<compile_context>
chip_gen: v7x
topology: tpu7x:2x2x1
jax: 0.10.0
libtpu: 0.0.40
codegen_flags: <defaults>
</compile_context>

<pallas_src>
import functools

import numpy as np

import jax
import jax.numpy as jnp
from jax import lax
from jax.experimental import pallas as pl
from jax.experimental.pallas import tpu as pltpu


# ---------------------------------------------------------------------------
# Kernel
# ---------------------------------------------------------------------------
def _aspp_kernel(xp_ref, w_ref, scale_ref, shift_ref, o_ref, patch_ref, *,
                 TH, W_out, Cin, Cout, KH, KW, dil):
    """One (batch element, output-row block) step of conv + BN + ReLU.

    xp_ref    : (1, Hp, Wp, Cin)        padded NHWC input (resident across rows)
    w_ref     : (Cout, KH*KW*Cin)       conv weights
    scale_ref : (Cout, 1)               fused BN scale  (f32)
    shift_ref : (Cout, 1)               fused BN shift  (f32)
    o_ref     : (1, Cout, TH*W_out)     NCHW-flat, lane-dense output row block
    patch_ref : (TH*W_out, KH*KW*Cin)   2-D VMEM scratch for the im2col patches
    """
    r = pl.program_id(1)
    row0 = pl.multiple_of(r * TH, TH)

    # In-kernel im2col: each tap is a statically shifted (TH, W_out, Cin) slab
    # of the VMEM-resident window, written at its feature (lane) offset as a
    # (TH*W_out, Cin) slab of the 2-D patch matrix.
    for kh in range(KH):
        for kw in range(KW):
            off = (kh * KW + kw) * Cin
            tap = xp_ref[0, pl.ds(row0 + kh * dil, TH),
                         kw * dil:kw * dil + W_out, :]
            patch_ref[:, off:off + Cin] = tap.reshape(TH * W_out, Cin)

    # Single fused-K MXU push: (Cout, K) x (TH*W_out, K)^T -> (Cout, TH*W_out)
    # with f32 accumulation.  Keeping the weights as LHS keeps the output
    # lane-dense (last dim TH*W_out, a multiple of 128) -> unmasked stores.
    y = lax.dot_general(w_ref[...], patch_ref[...],
                        dimension_numbers=(((1,), (1,)), ((), ())),
                        preferred_element_type=jnp.float32)
    y = jnp.maximum(y * scale_ref[...] + shift_ref[...], 0.0)   # BN + ReLU, f32
    o_ref[0] = y.astype(o_ref.dtype)


# ---------------------------------------------------------------------------
# Block sizing helpers
# ---------------------------------------------------------------------------
def _round_up(x, m):
    return -(-x // m) * m


def _tile_bytes(shape, itemsize):
    """Crude VMEM footprint of one tile, including (8, 128) layout padding."""
    if len(shape) == 1:
        return _round_up(shape[0], 128) * itemsize
    lead = 1
    for d in shape[:-2]:
        lead *= d
    return lead * _round_up(shape[-2], 8) * _round_up(shape[-1], 128) * itemsize


def _pick_row_block(h_out, w_out, step_bytes_fn, resident_bytes, budget):
    """Largest row-block height TH (dividing h_out) that fits the VMEM budget.

    Preference (perf review): TH*w_out a multiple of 256 and >= 512 (fills the
    256-wide MXU on v6e/v7x, large output DMAs), then any multiple of 128
    (dense output lanes), then the largest TH that fits at all.  Falls back to
    the full-extent block (always a legal BlockSpec) if nothing fits.
    """
    fitting = [th for th in range(h_out, 0, -1)
               if h_out % th == 0
               and resident_bytes + step_bytes_fn(th) <= budget]
    if not fitting:
        return h_out

    def score(th):
        lanes = th * w_out
        return (lanes % 256 == 0 and lanes >= 512, lanes % 128 == 0, th)

    return max(fitting, key=score)


# ---------------------------------------------------------------------------
# Wrapper
# ---------------------------------------------------------------------------
def aspp_module(x_nchw, weight_oihw, gamma, beta, running_mean, running_var,
                *, padding, dilation, eps=1e-5, compute_dtype=jnp.float32):
    """Forward pass of _ASPPModule (eval-mode BatchNorm).  NCHW in / NCHW out."""
    N, Cin, H, W = x_nchw.shape
    Cout, Cin2, KH, KW = weight_oihw.shape
    assert Cin == Cin2
    # Exact stride-1 dilated-conv output size (matches the PyTorch layer).
    H_out = H + 2 * padding - dilation * (KH - 1)
    W_out = W + 2 * padding - dilation * (KW - 1)
    assert H_out > 0 and W_out > 0, "conv output must be non-empty"

    # ---- wrapper glue: layout, halo padding, parameter preparation ----
    # TODO(synk): keep the surrounding model NHWC end-to-end so this transpose
    #   and the jnp.pad halo pass disappear as well.
    x_nhwc = jnp.transpose(x_nchw, (0, 2, 3, 1))                 # NCHW -> NHWC
    xp = jnp.pad(x_nhwc,
                 ((0, 0), (padding, padding), (padding, padding), (0, 0)))
    xp = xp.astype(compute_dtype)
    Hp, Wp = xp.shape[1], xp.shape[2]

    inv_std = 1.0 / jnp.sqrt(running_var.astype(jnp.float32) + eps)
    scale = (gamma.astype(jnp.float32) * inv_std).reshape(Cout, 1)
    shift = (beta.astype(jnp.float32).reshape(Cout, 1)
             - running_mean.astype(jnp.float32).reshape(Cout, 1) * scale)
    # (Cout, Cin, KH, KW) -> (Cout, KH*KW*Cin)  (tap-major, channel-minor).
    K = KH * KW * Cin
    w_t = jnp.transpose(weight_oihw, (0, 2, 3, 1)).reshape(Cout, K)
    w_t = w_t.astype(compute_dtype)

    # ---- block sizing from the actual VMEM footprint ----
    in_isz = np.dtype(compute_dtype).itemsize
    out_isz = np.dtype(x_nchw.dtype).itemsize
    resident = (_tile_bytes((Hp, Wp, Cin), in_isz)     # padded image, Buffered(1)
                + _tile_bytes((Cout, K), in_isz)       # weights,      Buffered(1)
                + 2 * _tile_bytes((Cout, 1), 4))       # BN scale + shift

    def step_bytes(th):
        lanes = th * W_out
        return (_tile_bytes((lanes, K), in_isz)              # patch scratch
                + 2 * _tile_bytes((Cout, lanes), out_isz))   # 2x-buffered out

    VMEM_SOFT_BUDGET = 40 * 1024 * 1024
    TH = _pick_row_block(H_out, W_out, step_bytes, resident, VMEM_SOFT_BUDGET)
    grid = (N, H_out // TH)

    # Scoped-VMEM request derived from the chosen blocks (x2 on the resident
    # operands covers the no-Buffered(1) fallback).  Clamp at 64 MiB so the
    # same request is legal on v7x; v5e/v6e (128 MiB physical) could go higher.
    vmem_limit = int(min(64 * 1024 * 1024,
                         max(32 * 1024 * 1024,
                             2 * (2 * resident + step_bytes(TH)))))

    kernel = functools.partial(_aspp_kernel, TH=TH, W_out=W_out, Cin=Cin,
                               Cout=Cout, KH=KH, KW=KW, dil=dilation)

    # Shard the batch axis (not the row axis) across megacore / v7x's two TCs
    # when N >= 2 so each core fetches each padded image only once.
    row_sem = "parallel" if N == 1 else "arbitrary"

    def build(use_buffered):
        def in_spec(shape, index_map):
            if use_buffered and hasattr(pl, "Buffered"):
                # Constant-per-step operands: single-buffer them (default
                # double-buffering only doubles their VMEM footprint).
                return pl.BlockSpec(shape, index_map,
                                    pipeline_mode=pl.Buffered(1))
            return pl.BlockSpec(shape, index_map)

        return pl.pallas_call(
            kernel,
            out_shape=jax.ShapeDtypeStruct((N, Cout, H_out * W_out),
                                           x_nchw.dtype),
            grid_spec=pltpu.PrefetchScalarGridSpec(
                num_scalar_prefetch=0,
                grid=grid,
                in_specs=[
                    # Full padded image per batch element; index map constant
                    # in the row axis -> fetched once per n, VMEM-resident.
                    # TODO(synk): at production sizes switch to
                    #   memory_space=pl.ANY + manual halo-slab DMA (P4) so the
                    #   resident input shrinks to a few MB (critical on v7x).
                    in_spec((1, Hp, Wp, Cin), lambda n, r: (n, 0, 0, 0)),
                    in_spec((Cout, K), lambda n, r: (0, 0)),
                    in_spec((Cout, 1), lambda n, r: (0, 0)),
                    in_spec((Cout, 1), lambda n, r: (0, 0)),
                ],
                out_specs=pl.BlockSpec((1, Cout, TH * W_out),
                                       lambda n, r: (n, 0, r)),
                scratch_shapes=[pltpu.VMEM((TH * W_out, K), compute_dtype)],
            ),
            compiler_params=pltpu.CompilerParams(
                dimension_semantics=("parallel", row_sem),
                vmem_limit_bytes=vmem_limit),
        )

    try:
        out_flat = build(use_buffered=True)(xp, w_t, scale, shift)
    except Exception:
        # Some Pallas versions reject pipeline_mode / Buffered(1); retry with
        # the default double-buffering (identical semantics, more VMEM).
        out_flat = build(use_buffered=False)(xp, w_t, scale, shift)

    # NCHW-flat -> NCHW (contiguous reshape, no transpose pass).
    return out_flat.reshape(N, Cout, H_out, W_out)


# ---------------------------------------------------------------------------
# Pure-JAX reference (mirrors the PyTorch module)
# ---------------------------------------------------------------------------
def _reference(x_nchw, weight_oihw, gamma, beta, rmean, rvar,
               *, padding, dilation, eps=1e-5):
    y = lax.conv_general_dilated(
        x_nchw, weight_oihw, window_strides=(1, 1),
        padding=((padding, padding), (padding, padding)),
        rhs_dilation=(dilation, dilation),
        dimension_numbers=("NCHW", "OIHW", "NCHW"))
    inv_std = 1.0 / jnp.sqrt(rvar + eps)
    y = (y - rmean[None, :, None, None]) * (gamma * inv_std)[None, :, None, None] \
        + beta[None, :, None, None]
    return jnp.maximum(y, 0.0)


if __name__ == "__main__":
    # _ASPPModule(inplanes=4, planes=8, kernel_size=3, padding=2, dilation=2)
    N, Cin, H, W = 2, 4, 16, 16
    Cout, Ksz, pad, dil = 8, 3, 2, 2

    key = jax.random.PRNGKey(0)
    kx, kw = jax.random.split(key)

    # Test data is rounded through bf16 so the products in the kernel's MXU
    # matmul and in the XLA reference conv are bit-identical regardless of
    # which f32-matmul precision path (single bf16 pass vs multi-pass f32)
    # each side picks; only the f32 summation order can differ.
    x = jax.random.normal(kx, (N, Cin, H, W), dtype=jnp.float32)
    x = x.astype(jnp.bfloat16).astype(jnp.float32)

    # kaiming_normal_: std = sqrt(2 / fan_in), fan_in = Cin*K*K.
    fan_in = Cin * Ksz * Ksz
    weight = (jax.random.normal(kw, (Cout, Cin, Ksz, Ksz), dtype=jnp.float32)
              * jnp.sqrt(2.0 / fan_in))
    weight = weight.astype(jnp.bfloat16).astype(jnp.float32)

    # BatchNorm per _init_weight: weight=1, bias=0; default running stats.
    gamma = jnp.ones((Cout,), jnp.float32)
    beta = jnp.zeros((Cout,), jnp.float32)
    rmean = jnp.zeros((Cout,), jnp.float32)
    rvar = jnp.ones((Cout,), jnp.float32)

    compute_dtype = jnp.float32   # bf16 path available; keep f32 for the check
    out = aspp_module(x, weight, gamma, beta, rmean, rvar,
                      padding=pad, dilation=dil, compute_dtype=compute_dtype)
    out = jax.block_until_ready(out)

    ref = _reference(x, weight, gamma, beta, rmean, rvar,
                     padding=pad, dilation=dil)
    assert out.shape == (N, Cout, H, W), out.shape
    tol = 1e-4 if np.dtype(compute_dtype) == np.dtype(jnp.float32) else 2e-2
    err = float(jnp.max(jnp.abs(out - ref)))
    assert jnp.allclose(out, ref, rtol=tol, atol=tol), f"max abs err = {err}"

    print("KERNEL_OK")
</pallas_src>

<mosaic_0001>
module attributes {stable_mosaic.version = 11 : i64} {
  func.func @_aspp_kernel(%arg0: i32, %arg1: i32, %arg2: memref<1x20x20x4xf32, #tpu.memory_space<vmem>>, %arg3: memref<8x36xf32, #tpu.memory_space<vmem>>, %arg4: memref<8x1xf32, #tpu.memory_space<vmem>>, %arg5: memref<8x1xf32, #tpu.memory_space<vmem>>, %arg6: memref<1x8x256xf32, #tpu.memory_space<vmem>>, %arg7: memref<256x36xf32, #tpu.memory_space<vmem>>) attributes {dimension_semantics = [#tpu.dimension_semantics<parallel>, #tpu.dimension_semantics<arbitrary>], iteration_bounds = array<i64: 2, 1>, scalar_prefetch = 0 : i64, scratch_operands = 1 : i64, tpu.core_type = #tpu.core_type<tc>, window_params = [{pipeline_mode = #tpu.pipeline_mode<synchronous>, transform_indices = @transform_0, window_bounds = array<i64: 1, 20, 20, 4>}, {pipeline_mode = #tpu.pipeline_mode<synchronous>, transform_indices = @transform_1, window_bounds = array<i64: 8, 36>}, {pipeline_mode = #tpu.pipeline_mode<synchronous>, transform_indices = @transform_2, window_bounds = array<i64: 8, 1>}, {pipeline_mode = #tpu.pipeline_mode<synchronous>, transform_indices = @transform_3, window_bounds = array<i64: 8, 1>}, {transform_indices = @transform_4, window_bounds = array<i64: 1, 8, 256>}]} {
    %c16_i32 = arith.constant 16 : i32
    %0 = arith.muli %arg1, %c16_i32 : i32
    %1 = tpu.assume_multiple %0, 16 : i32
    %c0_i32 = arith.constant 0 : i32
    %2 = arith.addi %1, %c0_i32 : i32
    %c0 = arith.constant 0 : index
    %3 = arith.index_cast %2 : i32 to index
    %c0_0 = arith.constant 0 : index
    %c0_1 = arith.constant 0 : index
    %4 = vector.load %arg2[%c0, %3, %c0_0, %c0_1] : memref<1x20x20x4xf32, #tpu.memory_space<vmem>>, vector<1x16x16x4xf32>
    %5 = vector.shape_cast %4 : vector<1x16x16x4xf32> to vector<16x16x4xf32>
    %6 = vector.shape_cast %5 : vector<16x16x4xf32> to vector<256x4xf32>
    %c0_2 = arith.constant 0 : index
    %c0_3 = arith.constant 0 : index
    %7 = vector.load %arg7[%c0_2, %c0_3] : memref<256x36xf32, #tpu.memory_space<vmem>>, vector<256x4xf32>
    tpu.vector_store %arg7[%c0_2, %c0_3], %6 {strides = array<i32>} : memref<256x36xf32, #tpu.memory_space<vmem>>, vector<256x4xf32>,
    %c0_i32_4 = arith.constant 0 : i32
    %8 = arith.addi %1, %c0_i32_4 : i32
    %c0_5 = arith.constant 0 : index
    %9 = arith.index_cast %8 : i32 to index
    %c2 = arith.constant 2 : index
    %c0_6 = arith.constant 0 : index
    %10 = vector.load %arg2[%c0_5, %9, %c2, %c0_6] : memref<1x20x20x4xf32, #tpu.memory_space<vmem>>, vector<1x16x16x4xf32>
    %11 = vector.shape_cast %10 : vector<1x16x16x4xf32> to vector<16x16x4xf32>
    %12 = vector.shape_cast %11 : vector<16x16x4xf32> to vector<256x4xf32>
    %c0_7 = arith.constant 0 : index
    %c4 = arith.constant 4 : index
    %13 = vector.load %arg7[%c0_7, %c4] : memref<256x36xf32, #tpu.memory_space<vmem>>, vector<256x4xf32>
    tpu.vector_store %arg7[%c0_7, %c4], %12 {strides = array<i32>} : memref<256x36xf32, #tpu.memory_space<vmem>>, vector<256x4xf32>,
    %c0_i32_8 = arith.constant 0 : i32
    %14 = arith.addi %1, %c0_i32_8 : i32
    %c0_9 = arith.constant 0 : index
    %15 = arith.index_cast %14 : i32 to index
    %c4_10 = arith.constant 4 : index
    %c0_11 = arith.constant 0 : index
    %16 = vector.load %arg2[%c0_9, %15, %c4_10, %c0_11] : memref<1x20x20x4xf32, #tpu.memory_space<vmem>>, vector<1x16x16x4xf32>
    %17 = vector.shape_cast %16 : vector<1x16x16x4xf32> to vector<16x16x4xf32>
    %18 = vector.shape_cast %17 : vector<16x16x4xf32> to vector<256x4xf32>
    %c0_12 = arith.constant 0 : index
    %c8 = arith.constant 8 : index
    %19 = vector.load %arg7[%c0_12, %c8] : memref<256x36xf32, #tpu.memory_space<vmem>>, vector<256x4xf32>
    tpu.vector_store %arg7[%c0_12, %c8], %18 {strides = array<i32>} : memref<256x36xf32, #tpu.memory_space<vmem>>, vector<256x4xf32>,
    %c2_i32 = arith.constant 2 : i32
    %20 = arith.addi %1, %c2_i32 : i32
    %c0_13 = arith.constant 0 : index
    %21 = arith.index_cast %20 : i32 to index
    %c0_14 = arith.constant 0 : index
    %c0_15 = arith.constant 0 : index
    %22 = vector.load %arg2[%c0_13, %21, %c0_14, %c0_15] : memref<1x20x20x4xf32, #tpu.memory_space<vmem>>, vector<1x16x16x4xf32>
    %23 = vector.shape_cast %22 : vector<1x16x16x4xf32> to vector<16x16x4xf32>
    %24 = vector.shape_cast %23 : vector<16x16x4xf32> to vector<256x4xf32>
    %c0_16 = arith.constant 0 : index
    %c12 = arith.constant 12 : index
    %25 = vector.load %arg7[%c0_16, %c12] : memref<256x36xf32, #tpu.memory_space<vmem>>, vector<256x4xf32>
    tpu.vector_store %arg7[%c0_16, %c12], %24 {strides = array<i32>} : memref<256x36xf32, #tpu.memory_space<vmem>>, vector<256x4xf32>,
    %c2_i32_17 = arith.constant 2 : i32
    %26 = arith.addi %1, %c2_i32_17 : i32
    %c0_18 = arith.constant 0 : index
    %27 = arith.index_cast %26 : i32 to index
    %c2_19 = arith.constant 2 : index
    %c0_20 = arith.constant 0 : index
    %28 = vector.load %arg2[%c0_18, %27, %c2_19, %c0_20] : memref<1x20x20x4xf32, #tpu.memory_space<vmem>>, vector<1x16x16x4xf32>
    %29 = vector.shape_cast %28 : vector<1x16x16x4xf32> to vector<16x16x4xf32>
    %30 = vector.shape_cast %29 : vector<16x16x4xf32> to vector<256x4xf32>
    %c0_21 = arith.constant 0 : index
    %c16 = arith.constant 16 : index
    %31 = vector.load %arg7[%c0_21, %c16] : memref<256x36xf32, #tpu.memory_space<vmem>>, vector<256x4xf32>
    tpu.vector_store %arg7[%c0_21, %c16], %30 {strides = array<i32>} : memref<256x36xf32, #tpu.memory_space<vmem>>, vector<256x4xf32>,
    %c2_i32_22 = arith.constant 2 : i32
    %32 = arith.addi %1, %c2_i32_22 : i32
    %c0_23 = arith.constant 0 : index
    %33 = arith.index_cast %32 : i32 to index
    %c4_24 = arith.constant 4 : index
    %c0_25 = arith.constant 0 : index
    %34 = vector.load %arg2[%c0_23, %33, %c4_24, %c0_25] : memref<1x20x20x4xf32, #tpu.memory_space<vmem>>, vector<1x16x16x4xf32>
    %35 = vector.shape_cast %34 : vector<1x16x16x4xf32> to vector<16x16x4xf32>
    %36 = vector.shape_cast %35 : vector<16x16x4xf32> to vector<256x4xf32>
    %c0_26 = arith.constant 0 : index
    %c20 = arith.constant 20 : index
    %37 = vector.load %arg7[%c0_26, %c20] : memref<256x36xf32, #tpu.memory_space<vmem>>, vector<256x4xf32>
    tpu.vector_store %arg7[%c0_26, %c20], %36 {strides = array<i32>} : memref<256x36xf32, #tpu.memory_space<vmem>>, vector<256x4xf32>,
    %c4_i32 = arith.constant 4 : i32
    %38 = arith.addi %1, %c4_i32 : i32
    %c0_27 = arith.constant 0 : index
    %39 = arith.index_cast %38 : i32 to index
    %c0_28 = arith.constant 0 : index
    %c0_29 = arith.constant 0 : index
    %40 = vector.load %arg2[%c0_27, %39, %c0_28, %c0_29] : memref<1x20x20x4xf32, #tpu.memory_space<vmem>>, vector<1x16x16x4xf32>
    %41 = vector.shape_cast %40 : vector<1x16x16x4xf32> to vector<16x16x4xf32>
    %42 = vector.shape_cast %41 : vector<16x16x4xf32> to vector<256x4xf32>
    %c0_30 = arith.constant 0 : index
    %c24 = arith.constant 24 : index
    %43 = vector.load %arg7[%c0_30, %c24] : memref<256x36xf32, #tpu.memory_space<vmem>>, vector<256x4xf32>
    tpu.vector_store %arg7[%c0_30, %c24], %42 {strides = array<i32>} : memref<256x36xf32, #tpu.memory_space<vmem>>, vector<256x4xf32>,
    %c4_i32_31 = arith.constant 4 : i32
    %44 = arith.addi %1, %c4_i32_31 : i32
    %c0_32 = arith.constant 0 : index
    %45 = arith.index_cast %44 : i32 to index
    %c2_33 = arith.constant 2 : index
    %c0_34 = arith.constant 0 : index
    %46 = vector.load %arg2[%c0_32, %45, %c2_33, %c0_34] : memref<1x20x20x4xf32, #tpu.memory_space<vmem>>, vector<1x16x16x4xf32>
    %47 = vector.shape_cast %46 : vector<1x16x16x4xf32> to vector<16x16x4xf32>
    %48 = vector.shape_cast %47 : vector<16x16x4xf32> to vector<256x4xf32>
    %c0_35 = arith.constant 0 : index
    %c28 = arith.constant 28 : index
    %49 = vector.load %arg7[%c0_35, %c28] : memref<256x36xf32, #tpu.memory_space<vmem>>, vector<256x4xf32>
    tpu.vector_store %arg7[%c0_35, %c28], %48 {strides = array<i32>} : memref<256x36xf32, #tpu.memory_space<vmem>>, vector<256x4xf32>,
    %c4_i32_36 = arith.constant 4 : i32
    %50 = arith.addi %1, %c4_i32_36 : i32
    %c0_37 = arith.constant 0 : index
    %51 = arith.index_cast %50 : i32 to index
    %c4_38 = arith.constant 4 : index
    %c0_39 = arith.constant 0 : index
    %52 = vector.load %arg2[%c0_37, %51, %c4_38, %c0_39] : memref<1x20x20x4xf32, #tpu.memory_space<vmem>>, vector<1x16x16x4xf32>
    %53 = vector.shape_cast %52 : vector<1x16x16x4xf32> to vector<16x16x4xf32>
    %54 = vector.shape_cast %53 : vector<16x16x4xf32> to vector<256x4xf32>
    %c0_40 = arith.constant 0 : index
    %c32 = arith.constant 32 : index
    %55 = vector.load %arg7[%c0_40, %c32] : memref<256x36xf32, #tpu.memory_space<vmem>>, vector<256x4xf32>
    tpu.vector_store %arg7[%c0_40, %c32], %54 {strides = array<i32>} : memref<256x36xf32, #tpu.memory_space<vmem>>, vector<256x4xf32>,
    %c0_41 = arith.constant 0 : index
    %c0_42 = arith.constant 0 : index
    %56 = vector.load %arg3[%c0_41, %c0_42] : memref<8x36xf32, #tpu.memory_space<vmem>>, vector<8x36xf32>
    %c0_43 = arith.constant 0 : index
    %c0_44 = arith.constant 0 : index
    %57 = vector.load %arg7[%c0_43, %c0_44] : memref<256x36xf32, #tpu.memory_space<vmem>>, vector<256x36xf32>
    %cst = arith.constant dense<0.000000e+00> : vector<8x256xf32>
    %58 = tpu.matmul %56, %57, %cst {dimension_numbers = #tpu.dot_dimension_numbers<[1], [1], [0], [0], [0, 0, 1, 0], [], []>} : vector<8x36xf32>, vector<256x36xf32>, vector<8x256xf32> -> vector<8x256xf32>
    %c0_45 = arith.constant 0 : index
    %c0_46 = arith.constant 0 : index
    %59 = vector.load %arg4[%c0_45, %c0_46] : memref<8x1xf32, #tpu.memory_space<vmem>>, vector<8x1xf32>
    %60 = vector.broadcast %59 : vector<8x1xf32> to vector<8x256xf32>
    %61 = arith.mulf %58, %60 : vector<8x256xf32>
    %c0_47 = arith.constant 0 : index
    %c0_48 = arith.constant 0 : index
    %62 = vector.load %arg5[%c0_47, %c0_48] : memref<8x1xf32, #tpu.memory_space<vmem>>, vector<8x1xf32>
    %63 = vector.broadcast %62 : vector<8x1xf32> to vector<8x256xf32>
    %64 = arith.addf %61, %63 : vector<8x256xf32>
    %cst_49 = arith.constant 0.000000e+00 : f32
    %65 = vector.broadcast %cst_49 : f32 to vector<8x256xf32>
    %66 = arith.maximumf %64, %65 : vector<8x256xf32>
    %c0_50 = arith.constant 0 : index
    %c0_51 = arith.constant 0 : index
    %c0_52 = arith.constant 0 : index
    %67 = vector.load %arg6[%c0_50, %c0_51, %c0_52] : memref<1x8x256xf32, #tpu.memory_space<vmem>>, vector<1x8x256xf32>
    %68 = vector.shape_cast %67 : vector<1x8x256xf32> to vector<8x256xf32>
    %69 = vector.shape_cast %66 : vector<8x256xf32> to vector<1x8x256xf32>
    tpu.vector_store %arg6[%c0_50, %c0_51, %c0_52], %69 {strides = array<i32>} : memref<1x8x256xf32, #tpu.memory_space<vmem>>, vector<1x8x256xf32>,
    return
  }
  func.func @transform_0(%arg0: i32, %arg1: i32) -> (i32, i32, i32, i32) {
    %c0_i32 = arith.constant 0 : i32
    %c0_i32_0 = arith.constant 0 : i32
    %c0_i32_1 = arith.constant 0 : i32
    %c0_i32_2 = arith.constant 0 : i32
    return %arg0, %c0_i32, %c0_i32_0, %c0_i32_1 : i32, i32, i32, i32
  }
  func.func @transform_1(%arg0: i32, %arg1: i32) -> (i32, i32) {
    %c0_i32 = arith.constant 0 : i32
    %c0_i32_0 = arith.constant 0 : i32
    %c0_i32_1 = arith.constant 0 : i32
    return %c0_i32, %c0_i32_0 : i32, i32
  }
  func.func @transform_2(%arg0: i32, %arg1: i32) -> (i32, i32) {
    %c0_i32 = arith.constant 0 : i32
    %c0_i32_0 = arith.constant 0 : i32
    %c0_i32_1 = arith.constant 0 : i32
    return %c0_i32, %c0_i32_0 : i32, i32
  }
  func.func @transform_3(%arg0: i32, %arg1: i32) -> (i32, i32) {
    %c0_i32 = arith.constant 0 : i32
    %c0_i32_0 = arith.constant 0 : i32
    %c0_i32_1 = arith.constant 0 : i32
    return %c0_i32, %c0_i32_0 : i32, i32
  }
  func.func @transform_4(%arg0: i32, %arg1: i32) -> (i32, i32, i32) {
    %c0_i32 = arith.constant 0 : i32
    %c0_i32_0 = arith.constant 0 : i32
    return %arg0, %c0_i32, %arg1 : i32, i32, i32
  }
}

module attributes {stable_mosaic.version = 11 : i64} {
  func.func @_aspp_kernel(%arg0: i32, %arg1: i32, %arg2: memref<1x20x20x4xf32, #tpu.memory_space<vmem>>, %arg3: memref<8x36xf32, #tpu.memory_space<vmem>>, %arg4: memref<8x1xf32, #tpu.memory_space<vmem>>, %arg5: memref<8x1xf32, #tpu.memory_space<vmem>>, %arg6: memref<1x8x256xf32, #tpu.memory_space<vmem>>, %arg7: memref<256x36xf32, #tpu.memory_space<vmem>>) attributes {dimension_semantics = [#tpu.dimension_semantics<parallel>, #tpu.dimension_semantics<arbitrary>], iteration_bounds = array<i64: 2, 1>, scalar_prefetch = 0 : i64, scratch_operands = 1 : i64, tpu.core_type = #tpu.core_type<tc>, window_params = [{transform_indices = @transform_0, window_bounds = array<i64: 1, 20, 20, 4>}, {pipeline_mode = #tpu.pipeline_mode<synchronous>, transform_indices = @transform_1, window_bounds = array<i64: 8, 36>}, {pipeline_mode = #tpu.pipeline_mode<synchronous>, transform_indices = @transform_2, window_bounds = array<i64: 8, 1>}, {pipeline_mode = #tpu.pipeline_mode<synchronous>, transform_indices = @transform_3, window_bounds = array<i64: 8, 1>}, {transform_indices = @transform_4, window_bounds = array<i64: 1, 8, 256>}]} {
    %c16_i32 = arith.constant 16 : i32
    %0 = arith.muli %arg1, %c16_i32 : i32
    %1 = tpu.assume_multiple %0, 16 : i32
    %c0_i32 = arith.constant 0 : i32
    %2 = arith.addi %1, %c0_i32 : i32
    %c0 = arith.constant 0 : index
    %3 = arith.index_cast %2 : i32 to index
    %c0_0 = arith.constant 0 : index
    %c0_1 = arith.constant 0 : index
    %4 = vector.load %arg2[%c0, %3, %c0_0, %c0_1] : memref<1x20x20x4xf32, #tpu.memory_space<vmem>>, vector<1x16x16x4xf32>
    %5 = vector.shape_cast %4 : vector<1x16x16x4xf32> to vector<16x16x4xf32>
    %6 = vector.shape_cast %5 : vector<16x16x4xf32> to vector<256x4xf32>
    %c0_2 = arith.constant 0 : index
    %c0_3 = arith.constant 0 : index
    %7 = vector.load %arg7[%c0_2, %c0_3] : memref<256x36xf32, #tpu.memory_space<vmem>>, vector<256x4xf32>
    tpu.vector_store %arg7[%c0_2, %c0_3], %6 {strides = array<i32>} : memref<256x36xf32, #tpu.memory_space<vmem>>, vector<256x4xf32>,
    %c0_i32_4 = arith.constant 0 : i32
    %8 = arith.addi %1, %c0_i32_4 : i32
    %c0_5 = arith.constant 0 : index
    %9 = arith.index_cast %8 : i32 to index
    %c2 = arith.constant 2 : index
    %c0_6 = arith.constant 0 : index
    %10 = vector.load %arg2[%c0_5, %9, %c2, %c0_6] : memref<1x20x20x4xf32, #tpu.memory_space<vmem>>, vector<1x16x16x4xf32>
    %11 = vector.shape_cast %10 : vector<1x16x16x4xf32> to vector<16x16x4xf32>
    %12 = vector.shape_cast %11 : vector<16x16x4xf32> to vector<256x4xf32>
    %c0_7 = arith.constant 0 : index
    %c4 = arith.constant 4 : index
    %13 = vector.load %arg7[%c0_7, %c4] : memref<256x36xf32, #tpu.memory_space<vmem>>, vector<256x4xf32>
    tpu.vector_store %arg7[%c0_7, %c4], %12 {strides = array<i32>} : memref<256x36xf32, #tpu.memory_space<vmem>>, vector<256x4xf32>,
    %c0_i32_8 = arith.constant 0 : i32
    %14 = arith.addi %1, %c0_i32_8 : i32
    %c0_9 = arith.constant 0 : index
    %15 = arith.index_cast %14 : i32 to index
    %c4_10 = arith.constant 4 : index
    %c0_11 = arith.constant 0 : index
    %16 = vector.load %arg2[%c0_9, %15, %c4_10, %c0_11] : memref<1x20x20x4xf32, #tpu.memory_space<vmem>>, vector<1x16x16x4xf32>
    %17 = vector.shape_cast %16 : vector<1x16x16x4xf32> to vector<16x16x4xf32>
    %18 = vector.shape_cast %17 : vector<16x16x4xf32> to vector<256x4xf32>
    %c0_12 = arith.constant 0 : index
    %c8 = arith.constant 8 : index
    %19 = vector.load %arg7[%c0_12, %c8] : memref<256x36xf32, #tpu.memory_space<vmem>>, vector<256x4xf32>
    tpu.vector_store %arg7[%c0_12, %c8], %18 {strides = array<i32>} : memref<256x36xf32, #tpu.memory_space<vmem>>, vector<256x4xf32>,
    %c2_i32 = arith.constant 2 : i32
    %20 = arith.addi %1, %c2_i32 : i32
    %c0_13 = arith.constant 0 : index
    %21 = arith.index_cast %20 : i32 to index
    %c0_14 = arith.constant 0 : index
    %c0_15 = arith.constant 0 : index
    %22 = vector.load %arg2[%c0_13, %21, %c0_14, %c0_15] : memref<1x20x20x4xf32, #tpu.memory_space<vmem>>, vector<1x16x16x4xf32>
    %23 = vector.shape_cast %22 : vector<1x16x16x4xf32> to vector<16x16x4xf32>
    %24 = vector.shape_cast %23 : vector<16x16x4xf32> to vector<256x4xf32>
    %c0_16 = arith.constant 0 : index
    %c12 = arith.constant 12 : index
    %25 = vector.load %arg7[%c0_16, %c12] : memref<256x36xf32, #tpu.memory_space<vmem>>, vector<256x4xf32>
    tpu.vector_store %arg7[%c0_16, %c12], %24 {strides = array<i32>} : memref<256x36xf32, #tpu.memory_space<vmem>>, vector<256x4xf32>,
    %c2_i32_17 = arith.constant 2 : i32
    %26 = arith.addi %1, %c2_i32_17 : i32
    %c0_18 = arith.constant 0 : index
    %27 = arith.index_cast %26 : i32 to index
    %c2_19 = arith.constant 2 : index
    %c0_20 = arith.constant 0 : index
    %28 = vector.load %arg2[%c0_18, %27, %c2_19, %c0_20] : memref<1x20x20x4xf32, #tpu.memory_space<vmem>>, vector<1x16x16x4xf32>
    %29 = vector.shape_cast %28 : vector<1x16x16x4xf32> to vector<16x16x4xf32>
    %30 = vector.shape_cast %29 : vector<16x16x4xf32> to vector<256x4xf32>
    %c0_21 = arith.constant 0 : index
    %c16 = arith.constant 16 : index
    %31 = vector.load %arg7[%c0_21, %c16] : memref<256x36xf32, #tpu.memory_space<vmem>>, vector<256x4xf32>
    tpu.vector_store %arg7[%c0_21, %c16], %30 {strides = array<i32>} : memref<256x36xf32, #tpu.memory_space<vmem>>, vector<256x4xf32>,
    %c2_i32_22 = arith.constant 2 : i32
    %32 = arith.addi %1, %c2_i32_22 : i32
    %c0_23 = arith.constant 0 : index
    %33 = arith.index_cast %32 : i32 to index
    %c4_24 = arith.constant 4 : index
    %c0_25 = arith.constant 0 : index
    %34 = vector.load %arg2[%c0_23, %33, %c4_24, %c0_25] : memref<1x20x20x4xf32, #tpu.memory_space<vmem>>, vector<1x16x16x4xf32>
    %35 = vector.shape_cast %34 : vector<1x16x16x4xf32> to vector<16x16x4xf32>
    %36 = vector.shape_cast %35 : vector<16x16x4xf32> to vector<256x4xf32>
    %c0_26 = arith.constant 0 : index
    %c20 = arith.constant 20 : index
    %37 = vector.load %arg7[%c0_26, %c20] : memref<256x36xf32, #tpu.memory_space<vmem>>, vector<256x4xf32>
    tpu.vector_store %arg7[%c0_26, %c20], %36 {strides = array<i32>} : memref<256x36xf32, #tpu.memory_space<vmem>>, vector<256x4xf32>,
    %c4_i32 = arith.constant 4 : i32
    %38 = arith.addi %1, %c4_i32 : i32
    %c0_27 = arith.constant 0 : index
    %39 = arith.index_cast %38 : i32 to index
    %c0_28 = arith.constant 0 : index
    %c0_29 = arith.constant 0 : index
    %40 = vector.load %arg2[%c0_27, %39, %c0_28, %c0_29] : memref<1x20x20x4xf32, #tpu.memory_space<vmem>>, vector<1x16x16x4xf32>
    %41 = vector.shape_cast %40 : vector<1x16x16x4xf32> to vector<16x16x4xf32>
    %42 = vector.shape_cast %41 : vector<16x16x4xf32> to vector<256x4xf32>
    %c0_30 = arith.constant 0 : index
    %c24 = arith.constant 24 : index
    %43 = vector.load %arg7[%c0_30, %c24] : memref<256x36xf32, #tpu.memory_space<vmem>>, vector<256x4xf32>
    tpu.vector_store %arg7[%c0_30, %c24], %42 {strides = array<i32>} : memref<256x36xf32, #tpu.memory_space<vmem>>, vector<256x4xf32>,
    %c4_i32_31 = arith.constant 4 : i32
    %44 = arith.addi %1, %c4_i32_31 : i32
    %c0_32 = arith.constant 0 : index
    %45 = arith.index_cast %44 : i32 to index
    %c2_33 = arith.constant 2 : index
    %c0_34 = arith.constant 0 : index
    %46 = vector.load %arg2[%c0_32, %45, %c2_33, %c0_34] : memref<1x20x20x4xf32, #tpu.memory_space<vmem>>, vector<1x16x16x4xf32>
    %47 = vector.shape_cast %46 : vector<1x16x16x4xf32> to vector<16x16x4xf32>
    %48 = vector.shape_cast %47 : vector<16x16x4xf32> to vector<256x4xf32>
    %c0_35 = arith.constant 0 : index
    %c28 = arith.constant 28 : index
    %49 = vector.load %arg7[%c0_35, %c28] : memref<256x36xf32, #tpu.memory_space<vmem>>, vector<256x4xf32>
    tpu.vector_store %arg7[%c0_35, %c28], %48 {strides = array<i32>} : memref<256x36xf32, #tpu.memory_space<vmem>>, vector<256x4xf32>,
    %c4_i32_36 = arith.constant 4 : i32
    %50 = arith.addi %1, %c4_i32_36 : i32
    %c0_37 = arith.constant 0 : index
    %51 = arith.index_cast %50 : i32 to index
    %c4_38 = arith.constant 4 : index
    %c0_39 = arith.constant 0 : index
    %52 = vector.load %arg2[%c0_37, %51, %c4_38, %c0_39] : memref<1x20x20x4xf32, #tpu.memory_space<vmem>>, vector<1x16x16x4xf32>
    %53 = vector.shape_cast %52 : vector<1x16x16x4xf32> to vector<16x16x4xf32>
    %54 = vector.shape_cast %53 : vector<16x16x4xf32> to vector<256x4xf32>
    %c0_40 = arith.constant 0 : index
    %c32 = arith.constant 32 : index
    %55 = vector.load %arg7[%c0_40, %c32] : memref<256x36xf32, #tpu.memory_space<vmem>>, vector<256x4xf32>
    tpu.vector_store %arg7[%c0_40, %c32], %54 {strides = array<i32>} : memref<256x36xf32, #tpu.memory_space<vmem>>, vector<256x4xf32>,
    %c0_41 = arith.constant 0 : index
    %c0_42 = arith.constant 0 : index
    %56 = vector.load %arg3[%c0_41, %c0_42] : memref<8x36xf32, #tpu.memory_space<vmem>>, vector<8x36xf32>
    %c0_43 = arith.constant 0 : index
    %c0_44 = arith.constant 0 : index
    %57 = vector.load %arg7[%c0_43, %c0_44] : memref<256x36xf32, #tpu.memory_space<vmem>>, vector<256x36xf32>
    %cst = arith.constant dense<0.000000e+00> : vector<8x256xf32>
    %58 = tpu.matmul %56, %57, %cst {dimension_numbers = #tpu.dot_dimension_numbers<[1], [1], [0], [0], [0, 0, 1, 0], [], []>} : vector<8x36xf32>, vector<256x36xf32>, vector<8x256xf32> -> vector<8x256xf32>
    %c0_45 = arith.constant 0 : index
    %c0_46 = arith.constant 0 : index
    %59 = vector.load %arg4[%c0_45, %c0_46] : memref<8x1xf32, #tpu.memory_space<vmem>>, vector<8x1xf32>
    %60 = vector.broadcast %59 : vector<8x1xf32> to vector<8x256xf32>
    %61 = arith.mulf %58, %60 : vector<8x256xf32>
    %c0_47 = arith.constant 0 : index
    %c0_48 = arith.constant 0 : index
    %62 = vector.load %arg5[%c0_47, %c0_48] : memref<8x1xf32, #tpu.memory_space<vmem>>, vector<8x1xf32>
    %63 = vector.broadcast %62 : vector<8x1xf32> to vector<8x256xf32>
    %64 = arith.addf %61, %63 : vector<8x256xf32>
    %cst_49 = arith.constant 0.000000e+00 : f32
    %65 = vector.broadcast %cst_49 : f32 to vector<8x256xf32>
    %66 = arith.maximumf %64, %65 : vector<8x256xf32>
    %c0_50 = arith.constant 0 : index
    %c0_51 = arith.constant 0 : index
    %c0_52 = arith.constant 0 : index
    %67 = vector.load %arg6[%c0_50, %c0_51, %c0_52] : memref<1x8x256xf32, #tpu.memory_space<vmem>>, vector<1x8x256xf32>
    %68 = vector.shape_cast %67 : vector<1x8x256xf32> to vector<8x256xf32>
    %69 = vector.shape_cast %66 : vector<8x256xf32> to vector<1x8x256xf32>
    tpu.vector_store %arg6[%c0_50, %c0_51, %c0_52], %69 {strides = array<i32>} : memref<1x8x256xf32, #tpu.memory_space<vmem>>, vector<1x8x256xf32>,
    return
  }
  func.func @transform_0(%arg0: i32, %arg1: i32) -> (i32, i32, i32, i32) {
    %c0_i32 = arith.constant 0 : i32
    %c0_i32_0 = arith.constant 0 : i32
    %c0_i32_1 = arith.constant 0 : i32
    %c0_i32_2 = arith.constant 0 : i32
    return %arg0, %c0_i32, %c0_i32_0, %c0_i32_1 : i32, i32, i32, i32
  }
  func.func @transform_1(%arg0: i32, %arg1: i32) -> (i32, i32) {
    %c0_i32 = arith.constant 0 : i32
    %c0_i32_0 = arith.constant 0 : i32
    %c0_i32_1 = arith.constant 0 : i32
    return %c0_i32, %c0_i32_0 : i32, i32
  }
  func.func @transform_2(%arg0: i32, %arg1: i32) -> (i32, i32) {
    %c0_i32 = arith.constant 0 : i32
    %c0_i32_0 = arith.constant 0 : i32
    %c0_i32_1 = arith.constant 0 : i32
    return %c0_i32, %c0_i32_0 : i32, i32
  }
  func.func @transform_3(%arg0: i32, %arg1: i32) -> (i32, i32) {
    %c0_i32 = arith.constant 0 : i32
    %c0_i32_0 = arith.constant 0 : i32
    %c0_i32_1 = arith.constant 0 : i32
    return %c0_i32, %c0_i32_0 : i32, i32
  }
  func.func @transform_4(%arg0: i32, %arg1: i32) -> (i32, i32, i32) {
    %c0_i32 = arith.constant 0 : i32
    %c0_i32_0 = arith.constant 0 : i32
    return %arg0, %c0_i32, %arg1 : i32, i32, i32
  }
}

</mosaic_0001>

<bundles_post_ra>
// kernel: tpu_custom_call.1
= control target key start
LH: loop header
LB: loop body
LE: loop exit
PB: predicated region body
PF: predicated region fallthrough
CT: control target
= control target key end

     0   :  { %9 = vsyncpa [#allocation4], 0  ;;  %s3941_s0 = inlined_call_operand.vmem [shape: f32[2,20,20,4], index: 0, kind: input, shape index: {}]   ;;  %s3942_s1 = inlined_call_operand.vmem [shape: f32[8,36], index: 1, kind: input, shape index: {}]   ;;  %s3943_s2 = inlined_call_operand.vmem [shape: f32[8,1], index: 2, kind: input, shape index: {}]   ;;  %s3944_s3 = inlined_call_operand.vmem [shape: f32[8,1], index: 3, kind: input, shape index: {}]   ;;  %s3945_s4 = inlined_call_operand.hbm [shape: f32[2,8,256], index: 4, kind: output, shape index: {}]  }
   0x1   :  { %11 = vsyncpa [#allocation4 + $0x1], 0  ;;  %s2654_s15 = smov 0   ;;  %s2656_s16 = smov 0  }
   0x2   :  { %s2658_s17 = smov 0   ;;  %s2660_s18 = smov 0  }
   0x3   :  { %s2662_s19 = smov 0   ;;  %s2664_s20 = smov 0  }
   0x4 LB: > { %s2153_s21 = sadd.s32 4294967295, %s2617_s20   ;;  %s2154_s22 = sadd.s32 4294967294, %s2617_s20   ;;  %s2617_s20 = sphi %s2664_s20, %s17_s20   ;;  %s2613_s19 = sphi %s2662_s19, %s3988_s19   ;;  %s2609_s18 = sphi %s2660_s18, %s3987_s18   ;;  %s2605_s17 = sphi %s2658_s17, %s3986_s17   ;;  %s2601_s16 = sphi %s2656_s16, %s3985_s16   ;;  %s2597_s15 = sphi %s2654_s15, %s3984_s15  }
   0x5   : > { %s29_s23 = sadd.s32 1, %s2613_s19  ;;  %s127_s24 = sadd.s32 1, %s2605_s17 }
   0x6   : > { %p31_p0 = scmp.ge.s32.totalorder %s29_s23, 2  ;;  %p137_p1 = scmp.ne.s32.totalorder %s2605_s17, %s2601_s16 }
   0x7   : > { %p138_p2 = scmp.eq.s32.totalorder %s2153_s21, 1  ;;  %p143_p3 = scmp.ne.s32.totalorder %s2601_s16, %s2597_s15 }
   0x8   : > { %s3990_s23 = smov (%p31_p0, %s29_s23), 0  ;;  %p144_p5 = scmp.eq.s32.totalorder %s2154_s22, 1 }
   0x9   : > { %p2694_p4 = por %p138_p2, %p137_p1  ;;  %s122_s26 = ssub.s32 %s2613_s19, %s3990_s23 }
   0xa   : > { %p2156_p6 = scmp.ge.s32.totalorder %s2617_s20, 1  ;;  %p125_p7 = scmp.eq.s32.totalorder %s122_s26, 0 }
   0xb   : > { %p2701_p8 = por %p144_p5, %p143_p3  ;;  %p179_p9 = scmp.lt.s32.totalorder %s2617_s20, 3 }
   0xc   : > { %s2707_s28 = scalar_select %p125_p7, %s2605_s17, %s127_s24  }
   0xd   : > { %p180_p10 = pnand %p2156_p6, %p179_p9 }
   0xf   : > { %183 = sbr.rel (%p180_p10) target bundleno = 903 (0x387), region = 36 }
  0x16   : > { %p205_p11 = scmp.lt.s32.totalorder %s2609_s18, 1  ;;  %s2619_s8 = smov 4   ;;  %vm246_vm0 = vcmask 31744   ;;  %vm439_vm1 = vcmask 64544   ;;  %vm632_vm2 = vcmask 97344   ;;  %vm828_vm3 = vcmask 130144  }
  0x17   : > { %s2620_s9 = smov 8   ;;  %s2621_s10 = smov 12   ;;  %vm1021_vm4 = vcmask 162944   ;;  %vm1214_vm5 = vcmask 195744   ;;  %vm1410_vm6 = vcmask 228544   ;;  %vm1603_vm7 = vcmask 261344  }
  0x18   : > { %s206_s29 = scalar_select %p205_p11, %s2609_s18, 1  ;;  %vm1796_vm8 = vcmask 294144   ;;  %vm1862_vm9 = vcmask 293888  }
  0x19   : > { %s2622_s11 = smov 16   ;;  %s2623_s12 = smov 20   ;;  %vm3420_vm10 = vmpackc.low %vm1862_vm9, %vm1862_vm9 }
  0x1a   : > { %s2472_s30 = smul.u32 480, %s206_s29  ;;  %s2624_s13 = smov 24  }
  0x1b   : > { %s2625_s14 = smov 28   ;;  %s2626_s21 = smov 32  }
  0x1c   : > { %s2714_s7 = scalar_lea.vmem %s3941_s0, %s2472_s30  ;;  %s202_s6 = sand.u32 1, %s2601_s16  }
  0x1d   : > { %v281_v0 = vld [vmem:[%s2714_s7 + $0x1a] sm:$0xff]  ;;  %v279_v1 = vld [vmem:[%s2714_s7 + $0x2] sm:$0xff]  ;;  %v280_v3 = vld [vmem:[%s2714_s7 + $0xa] sm:$0xff] }
  0x1e   : > { %347 = vrot.lane.b32.xlu1 %v281_v0, %s2619_s8  ;;  %343 = vrot.lane.b32.xlu0 %v279_v1, %s2619_s8  ;;  %v282_v2 = vld [vmem:[%s2714_s7 + $0x22] sm:$0xff]  ;;  %v2725_v4 = vld [vmem:[%s2714_s7 + $0x3a] sm:$0xff] }
  0x1f   : > { %v2728_v5 = vld [vmem:[%s2714_s7 + $0x32] sm:$0xff]  ;;  %v2738_v7 = vld [vmem:[%s2714_s7 + $0x4a] sm:$0xff]  ;;  %v2748_v9 = vld [vmem:[%s2714_s7 + $0x62] sm:$0xff] }
  0x20   : > { %v2735_v6 = vld [vmem:[%s2714_s7 + $0x52] sm:$0xff]  ;;  %v2745_v8 = vld [vmem:[%s2714_s7 + $0x6a] sm:$0xff]  ;;  %v2755_v10 = vld [vmem:[%s2714_s7 + $0x82] sm:$0xff] }
  0x21   : > { %v2758_v11 = vld [vmem:[%s2714_s7 + $0x7a] sm:$0xff]  ;;  %v2770_v15 = vld [vmem:[%s2714_s7 + $0x92] sm:$0xff]  ;;  %v215_v17 = vld [vmem:[%s2714_s7 + $0x8] sm:$0xff] }
  0x22   : > { %349 = vrot.lane.b32.xlu1 %v282_v2, %s2619_s8  ;;  %345 = vrot.lane.b32.xlu0 %v280_v3, %s2619_s8  ;;  %v216_v12 = vld [vmem:[%s2714_s7 + $0x18] sm:$0xff]  ;;  %v214_v13 = vld [vmem:[%s2714_s7] sm:$0xff]  ;;  %3963 = vst [vmem:[#allocation7_spill] sm:$0xff] %v2770_v15  ;;  %248 = vst.msk [vmem:[#allocation2 + $0x8] sm:$0xff] %vm246_vm0, %v215_v17 }
  0x23   : > { %v2767_v14 = vld [vmem:[%s2714_s7 + $0x9a] sm:$0xff]  ;;  %249 = vst.msk [vmem:[#allocation2 + $0x10] sm:$0xff] %vm246_vm0, %v216_v12  ;;  %247 = vst.msk [vmem:[#allocation2] sm:$0xff] %vm246_vm0, %v214_v13  ;;  %v294_v18 = vld [vmem:[%s2714_s7 + $0xb2] sm:$0xff] }
  0x24   : > { %3962 = vst [vmem:[#allocation6_spill] sm:$0xff] %v2767_v14  ;;  %v217_v16 = vld [vmem:[%s2714_s7 + $0x20] sm:$0xff]  ;;  %v2780_v19 = vld [vmem:[%s2714_s7 + $0x38] sm:$0xff]  ;;  %v2783_v20 = vld [vmem:[%s2714_s7 + $0x30] sm:$0xff] }
  0x25   : > { %250 = vst.msk [vmem:[#allocation2 + $0x18] sm:$0xff] %vm246_vm0, %v217_v16  ;;  %v293_v21 = vld [vmem:[%s2714_s7 + $0xaa] sm:$0xff]  ;;  %252 = vst.msk [vmem:[#allocation2 + $0x28] sm:$0xff] %vm246_vm0, %v2780_v19  ;;  %v2806_v25 = vld [vmem:[%s2714_s7 + $0x60] sm:$0xff] }
  0x26   : > { %353 = vrot.lane.b32.xlu1 %v2725_v4, %s2619_s8  ;;  %351 = vrot.lane.b32.xlu0 %v2728_v5, %s2619_s8  ;;  %251 = vst.msk [vmem:[#allocation2 + $0x20] sm:$0xff] %vm246_vm0, %v2783_v20  ;;  %v2795_v22 = vld [vmem:[%s2714_s7 + $0x50] sm:$0xff]  ;;  %v2800_v23 = vld [vmem:[%s2714_s7 + $0x48] sm:$0xff]  ;;  %255 = vst.msk [vmem:[#allocation2 + $0x40] sm:$0xff] %vm246_vm0, %v2806_v25 }
  0x27   : > { %254 = vst.msk [vmem:[#allocation2 + $0x38] sm:$0xff] %vm246_vm0, %v2795_v22  ;;  %v2803_v24 = vld [vmem:[%s2714_s7 + $0x68] sm:$0xff]  ;;  %253 = vst.msk [vmem:[#allocation2 + $0x30] sm:$0xff] %vm246_vm0, %v2800_v23  ;;  %v2815_v26 = vld [vmem:[%s2714_s7 + $0x80] sm:$0xff] }
  0x28   : > { %256 = vst.msk [vmem:[#allocation2 + $0x48] sm:$0xff] %vm246_vm0, %v2803_v24  ;;  %v2818_v27 = vld [vmem:[%s2714_s7 + $0x78] sm:$0xff]  ;;  %v296_v29 = vld [vmem:[%s2714_s7 + $0xca] sm:$0xff]  ;;  %v295_v30 = vld [vmem:[%s2714_s7 + $0xc2] sm:$0xff] }
  0x29   : > { %v2821_v28 = vld [vmem:[%s2714_s7 + $0x98] sm:$0xff]  ;;  %258 = vst.msk [vmem:[#allocation2 + $0x58] sm:$0xff] %vm246_vm0, %v2815_v26  ;;  %257 = vst.msk [vmem:[#allocation2 + $0x50] sm:$0xff] %vm246_vm0, %v2818_v27  ;;  %v2832_v31 = vld [vmem:[%s2714_s7 + $0x90] sm:$0xff] }
  0x2a   : > { %357 = vrot.lane.b32.xlu1 %v2735_v6, %s2619_s8  ;;  %355 = vrot.lane.b32.xlu0 %v2738_v7, %s2619_s8  ;;  %260 = vst.msk [vmem:[#allocation2 + $0x68] sm:$0xff] %vm246_vm0, %v2821_v28  ;;  %v2835_v32 = vld [vmem:[%s2714_s7 + $0xb0] sm:$0xff]  ;;  %v2838_v33 = vld [vmem:[%s2714_s7 + $0xa8] sm:$0xff]  ;;  %259 = vst.msk [vmem:[#allocation2 + $0x60] sm:$0xff] %vm246_vm0, %v2832_v31 }
  0x2b   : > { %262 = vst.msk [vmem:[#allocation2 + $0x78] sm:$0xff] %vm246_vm0, %v2835_v32  ;;  %261 = vst.msk [vmem:[#allocation2 + $0x70] sm:$0xff] %vm246_vm0, %v2838_v33  ;;  %v2849_v34 = vld [vmem:[%s2714_s7 + $0xc8] sm:$0xff]  ;;  %v2852_v35 = vld [vmem:[%s2714_s7 + $0xc0] sm:$0xff] }
  0x2c   : > { %264 = vst.msk [vmem:[#allocation2 + $0x88] sm:$0xff] %vm246_vm0, %v2849_v34  ;;  %263 = vst.msk [vmem:[#allocation2 + $0x80] sm:$0xff] %vm246_vm0, %v2852_v35  ;;  %v2859_v36 = vld [vmem:[%s2714_s7 + $0xe0] sm:$0xff]  ;;  %v2862_v37 = vld [vmem:[%s2714_s7 + $0xd8] sm:$0xff] }
  0x2d   : > { %v2865_v38 = vld [vmem:[%s2714_s7 + $0xf8] sm:$0xff]  ;;  %266 = vst.msk [vmem:[#allocation2 + $0x98] sm:$0xff] %vm246_vm0, %v2859_v36  ;;  %265 = vst.msk [vmem:[#allocation2 + $0x90] sm:$0xff] %vm246_vm0, %v2862_v37  ;;  %v2874_v39 = vld [vmem:[%s2714_s7 + $0xf0] sm:$0xff] }
  0x2e   : > { %361 = vrot.lane.b32.xlu1 %v2745_v8, %s2619_s8  ;;  %359 = vrot.lane.b32.xlu0 %v2748_v9, %s2619_s8  ;;  %268 = vst.msk [vmem:[#allocation2 + $0xa8] sm:$0xff] %vm246_vm0, %v2865_v38  ;;  %v2877_v40 = vld [vmem:[%s2714_s7 + $0x110] sm:$0xff]  ;;  %v2880_v41 = vld [vmem:[%s2714_s7 + $0x108] sm:$0xff]  ;;  %267 = vst.msk [vmem:[#allocation2 + $0xa0] sm:$0xff] %vm246_vm0, %v2874_v39 }
  0x2f   : > { %270 = vst.msk [vmem:[#allocation2 + $0xb8] sm:$0xff] %vm246_vm0, %v2877_v40  ;;  %269 = vst.msk [vmem:[#allocation2 + $0xb0] sm:$0xff] %vm246_vm0, %v2880_v41  ;;  %v298_v42 = vld [vmem:[%s2714_s7 + $0xe2] sm:$0xff]  ;;  %v297_v43 = vld [vmem:[%s2714_s7 + $0xda] sm:$0xff] }
  0x30   : > { %v2893_v44 = vld [vmem:[%s2714_s7 + $0x128] sm:$0xff]  ;;  %v2896_v45 = vld [vmem:[%s2714_s7 + $0x120] sm:$0xff]  ;;  %v2908_v47 = vld [vmem:[%s2714_s7 + $0xf2] sm:$0xff] }
  0x31   : > { %272 = vst.msk [vmem:[#allocation2 + $0xc8] sm:$0xff] %vm246_vm0, %v2893_v44  ;;  %271 = vst.msk [vmem:[#allocation2 + $0xc0] sm:$0xff] %vm246_vm0, %v2896_v45  ;;  %v2905_v46 = vld [vmem:[%s2714_s7 + $0xfa] sm:$0xff]  ;;  %v2925_v50 = vld [vmem:[%s2714_s7 + $0x112] sm:$0xff] }
  0x32   : > { %365 = vrot.lane.b32.xlu1 %v2755_v10, %s2619_s8  ;;  %363 = vrot.lane.b32.xlu0 %v2758_v11, %s2619_s8  ;;  %v2911_v48 = vld [vmem:[%s2714_s7 + $0x140] sm:$0xff]  ;;  %v2914_v49 = vld [vmem:[%s2714_s7 + $0x138] sm:$0xff] }
  0x33   : > { %274 = vst.msk [vmem:[#allocation2 + $0xd8] sm:$0xff] %vm246_vm0, %v2911_v48  ;;  %273 = vst.msk [vmem:[#allocation2 + $0xd0] sm:$0xff] %vm246_vm0, %v2914_v49  ;;  %v2928_v51 = vld [vmem:[%s2714_s7 + $0x10a] sm:$0xff]  ;;  %v2931_v52 = vld [vmem:[%s2714_s7 + $0x158] sm:$0xff] }
  0x34   : > { %3964 = vst [vmem:[#allocation8_spill] sm:$0xff] %v2931_v52  ;;  %v2934_v53 = vld [vmem:[%s2714_s7 + $0x150] sm:$0xff]  ;;  %276 = vst.msk [vmem:[#allocation2 + $0xe8] sm:$0xff] %vm246_vm0, %v2931_v52  ;;  %v2948_v55 = vld [vmem:[%s2714_s7 + $0x122] sm:$0xff] }
  0x35   : > { %3965 = vst [vmem:[#allocation9_spill] sm:$0xff] %v2934_v53  ;;  %275 = vst.msk [vmem:[#allocation2 + $0xe0] sm:$0xff] %vm246_vm0, %v2934_v53  ;;  %v2945_v54 = vld [vmem:[%s2714_s7 + $0x12a] sm:$0xff]  ;;  %v2965_v58 = vld [vmem:[%s2714_s7 + $0x142] sm:$0xff] }
  0x36   : > { %369 = vrot.lane.b32.xlu1 %v2767_v14, %s2619_s8  ;;  %367 = vrot.lane.b32.xlu0 %v2770_v15, %s2619_s8  ;;  %v2951_v56 = vld [vmem:[%s2714_s7 + $0x170] sm:$0xff]  ;;  %v2954_v57 = vld [vmem:[%s2714_s7 + $0x168] sm:$0xff] }
  0x37   : > { %3966 = vst [vmem:[#allocation10_spill] sm:$0xff] %v2951_v56  ;;  %3967 = vst [vmem:[#allocation11_spill] sm:$0xff] %v2954_v57  ;;  %v2968_v59 = vld [vmem:[%s2714_s7 + $0x13a] sm:$0xff]  ;;  %v2978_v61 = vld [vmem:[%s2714_s7 + $0x152] sm:$0xff] }
  0x38   : > { %278 = vst.msk [vmem:[#allocation2 + $0xf8] sm:$0xff] %vm246_vm0, %v2951_v56  ;;  %277 = vst.msk [vmem:[#allocation2 + $0xf0] sm:$0xff] %vm246_vm0, %v2954_v57  ;;  %v2975_v60 = vld [vmem:[%s2714_s7 + $0x15a] sm:$0xff]  ;;  %v310_v62 = vld [vmem:[%s2714_s7 + $0x172] sm:$0xff] }
  0x39   : > { %3968 = vst [vmem:[#allocation12_spill] sm:$0xff] %v2975_v60  ;;  %3969 = vst [vmem:[#allocation13_spill] sm:$0xff] %v2978_v61  ;;  %v309_v63 = vld [vmem:[%s2714_s7 + $0x16a] sm:$0xff]  ;;  %v474_v3 = vld [vmem:[%s2714_s7 + $0x1c] sm:$0xff] }
  0x3a   : > { %373 = vrot.lane.b32.xlu1 %v294_v18, %s2619_s8  ;;  %371 = vrot.lane.b32.xlu0 %v293_v21, %s2619_s8  ;;  %v473_v0 = vld [vmem:[%s2714_s7 + $0xc] sm:$0xff]  ;;  %v472_v1 = vld [vmem:[%s2714_s7 + $0x4] sm:$0xff] }
  0x3b   : > { %v475_v2 = vld [vmem:[%s2714_s7 + $0x24] sm:$0xff]  ;;  %v2997_v12 = vld [vmem:[%s2714_s7 + $0x3c] sm:$0xff]  ;;  %v3000_v13 = vld [vmem:[%s2714_s7 + $0x34] sm:$0xff] }
  0x3c   : > { %v3007_v16 = vld [vmem:[%s2714_s7 + $0x54] sm:$0xff]  ;;  %v3010_v17 = vld [vmem:[%s2714_s7 + $0x4c] sm:$0xff]  ;;  %v3020_v21 = vld [vmem:[%s2714_s7 + $0x64] sm:$0xff] }
  0x3d   : > { %v3017_v18 = vld [vmem:[%s2714_s7 + $0x6c] sm:$0xff]  ;;  %v3059_v57 = vld [vmem:[%s2714_s7 + $0xfc] sm:$0xff]  ;;  %v3104_v14 = vld [vmem:[%s2714_s7 + $0x154] sm:$0xff] }
  0x3e   : > { %377 = vrot.lane.b32.xlu1 %v296_v29, %s2619_s8  ;;  %375 = vrot.lane.b32.xlu0 %v295_v30, %s2619_s8  ;;  %v3027_v29 = vld [vmem:[%s2714_s7 + $0x84] sm:$0xff]  ;;  %v3030_v30 = vld [vmem:[%s2714_s7 + $0x7c] sm:$0xff] }
  0x3f   : > { %v3092_v56 = vld [vmem:[%s2714_s7 + $0x13c] sm:$0xff] }
  0x40   : > { %v3101_v15 = vld [vmem:[%s2714_s7 + $0x15c] sm:$0xff] }
  0x42   : > { %381 = vrot.lane.b32.xlu1 %v298_v42, %s2619_s8  ;;  %379 = vrot.lane.b32.xlu0 %v297_v43, %s2619_s8  ;;  %v3037_v42 = vld [vmem:[%s2714_s7 + $0x9c] sm:$0xff]  ;;  %v3040_v43 = vld [vmem:[%s2714_s7 + $0x94] sm:$0xff] }
  0x43   : > { %3970 = vst [vmem:[#allocation14_spill] sm:$0xff] %v3037_v42  ;;  %3971 = vst [vmem:[#allocation15_spill] sm:$0xff] %v3040_v43 }
  0x46   : > { %385 = vrot.lane.b32.xlu1 %v2905_v46, %s2619_s8  ;;  %383 = vrot.lane.b32.xlu0 %v2908_v47, %s2619_s8 }
  0x4a   : > { %389 = vrot.lane.b32.xlu1 %v2925_v50, %s2619_s8  ;;  %387 = vrot.lane.b32.xlu0 %v2928_v51, %s2619_s8 }
  0x4e   : > { %393 = vrot.lane.b32.xlu1 %v2945_v54, %s2619_s8  ;;  %391 = vrot.lane.b32.xlu0 %v2948_v55, %s2619_s8 }
  0x52   : > { %397 = vrot.lane.b32.xlu1 %v2965_v58, %s2619_s8  ;;  %395 = vrot.lane.b32.xlu0 %v2968_v59, %s2619_s8 }
  0x56   : > { %401 = vrot.lane.b32.xlu1 %v2975_v60, %s2619_s8  ;;  %399 = vrot.lane.b32.xlu0 %v2978_v61, %s2619_s8 }
  0x5a   : > { %405 = vrot.lane.b32.xlu1 %v310_v62, %s2619_s8  ;;  %403 = vrot.lane.b32.xlu0 %v309_v63, %s2619_s8  ;;  %v487_v62 = vld [vmem:[%s2714_s7 + $0xb4] sm:$0xff]  ;;  %v486_v63 = vld [vmem:[%s2714_s7 + $0xac] sm:$0xff]  ;;  %s2389_s8 = sshll.u32 %s2609_s18, 8  ;;  %s2628_s18 = smov [#allocation3]  }
  0x5b   : > { %s2543_s22 = sshll.u32 %s2628_s18, 4  ;;  %s2544_s22 = int_to_ptr.vmem [resolvable:$false] %s2543_s22 }
  0x5c   : > { %s2545_s24 = scalar_lea.vmem %s2544_s22, 512 }
  0x5e   : > { %538 = vrot.lane.b32.xlu1 %v473_v0, %s2620_s9  ;;  %536 = vrot.lane.b32.xlu0 %v472_v1, %s2620_s9  ;;  %v489_v0 = vld [vmem:[%s2714_s7 + $0xcc] sm:$0xff]  ;;  %v488_v1 = vld [vmem:[%s2714_s7 + $0xc4] sm:$0xff] }
  0x62   : > { %542 = vrot.lane.b32.xlu1 %v475_v2, %s2620_s9  ;;  %540 = vrot.lane.b32.xlu0 %v474_v3, %s2620_s9  ;;  %v491_v2 = vld [vmem:[%s2714_s7 + $0xe4] sm:$0xff]  ;;  %v490_v3 = vld [vmem:[%s2714_s7 + $0xdc] sm:$0xff] }
  0x66   : > { %546 = vrot.lane.b32.xlu1 %v2997_v12, %s2620_s9  ;;  %544 = vrot.lane.b32.xlu0 %v3000_v13, %s2620_s9 }
  0x6a   : > { %550 = vrot.lane.b32.xlu1 %v3007_v16, %s2620_s9  ;;  %548 = vrot.lane.b32.xlu0 %v3010_v17, %s2620_s9 }
  0x6e   : > { %554 = vrot.lane.b32.xlu1 %v3017_v18, %s2620_s9  ;;  %552 = vrot.lane.b32.xlu0 %v3020_v21, %s2620_s9 }
  0x72   : > { %558 = vrot.lane.b32.xlu1 %v3027_v29, %s2620_s9  ;;  %556 = vrot.lane.b32.xlu0 %v3030_v30, %s2620_s9 }
  0x76   : > { %562 = vrot.lane.b32.xlu1 %v3037_v42, %s2620_s9  ;;  %560 = vrot.lane.b32.xlu0 %v3040_v43, %s2620_s9 }
  0x7a   : > { %566 = vrot.lane.b32.xlu1 %v487_v62, %s2620_s9  ;;  %564 = vrot.lane.b32.xlu0 %v486_v63, %s2620_s9  ;;  %v3062_v62 = vld [vmem:[%s2714_s7 + $0xf4] sm:$0xff] }
  0x7b   : > { %v3069_v63 = vld [vmem:[%s2714_s7 + $0x114] sm:$0xff] }
  0x7e   : > { %570 = vrot.lane.b32.xlu1 %v489_v0, %s2620_s9  ;;  %568 = vrot.lane.b32.xlu0 %v488_v1, %s2620_s9  ;;  %v3072_v0 = vld [vmem:[%s2714_s7 + $0x10c] sm:$0xff] }
  0x7f   : > { %v3079_v1 = vld [vmem:[%s2714_s7 + $0x12c] sm:$0xff] }
  0x82   : > { %574 = vrot.lane.b32.xlu1 %v491_v2, %s2620_s9  ;;  %572 = vrot.lane.b32.xlu0 %v490_v3, %s2620_s9  ;;  %v3082_v2 = vld [vmem:[%s2714_s7 + $0x124] sm:$0xff] }
  0x83   : > { %v3089_v3 = vld [vmem:[%s2714_s7 + $0x144] sm:$0xff] }
  0x86   : > { %578 = vrot.lane.b32.xlu1 %v3059_v57, %s2620_s9  ;;  %576 = vrot.lane.b32.xlu0 %v3062_v62, %s2620_s9 }
  0x8a   : > { %582 = vrot.lane.b32.xlu1 %v3069_v63, %s2620_s9  ;;  %580 = vrot.lane.b32.xlu0 %v3072_v0, %s2620_s9 }
  0x8e   : > { %586 = vrot.lane.b32.xlu1 %v3079_v1, %s2620_s9  ;;  %584 = vrot.lane.b32.xlu0 %v3082_v2, %s2620_s9 }
  0x90   : > { %v348_v43 = vpop.permute.xlu1 %347  ;;  %v344_v42 = vpop.permute.xlu0 %343 }
  0x91   : > { %442 = vst.msk [vmem:[#allocation2 + $0x10] sm:$0xff] %vm439_vm1, %v348_v43  ;;  %440 = vst.msk [vmem:[#allocation2] sm:$0xff] %vm439_vm1, %v344_v42  ;;  %v3113_v42 = vld [vmem:[%s2714_s7 + $0x174] sm:$0xff]  ;;  %v3116_v43 = vld [vmem:[%s2714_s7 + $0x16c] sm:$0xff] }
  0x92   : > { %590 = vrot.lane.b32.xlu1 %v3089_v3, %s2620_s9  ;;  %588 = vrot.lane.b32.xlu0 %v3092_v56, %s2620_s9 }
  0x94   : > { %v350_v61 = vpop.permute.xlu1 %349  ;;  %v346_v60 = vpop.permute.xlu0 %345 }
  0x95   : > { %443 = vst.msk [vmem:[#allocation2 + $0x18] sm:$0xff] %vm439_vm1, %v350_v61  ;;  %441 = vst.msk [vmem:[#allocation2 + $0x8] sm:$0xff] %vm439_vm1, %v346_v60 }
  0x96   : > { %594 = vrot.lane.b32.xlu1 %v3101_v15, %s2620_s9  ;;  %592 = vrot.lane.b32.xlu0 %v3104_v14, %s2620_s9 }
  0x98   : > { %v354_v53 = vpop.permute.xlu1 %353  ;;  %v352_v52 = vpop.permute.xlu0 %351 }
  0x99   : > { %445 = vst.msk [vmem:[#allocation2 + $0x28] sm:$0xff] %vm439_vm1, %v354_v53  ;;  %444 = vst.msk [vmem:[#allocation2 + $0x20] sm:$0xff] %vm439_vm1, %v352_v52 }
  0x9a   : > { %598 = vrot.lane.b32.xlu1 %v3113_v42, %s2620_s9  ;;  %596 = vrot.lane.b32.xlu0 %v3116_v43, %s2620_s9 }
  0x9c   : > { %v358_v60 = vpop.permute.xlu1 %357  ;;  %v356_v61 = vpop.permute.xlu0 %355 }
  0x9d   : > { %447 = vst.msk [vmem:[#allocation2 + $0x38] sm:$0xff] %vm439_vm1, %v358_v60  ;;  %446 = vst.msk [vmem:[#allocation2 + $0x30] sm:$0xff] %vm439_vm1, %v356_v61 }
  0x9e   : > { %734 = vrot.lane.b32.xlu1 %v2780_v19, %s2621_s10  ;;  %732 = vrot.lane.b32.xlu0 %v2783_v20, %s2621_s10 }
  0xa0   : > { %v362_v52 = vpop.permute.xlu1 %361  ;;  %v360_v53 = vpop.permute.xlu0 %359 }
  0xa1   : > { %449 = vst.msk [vmem:[#allocation2 + $0x48] sm:$0xff] %vm439_vm1, %v362_v52  ;;  %448 = vst.msk [vmem:[#allocation2 + $0x40] sm:$0xff] %vm439_vm1, %v360_v53 }
  0xa2   : > { %738 = vrot.lane.b32.xlu1 %v2795_v22, %s2621_s10  ;;  %736 = vrot.lane.b32.xlu0 %v2800_v23, %s2621_s10 }
  0xa4   : > { %v366_v60 = vpop.permute.xlu1 %365  ;;  %v364_v61 = vpop.permute.xlu0 %363 }
  0xa5   : > { %451 = vst.msk [vmem:[#allocation2 + $0x58] sm:$0xff] %vm439_vm1, %v366_v60  ;;  %450 = vst.msk [vmem:[#allocation2 + $0x50] sm:$0xff] %vm439_vm1, %v364_v61 }
  0xa6   : > { %742 = vrot.lane.b32.xlu1 %v2803_v24, %s2621_s10  ;;  %740 = vrot.lane.b32.xlu0 %v2806_v25, %s2621_s10 }
  0xa8   : > { %v370_v19 = vpop.permute.xlu1 %369  ;;  %v368_v20 = vpop.permute.xlu0 %367 }
  0xa9   : > { %453 = vst.msk [vmem:[#allocation2 + $0x68] sm:$0xff] %vm439_vm1, %v370_v19  ;;  %452 = vst.msk [vmem:[#allocation2 + $0x60] sm:$0xff] %vm439_vm1, %v368_v20 }
  0xaa   : > { %746 = vrot.lane.b32.xlu1 %v2815_v26, %s2621_s10  ;;  %744 = vrot.lane.b32.xlu0 %v2818_v27, %s2621_s10 }
  0xac   : > { %v374_v22 = vpop.permute.xlu1 %373  ;;  %v372_v23 = vpop.permute.xlu0 %371 }
  0xad   : > { %455 = vst.msk [vmem:[#allocation2 + $0x78] sm:$0xff] %vm439_vm1, %v374_v22  ;;  %454 = vst.msk [vmem:[#allocation2 + $0x70] sm:$0xff] %vm439_vm1, %v372_v23 }
  0xae   : > { %750 = vrot.lane.b32.xlu1 %v2821_v28, %s2621_s10  ;;  %748 = vrot.lane.b32.xlu0 %v2832_v31, %s2621_s10 }
  0xb0   : > { %v378_v52 = vpop.permute.xlu1 %377  ;;  %v376_v53 = vpop.permute.xlu0 %375 }
  0xb1   : > { %457 = vst.msk [vmem:[#allocation2 + $0x88] sm:$0xff] %vm439_vm1, %v378_v52  ;;  %456 = vst.msk [vmem:[#allocation2 + $0x80] sm:$0xff] %vm439_vm1, %v376_v53 }
  0xb2   : > { %754 = vrot.lane.b32.xlu1 %v2835_v32, %s2621_s10  ;;  %752 = vrot.lane.b32.xlu0 %v2838_v33, %s2621_s10 }
  0xb4   : > { %v382_v60 = vpop.permute.xlu1 %381  ;;  %v380_v61 = vpop.permute.xlu0 %379 }
  0xb5   : > { %459 = vst.msk [vmem:[#allocation2 + $0x98] sm:$0xff] %vm439_vm1, %v382_v60  ;;  %458 = vst.msk [vmem:[#allocation2 + $0x90] sm:$0xff] %vm439_vm1, %v380_v61 }
  0xb6   : > { %758 = vrot.lane.b32.xlu1 %v2849_v34, %s2621_s10  ;;  %756 = vrot.lane.b32.xlu0 %v2852_v35, %s2621_s10 }
  0xb8   : > { %v386_v19 = vpop.permute.xlu1 %385  ;;  %v384_v20 = vpop.permute.xlu0 %383 }
  0xb9   : > { %461 = vst.msk [vmem:[#allocation2 + $0xa8] sm:$0xff] %vm439_vm1, %v386_v19  ;;  %460 = vst.msk [vmem:[#allocation2 + $0xa0] sm:$0xff] %vm439_vm1, %v384_v20 }
  0xba   : > { %762 = vrot.lane.b32.xlu1 %v2859_v36, %s2621_s10  ;;  %760 = vrot.lane.b32.xlu0 %v2862_v37, %s2621_s10 }
  0xbc   : > { %v390_v22 = vpop.permute.xlu1 %389  ;;  %v388_v23 = vpop.permute.xlu0 %387 }
  0xbd   : > { %463 = vst.msk [vmem:[#allocation2 + $0xb8] sm:$0xff] %vm439_vm1, %v390_v22  ;;  %462 = vst.msk [vmem:[#allocation2 + $0xb0] sm:$0xff] %vm439_vm1, %v388_v23 }
  0xbe   : > { %766 = vrot.lane.b32.xlu1 %v2865_v38, %s2621_s10  ;;  %764 = vrot.lane.b32.xlu0 %v2874_v39, %s2621_s10 }
  0xc0   : > { %v394_v52 = vpop.permute.xlu1 %393  ;;  %v392_v53 = vpop.permute.xlu0 %391 }
  0xc1   : > { %465 = vst.msk [vmem:[#allocation2 + $0xc8] sm:$0xff] %vm439_vm1, %v394_v52  ;;  %464 = vst.msk [vmem:[#allocation2 + $0xc0] sm:$0xff] %vm439_vm1, %v392_v53 }
  0xc2   : > { %959 = vrot.lane.b32.xlu1 %v2905_v46, %s2622_s11  ;;  %957 = vrot.lane.b32.xlu0 %v2908_v47, %s2622_s11 }
  0xc4   : > { %v398_v36 = vpop.permute.xlu1 %397  ;;  %v396_v37 = vpop.permute.xlu0 %395 }
  0xc5   : > { %467 = vst.msk [vmem:[#allocation2 + $0xd8] sm:$0xff] %vm439_vm1, %v398_v36  ;;  %466 = vst.msk [vmem:[#allocation2 + $0xd0] sm:$0xff] %vm439_vm1, %v396_v37 }
  0xc6   : > { %927 = vrot.lane.b32.xlu1 %v2725_v4, %s2622_s11  ;;  %925 = vrot.lane.b32.xlu0 %v2728_v5, %s2622_s11 }
  0xc8   : > { %v402_v38 = vpop.permute.xlu1 %401  ;;  %v400_v39 = vpop.permute.xlu0 %399 }
  0xc9   : > { %469 = vst.msk [vmem:[#allocation2 + $0xe8] sm:$0xff] %vm439_vm1, %v402_v38  ;;  %468 = vst.msk [vmem:[#allocation2 + $0xe0] sm:$0xff] %vm439_vm1, %v400_v39 }
  0xca   : > { %1152 = vrot.lane.b32.xlu1 %v3059_v57, %s2623_s12  ;;  %1150 = vrot.lane.b32.xlu0 %v3062_v62, %s2623_s12 }
  0xcc   : > { %v406_v46 = vpop.permute.xlu1 %405  ;;  %v404_v47 = vpop.permute.xlu0 %403 }
  0xcd   : > { %471 = vst.msk [vmem:[#allocation2 + $0xf8] sm:$0xff] %vm439_vm1, %v406_v46  ;;  %470 = vst.msk [vmem:[#allocation2 + $0xf0] sm:$0xff] %vm439_vm1, %v404_v47 }
  0xce   : > { %1120 = vrot.lane.b32.xlu1 %v2997_v12, %s2623_s12  ;;  %1118 = vrot.lane.b32.xlu0 %v3000_v13, %s2623_s12 }
  0xd0   : > { %v539_v4 = vpop.permute.xlu1 %538  ;;  %v537_v5 = vpop.permute.xlu0 %536 }
  0xd1   : > { %634 = vst.msk [vmem:[#allocation2 + $0x8] sm:$0xff] %vm632_vm2, %v539_v4  ;;  %633 = vst.msk [vmem:[#allocation2] sm:$0xff] %vm632_vm2, %v537_v5 }
  0xd2   : > { %1348 = vrot.lane.b32.xlu1 %v2893_v44, %s2624_s13  ;;  %1346 = vrot.lane.b32.xlu0 %v2896_v45, %s2624_s13 }
  0xd4   : > { %v543_v57 = vpop.permute.xlu1 %542  ;;  %v541_v62 = vpop.permute.xlu0 %540 }
  0xd5   : > { %636 = vst.msk [vmem:[#allocation2 + $0x18] sm:$0xff] %vm632_vm2, %v543_v57  ;;  %635 = vst.msk [vmem:[#allocation2 + $0x10] sm:$0xff] %vm632_vm2, %v541_v62 }
  0xd6   : > { %1316 = vrot.lane.b32.xlu1 %v2803_v24, %s2624_s13  ;;  %1314 = vrot.lane.b32.xlu0 %v2806_v25, %s2624_s13 }
  0xd8   : > { %v547_v12 = vpop.permute.xlu1 %546  ;;  %v545_v13 = vpop.permute.xlu0 %544 }
  0xd9   : > { %638 = vst.msk [vmem:[#allocation2 + $0x28] sm:$0xff] %vm632_vm2, %v547_v12  ;;  %637 = vst.msk [vmem:[#allocation2 + $0x20] sm:$0xff] %vm632_vm2, %v545_v13 }
  0xda   : > { %1541 = vrot.lane.b32.xlu1 %v2945_v54, %s2625_s14  ;;  %1539 = vrot.lane.b32.xlu0 %v2948_v55, %s2625_s14 }
  0xdc   : > { %v551_v60 = vpop.permute.xlu1 %550  ;;  %v549_v61 = vpop.permute.xlu0 %548 }
  0xdd   : > { %640 = vst.msk [vmem:[#allocation2 + $0x38] sm:$0xff] %vm632_vm2, %v551_v60  ;;  %639 = vst.msk [vmem:[#allocation2 + $0x30] sm:$0xff] %vm632_vm2, %v549_v61  ;;  %v3974_v60 = vld [vmem:[#allocation12_spill] sm:$0xff]  ;;  %v3975_v61 = vld [vmem:[#allocation13_spill] sm:$0xff] }
  0xde   : > { %1509 = vrot.lane.b32.xlu1 %v2745_v8, %s2625_s14  ;;  %1507 = vrot.lane.b32.xlu0 %v2748_v9, %s2625_s14 }
  0xe0   : > { %v555_v24 = vpop.permute.xlu1 %554  ;;  %v553_v25 = vpop.permute.xlu0 %552 }
  0xe1   : > { %642 = vst.msk [vmem:[#allocation2 + $0x48] sm:$0xff] %vm632_vm2, %v555_v24  ;;  %641 = vst.msk [vmem:[#allocation2 + $0x40] sm:$0xff] %vm632_vm2, %v553_v25 }
  0xe2   : > { %1734 = vrot.lane.b32.xlu1 %v3079_v1, %s2626_s21  ;;  %1732 = vrot.lane.b32.xlu0 %v3082_v2, %s2626_s21 }
  0xe4   : > { %v559_v19 = vpop.permute.xlu1 %558  ;;  %v557_v20 = vpop.permute.xlu0 %556 }
  0xe5   : > { %644 = vst.msk [vmem:[#allocation2 + $0x58] sm:$0xff] %vm632_vm2, %v559_v19  ;;  %643 = vst.msk [vmem:[#allocation2 + $0x50] sm:$0xff] %vm632_vm2, %v557_v20 }
  0xe6   : > { %1702 = vrot.lane.b32.xlu1 %v3017_v18, %s2626_s21  ;;  %1700 = vrot.lane.b32.xlu0 %v3020_v21, %s2626_s21 }
  0xe8   : > { %v563_v22 = vpop.permute.xlu1 %562  ;;  %v561_v23 = vpop.permute.xlu0 %560 }
  0xe9   : > { %646 = vst.msk [vmem:[#allocation2 + $0x68] sm:$0xff] %vm632_vm2, %v563_v22  ;;  %645 = vst.msk [vmem:[#allocation2 + $0x60] sm:$0xff] %vm632_vm2, %v561_v23 }
  0xea   : > { %770 = vrot.lane.b32.xlu1 %v2877_v40, %s2621_s10  ;;  %768 = vrot.lane.b32.xlu0 %v2880_v41, %s2621_s10 }
  0xec   : > { %v567_v52 = vpop.permute.xlu1 %566  ;;  %v565_v53 = vpop.permute.xlu0 %564 }
  0xed   : > { %648 = vst.msk [vmem:[#allocation2 + $0x78] sm:$0xff] %vm632_vm2, %v567_v52  ;;  %647 = vst.msk [vmem:[#allocation2 + $0x70] sm:$0xff] %vm632_vm2, %v565_v53  ;;  %v3978_v52 = vld [vmem:[#allocation14_spill] sm:$0xff]  ;;  %v3979_v53 = vld [vmem:[#allocation15_spill] sm:$0xff] }
  0xee   : > { %963 = vrot.lane.b32.xlu1 %v2925_v50, %s2622_s11  ;;  %961 = vrot.lane.b32.xlu0 %v2928_v51, %s2622_s11 }
  0xf0   : > { %v571_v36 = vpop.permute.xlu1 %570  ;;  %v569_v37 = vpop.permute.xlu0 %568 }
  0xf1   : > { %650 = vst.msk [vmem:[#allocation2 + $0x88] sm:$0xff] %vm632_vm2, %v571_v36  ;;  %649 = vst.msk [vmem:[#allocation2 + $0x80] sm:$0xff] %vm632_vm2, %v569_v37 }
  0xf2   : > { %931 = vrot.lane.b32.xlu1 %v2735_v6, %s2622_s11  ;;  %929 = vrot.lane.b32.xlu0 %v2738_v7, %s2622_s11 }
  0xf4   : > { %v575_v40 = vpop.permute.xlu1 %574  ;;  %v573_v41 = vpop.permute.xlu0 %572 }
  0xf5   : > { %652 = vst.msk [vmem:[#allocation2 + $0x98] sm:$0xff] %vm632_vm2, %v575_v40  ;;  %651 = vst.msk [vmem:[#allocation2 + $0x90] sm:$0xff] %vm632_vm2, %v573_v41  ;;  %v2198_v40 = vld [vmem:[%s2714_s7 + $0x82] sm:$0xff]  ;;  %v2197_v41 = vld [vmem:[%s2714_s7 + $0x7a] sm:$0xff] }
  0xf6   : > { %1156 = vrot.lane.b32.xlu1 %v3069_v63, %s2623_s12  ;;  %1154 = vrot.lane.b32.xlu0 %v3072_v0, %s2623_s12 }
  0xf8   : > { %v579_v50 = vpop.permute.xlu1 %578  ;;  %v577_v51 = vpop.permute.xlu0 %576 }
  0xf9   : > { %654 = vst.msk [vmem:[#allocation2 + $0xa8] sm:$0xff] %vm632_vm2, %v579_v50  ;;  %653 = vst.msk [vmem:[#allocation2 + $0xa0] sm:$0xff] %vm632_vm2, %v577_v51 }
  0xfa   : > { %1124 = vrot.lane.b32.xlu1 %v3007_v16, %s2623_s12  ;;  %1122 = vrot.lane.b32.xlu0 %v3010_v17, %s2623_s12 }
  0xfc   : > { %v583_v6 = vpop.permute.xlu1 %582  ;;  %v581_v7 = vpop.permute.xlu0 %580 }
  0xfd   : > { %656 = vst.msk [vmem:[#allocation2 + $0xb8] sm:$0xff] %vm632_vm2, %v583_v6  ;;  %655 = vst.msk [vmem:[#allocation2 + $0xb0] sm:$0xff] %vm632_vm2, %v581_v7  ;;  %v3981_v7 = vld [vmem:[#allocation11_spill] sm:$0xff] }
  0xfe   : > { %1352 = vrot.lane.b32.xlu1 %v2911_v48, %s2624_s13  ;;  %1350 = vrot.lane.b32.xlu0 %v2914_v49, %s2624_s13 }
 0x100   : > { %v587_v63 = vpop.permute.xlu1 %586  ;;  %v585_v0 = vpop.permute.xlu0 %584 }
 0x101   : > { %658 = vst.msk [vmem:[#allocation2 + $0xc8] sm:$0xff] %vm632_vm2, %v587_v63  ;;  %657 = vst.msk [vmem:[#allocation2 + $0xc0] sm:$0xff] %vm632_vm2, %v585_v0  ;;  %v3416_v0 = vld [vmem:[%s2714_s7 + $0x16a] sm:$0xff] }
 0x102   : > { %1320 = vrot.lane.b32.xlu1 %v2815_v26, %s2624_s13  ;;  %1318 = vrot.lane.b32.xlu0 %v2818_v27, %s2624_s13 }
 0x104   : > { %v591_v16 = vpop.permute.xlu1 %590  ;;  %v589_v17 = vpop.permute.xlu0 %588 }
 0x105   : > { %660 = vst.msk [vmem:[#allocation2 + $0xd8] sm:$0xff] %vm632_vm2, %v591_v16  ;;  %659 = vst.msk [vmem:[#allocation2 + $0xd0] sm:$0xff] %vm632_vm2, %v589_v17 }
 0x106   : > { %1545 = vrot.lane.b32.xlu1 %v2965_v58, %s2625_s14  ;;  %1543 = vrot.lane.b32.xlu0 %v2968_v59, %s2625_s14 }
 0x108   : > { %v595_v38 = vpop.permute.xlu1 %594  ;;  %v593_v39 = vpop.permute.xlu0 %592 }
 0x109   : > { %662 = vst.msk [vmem:[#allocation2 + $0xe8] sm:$0xff] %vm632_vm2, %v595_v38  ;;  %661 = vst.msk [vmem:[#allocation2 + $0xe0] sm:$0xff] %vm632_vm2, %v593_v39 }
 0x10a   : > { %1513 = vrot.lane.b32.xlu1 %v2755_v10, %s2625_s14  ;;  %1511 = vrot.lane.b32.xlu0 %v2758_v11, %s2625_s14 }
 0x10c   : > { %v599_v26 = vpop.permute.xlu1 %598  ;;  %v597_v27 = vpop.permute.xlu0 %596 }
 0x10d   : > { %664 = vst.msk [vmem:[#allocation2 + $0xf8] sm:$0xff] %vm632_vm2, %v599_v26  ;;  %663 = vst.msk [vmem:[#allocation2 + $0xf0] sm:$0xff] %vm632_vm2, %v597_v27  ;;  %v3436_v27 = vld [vmem:[%s2714_s7 + $0xaa] sm:$0xff] }
 0x10e   : > { %1738 = vrot.lane.b32.xlu1 %v3089_v3, %s2626_s21  ;;  %1736 = vrot.lane.b32.xlu0 %v3092_v56, %s2626_s21 }
 0x110   : > { %v735_v46 = vpop.permute.xlu1 %734  ;;  %v733_v47 = vpop.permute.xlu0 %732 }
 0x111   : > { %830 = vst.msk [vmem:[#allocation2 + $0x8] sm:$0xff] %vm828_vm3, %v735_v46  ;;  %829 = vst.msk [vmem:[#allocation2] sm:$0xff] %vm828_vm3, %v733_v47 }
 0x112   : > { %1706 = vrot.lane.b32.xlu1 %v3027_v29, %s2626_s21  ;;  %1704 = vrot.lane.b32.xlu0 %v3030_v30, %s2626_s21 }
 0x114   : > { %v739_v10 = vpop.permute.xlu1 %738  ;;  %v737_v11 = vpop.permute.xlu0 %736 }
 0x115   : > { %832 = vst.msk [vmem:[#allocation2 + $0x18] sm:$0xff] %vm828_vm3, %v739_v10  ;;  %831 = vst.msk [vmem:[#allocation2 + $0x10] sm:$0xff] %vm828_vm3, %v737_v11 }
 0x116   : > { %774 = vrot.lane.b32.xlu1 %v2893_v44, %s2621_s10  ;;  %772 = vrot.lane.b32.xlu0 %v2896_v45, %s2621_s10 }
 0x118   : > { %v743_v4 = vpop.permute.xlu1 %742  ;;  %v741_v5 = vpop.permute.xlu0 %740 }
 0x119   : > { %834 = vst.msk [vmem:[#allocation2 + $0x28] sm:$0xff] %vm828_vm3, %v743_v4  ;;  %833 = vst.msk [vmem:[#allocation2 + $0x20] sm:$0xff] %vm828_vm3, %v741_v5 }
 0x11a   : > { %967 = vrot.lane.b32.xlu1 %v2945_v54, %s2622_s11  ;;  %965 = vrot.lane.b32.xlu0 %v2948_v55, %s2622_s11 }
 0x11c   : > { %v747_v57 = vpop.permute.xlu1 %746  ;;  %v745_v62 = vpop.permute.xlu0 %744 }
 0x11d   : > { %836 = vst.msk [vmem:[#allocation2 + $0x38] sm:$0xff] %vm828_vm3, %v747_v57  ;;  %835 = vst.msk [vmem:[#allocation2 + $0x30] sm:$0xff] %vm828_vm3, %v745_v62  ;;  %v3453_v62 = vld [vmem:[%s2714_s7 + $0xb4] sm:$0xff] }
 0x11e   : > { %935 = vrot.lane.b32.xlu1 %v2745_v8, %s2622_s11  ;;  %933 = vrot.lane.b32.xlu0 %v2748_v9, %s2622_s11 }
 0x120   : > { %v751_v44 = vpop.permute.xlu1 %750  ;;  %v749_v45 = vpop.permute.xlu0 %748 }
 0x121   : > { %838 = vst.msk [vmem:[#allocation2 + $0x48] sm:$0xff] %vm828_vm3, %v751_v44  ;;  %837 = vst.msk [vmem:[#allocation2 + $0x40] sm:$0xff] %vm828_vm3, %v749_v45  ;;  %v3456_v44 = vld [vmem:[%s2714_s7 + $0xac] sm:$0xff] }
 0x122   : > { %1160 = vrot.lane.b32.xlu1 %v3079_v1, %s2623_s12  ;;  %1158 = vrot.lane.b32.xlu0 %v3082_v2, %s2623_s12  ;;  %v3972_v1 = vld [vmem:[#allocation8_spill] sm:$0xff]  ;;  %v3973_v2 = vld [vmem:[#allocation9_spill] sm:$0xff] }
 0x124   : > { %v755_v54 = vpop.permute.xlu1 %754  ;;  %v753_v55 = vpop.permute.xlu0 %752 }
 0x125   : > { %840 = vst.msk [vmem:[#allocation2 + $0x58] sm:$0xff] %vm828_vm3, %v755_v54  ;;  %839 = vst.msk [vmem:[#allocation2 + $0x50] sm:$0xff] %vm828_vm3, %v753_v55  ;;  %v2216_v55 = vld [vmem:[%s2714_s7 + $0x15a] sm:$0xff] }
 0x126   : > { %1128 = vrot.lane.b32.xlu1 %v3017_v18, %s2623_s12  ;;  %1126 = vrot.lane.b32.xlu0 %v3020_v21, %s2623_s12 }
 0x128   : > { %v759_v8 = vpop.permute.xlu1 %758  ;;  %v757_v9 = vpop.permute.xlu0 %756 }
 0x129   : > { %842 = vst.msk [vmem:[#allocation2 + $0x68] sm:$0xff] %vm828_vm3, %v759_v8  ;;  %841 = vst.msk [vmem:[#allocation2 + $0x60] sm:$0xff] %vm828_vm3, %v757_v9  ;;  %v2215_v8 = vld [vmem:[%s2714_s7 + $0x152] sm:$0xff] }
 0x12a   : > { %1356 = vrot.lane.b32.xlu1 %v3972_v1, %s2624_s13  ;;  %1354 = vrot.lane.b32.xlu0 %v3973_v2, %s2624_s13 }
 0x12c   : > { %v763_v12 = vpop.permute.xlu1 %762  ;;  %v761_v13 = vpop.permute.xlu0 %760 }
 0x12d   : > { %844 = vst.msk [vmem:[#allocation2 + $0x78] sm:$0xff] %vm828_vm3, %v763_v12  ;;  %843 = vst.msk [vmem:[#allocation2 + $0x70] sm:$0xff] %vm828_vm3, %v761_v13  ;;  %v2200_v13 = vld [vmem:[%s2714_s7 + $0x9a] sm:$0xff] }
 0x12e   : > { %1324 = vrot.lane.b32.xlu1 %v2821_v28, %s2624_s13  ;;  %1322 = vrot.lane.b32.xlu0 %v2832_v31, %s2624_s13  ;;  %v3976_v28 = vld [vmem:[#allocation6_spill] sm:$0xff]  ;;  %v3977_v31 = vld [vmem:[#allocation7_spill] sm:$0xff] }
 0x130   : > { %v767_v18 = vpop.permute.xlu1 %766  ;;  %v765_v21 = vpop.permute.xlu0 %764 }
 0x131   : > { %846 = vst.msk [vmem:[#allocation2 + $0x88] sm:$0xff] %vm828_vm3, %v767_v18  ;;  %845 = vst.msk [vmem:[#allocation2 + $0x80] sm:$0xff] %vm828_vm3, %v765_v21  ;;  %v2248_v21 = vld [vmem:[%s2714_s7 + $0x15c] sm:$0xff] }
 0x132   : > { %1549 = vrot.lane.b32.xlu1 %v3974_v60, %s2625_s14  ;;  %1547 = vrot.lane.b32.xlu0 %v3975_v61, %s2625_s14  ;;  %v2247_v60 = vld [vmem:[%s2714_s7 + $0x154] sm:$0xff] }
 0x134   : > { %v960_v24 = vpop.permute.xlu1 %959  ;;  %v958_v25 = vpop.permute.xlu0 %957 }
 0x135   : > { %1039 = vst.msk [vmem:[#allocation2 + $0x88] sm:$0xff] %vm1021_vm4, %v960_v24  ;;  %1038 = vst.msk [vmem:[#allocation2 + $0x80] sm:$0xff] %vm1021_vm4, %v958_v25  ;;  %v2232_v25 = vld [vmem:[%s2714_s7 + $0x9c] sm:$0xff] }
 0x136   : > { %1517 = vrot.lane.b32.xlu1 %v3976_v28, %s2625_s14  ;;  %1515 = vrot.lane.b32.xlu0 %v3977_v31, %s2625_s14  ;;  %v2231_v28 = vld [vmem:[%s2714_s7 + $0x94] sm:$0xff] }
 0x138   : > { %v928_v19 = vpop.permute.xlu1 %927  ;;  %v926_v20 = vpop.permute.xlu0 %925 }
 0x139   : > { %1023 = vst.msk [vmem:[#allocation2 + $0x8] sm:$0xff] %vm1021_vm4, %v928_v19  ;;  %1022 = vst.msk [vmem:[#allocation2] sm:$0xff] %vm1021_vm4, %v926_v20  ;;  %v3495_v20 = vld [vmem:[%s2714_s7 + $0x188] sm:$0xff] }
 0x13a   : > { %1742 = vrot.lane.b32.xlu1 %v3101_v15, %s2626_s21  ;;  %1740 = vrot.lane.b32.xlu0 %v3104_v14, %s2626_s21 }
 0x13c   : > { %v1153_v22 = vpop.permute.xlu1 %1152  ;;  %v1151_v23 = vpop.permute.xlu0 %1150 }
 0x13d   : > { %1232 = vst.msk [vmem:[#allocation2 + $0x88] sm:$0xff] %vm1214_vm5, %v1153_v22  ;;  %1231 = vst.msk [vmem:[#allocation2 + $0x80] sm:$0xff] %vm1214_vm5, %v1151_v23  ;;  %v3498_v22 = vld [vmem:[%s2714_s7 + $0x180] sm:$0xff] }
 0x13e   : > { %1710 = vrot.lane.b32.xlu1 %v3978_v52, %s2626_s21  ;;  %1708 = vrot.lane.b32.xlu0 %v3979_v53, %s2626_s21 }
 0x140   : > { %v1121_v36 = vpop.permute.xlu1 %1120  ;;  %v1119_v15 = vpop.permute.xlu0 %1118 }
 0x141   : > { %1216 = vst.msk [vmem:[#allocation2 + $0x8] sm:$0xff] %vm1214_vm5, %v1121_v36  ;;  %1215 = vst.msk [vmem:[#allocation2] sm:$0xff] %vm1214_vm5, %v1119_v15  ;;  %v3513_v15 = vld [vmem:[%s2714_s7 + $0x18a] sm:$0xff] }
 0x142   : > { %778 = vrot.lane.b32.xlu1 %v2911_v48, %s2621_s10  ;;  %776 = vrot.lane.b32.xlu0 %v2914_v49, %s2621_s10 }
 0x144   : > { %v1349_v14 = vpop.permute.xlu1 %1348  ;;  %v1347_v37 = vpop.permute.xlu0 %1346 }
 0x145   : > { %1428 = vst.msk [vmem:[#allocation2 + $0x88] sm:$0xff] %vm1410_vm6, %v1349_v14  ;;  %1427 = vst.msk [vmem:[#allocation2 + $0x80] sm:$0xff] %vm1410_vm6, %v1347_v37  ;;  %v3516_v14 = vld [vmem:[%s2714_s7 + $0x182] sm:$0xff] }
 0x146   : > { %971 = vrot.lane.b32.xlu1 %v2965_v58, %s2622_s11  ;;  %969 = vrot.lane.b32.xlu0 %v2968_v59, %s2622_s11 }
 0x148   : > { %v1317_v50 = vpop.permute.xlu1 %1316  ;;  %v1315_v48 = vpop.permute.xlu0 %1314 }
 0x149   : > { %1412 = vst.msk [vmem:[#allocation2 + $0x8] sm:$0xff] %vm1410_vm6, %v1317_v50  ;;  %1411 = vst.msk [vmem:[#allocation2] sm:$0xff] %vm1410_vm6, %v1315_v48 }
 0x14a   : > { %939 = vrot.lane.b32.xlu1 %v2198_v40, %s2622_s11  ;;  %937 = vrot.lane.b32.xlu0 %v2197_v41, %s2622_s11 }
 0x14c   : > { %v1542_v49 = vpop.permute.xlu1 %1541  ;;  %v1540_v51 = vpop.permute.xlu0 %1539 }
 0x14d   : > { %1621 = vst.msk [vmem:[#allocation2 + $0x88] sm:$0xff] %vm1603_vm7, %v1542_v49  ;;  %1620 = vst.msk [vmem:[#allocation2 + $0x80] sm:$0xff] %vm1603_vm7, %v1540_v51 }
 0x14e   : > { %1164 = vrot.lane.b32.xlu1 %v3089_v3, %s2623_s12  ;;  %1162 = vrot.lane.b32.xlu0 %v3092_v56, %s2623_s12  ;;  %v3980_v56 = vld [vmem:[#allocation10_spill] sm:$0xff] }
 0x150   : > { %v1510_v58 = vpop.permute.xlu1 %1509  ;;  %v1508_v59 = vpop.permute.xlu0 %1507 }
 0x151   : > { %1605 = vst.msk [vmem:[#allocation2 + $0x8] sm:$0xff] %vm1603_vm7, %v1510_v58  ;;  %1604 = vst.msk [vmem:[#allocation2] sm:$0xff] %vm1603_vm7, %v1508_v59 }
 0x152   : > { %1132 = vrot.lane.b32.xlu1 %v3027_v29, %s2623_s12  ;;  %1130 = vrot.lane.b32.xlu0 %v3030_v30, %s2623_s12  ;;  %v3413_v30 = vld [vmem:[%s2714_s7 + $0x172] sm:$0xff] }
 0x154   : > { %v1735_v6 = vpop.permute.xlu1 %1734  ;;  %v1733_v3 = vpop.permute.xlu0 %1732 }
 0x155   : > { %1814 = vst.msk [vmem:[#allocation2 + $0x88] sm:$0xff] %vm1796_vm8, %v1735_v6  ;;  %1813 = vst.msk [vmem:[#allocation2 + $0x80] sm:$0xff] %vm1796_vm8, %v1733_v3  ;;  %v3541_v3 = vld [vmem:[%s2714_s7 + $0x18c] sm:$0xff] }
 0x156   : > { %1360 = vrot.lane.b32.xlu1 %v3980_v56, %s2624_s13  ;;  %1358 = vrot.lane.b32.xlu0 %v3981_v7, %s2624_s13 }
 0x158   : > { %v1703_v63 = vpop.permute.xlu1 %1702  ;;  %v1701_v29 = vpop.permute.xlu0 %1700 }
 0x159   : > { %1798 = vst.msk [vmem:[#allocation2 + $0x8] sm:$0xff] %vm1796_vm8, %v1703_v63  ;;  %1797 = vst.msk [vmem:[#allocation2] sm:$0xff] %vm1796_vm8, %v1701_v29  ;;  %v3544_v63 = vld [vmem:[%s2714_s7 + $0x184] sm:$0xff] }
 0x15a   : > { %1328 = vrot.lane.b32.xlu1 %v2835_v32, %s2624_s13  ;;  %1326 = vrot.lane.b32.xlu0 %v2838_v33, %s2624_s13  ;;  %v3433_v33 = vld [vmem:[%s2714_s7 + $0xb2] sm:$0xff] }
 0x15c   : > { %v771_v16 = vpop.permute.xlu1 %770  ;;  %v769_v17 = vpop.permute.xlu0 %768  ;;  %v1846_v38 = vld [vmem:[#allocation2 + $0x80] sm:$0xff]  ;;  %v1847_v39 = vld [vmem:[#allocation2 + $0x88] sm:$0xff] }
 0x15d   : > { %848 = vst.msk [vmem:[#allocation2 + $0x98] sm:$0xff] %vm828_vm3, %v771_v16  ;;  %847 = vst.msk [vmem:[#allocation2 + $0x90] sm:$0xff] %vm828_vm3, %v769_v17  ;;  %v2424_v32 = vpack.c.bf16 %v1847_v39, %v1846_v38  ;;  %v3553_v17 = vld [vmem:[%s2714_s7 + $0xcc] sm:$0xff]  ;;  %v3556_v38 = vld [vmem:[%s2714_s7 + $0xc4] sm:$0xff] }
 0x15e   : > { %1553 = vrot.lane.b32.xlu1 %v3413_v30, %s2625_s14  ;;  %1551 = vrot.lane.b32.xlu0 %v3416_v0, %s2625_s14 }
 0x15f   : > { %2426 = vmatprep.subr.msk.bf16.mxu0 %vm3420_vm10, %v2424_v32 }
 0x160   : > { %v964_v46 = vpop.permute.xlu1 %963  ;;  %v962_v47 = vpop.permute.xlu0 %961  ;;  %v1830_v10 = vld [vmem:[#allocation2] sm:$0xff]  ;;  %v1831_v11 = vld [vmem:[#allocation2 + $0x8] sm:$0xff] }
 0x161   : > { %1041 = vst.msk [vmem:[#allocation2 + $0x98] sm:$0xff] %vm1021_vm4, %v964_v46  ;;  %1040 = vst.msk [vmem:[#allocation2 + $0x90] sm:$0xff] %vm1021_vm4, %v962_v47  ;;  %v2427_v4 = vpack.c.bf16 %v1831_v11, %v1830_v10 }
 0x162   : > { %1521 = vrot.lane.b32.xlu1 %v3433_v33, %s2625_s14  ;;  %1519 = vrot.lane.b32.xlu0 %v3436_v27, %s2625_s14 }
 0x163   : > { %2429 = vmatpush3.bf16.xpose.msk.msra.mxu0 %vm3420_vm10, %v2427_v4 }
 0x164   : > { %v932_v5 = vpop.permute.xlu1 %931  ;;  %v930_v57 = vpop.permute.xlu0 %929 }
 0x165   : > { %1025 = vst.msk [vmem:[#allocation2 + $0x18] sm:$0xff] %vm1021_vm4, %v932_v5  ;;  %1024 = vst.msk [vmem:[#allocation2 + $0x10] sm:$0xff] %vm1021_vm4, %v930_v57 }
 0x166   : > { %1746 = vrot.lane.b32.xlu1 %v3113_v42, %s2626_s21  ;;  %1744 = vrot.lane.b32.xlu0 %v3116_v43, %s2626_s21 }
 0x168   : > { %v1157_v45 = vpop.permute.xlu1 %1156  ;;  %v1155_v54 = vpop.permute.xlu0 %1154 }
 0x169   : > { %1234 = vst.msk [vmem:[#allocation2 + $0x98] sm:$0xff] %vm1214_vm5, %v1157_v45  ;;  %1233 = vst.msk [vmem:[#allocation2 + $0x90] sm:$0xff] %vm1214_vm5, %v1155_v54  ;;  %v3598_v45 = vld [vmem:[%s2714_s7 + $0x198] sm:$0xff] }
 0x16a   : > { %1714 = vrot.lane.b32.xlu1 %v3453_v62, %s2626_s21  ;;  %1712 = vrot.lane.b32.xlu0 %v3456_v44, %s2626_s21 }
 0x16c   : > { %v1125_v42 = vpop.permute.xlu1 %1124  ;;  %v1123_v43 = vpop.permute.xlu0 %1122 }
 0x16d   : > { %1218 = vst.msk [vmem:[#allocation2 + $0x18] sm:$0xff] %vm1214_vm5, %v1125_v42  ;;  %1217 = vst.msk [vmem:[#allocation2 + $0x10] sm:$0xff] %vm1214_vm5, %v1123_v43 }
 0x16e   : > { %782 = vrot.lane.b32.xlu1 %v3972_v1, %s2621_s10  ;;  %780 = vrot.lane.b32.xlu0 %v3973_v2, %s2621_s10  ;;  %v2199_v1 = vld [vmem:[%s2714_s7 + $0x92] sm:$0xff] }
 0x170   : > { %v1353_v9 = vpop.permute.xlu1 %1352  ;;  %v1351_v12 = vpop.permute.xlu0 %1350 }
 0x171   : > { %1430 = vst.msk [vmem:[#allocation2 + $0x98] sm:$0xff] %vm1410_vm6, %v1353_v9  ;;  %1429 = vst.msk [vmem:[#allocation2 + $0x90] sm:$0xff] %vm1410_vm6, %v1351_v12  ;;  %v3616_v9 = vld [vmem:[%s2714_s7 + $0x19a] sm:$0xff] }
 0x172   : > { %975 = vrot.lane.b32.xlu1 %v2216_v55, %s2622_s11  ;;  %973 = vrot.lane.b32.xlu0 %v2215_v8, %s2622_s11  ;;  %v3613_v8 = vld [vmem:[%s2714_s7 + $0x1a2] sm:$0xff] }
 0x174   : > { %v1321_v18 = vpop.permute.xlu1 %1320  ;;  %v1319_v2 = vpop.permute.xlu0 %1318 }
 0x175   : > { %1414 = vst.msk [vmem:[#allocation2 + $0x18] sm:$0xff] %vm1410_vm6, %v1321_v18  ;;  %1413 = vst.msk [vmem:[#allocation2 + $0x10] sm:$0xff] %vm1410_vm6, %v1319_v2 }
 0x176   : > { %943 = vrot.lane.b32.xlu1 %v2200_v13, %s2622_s11  ;;  %941 = vrot.lane.b32.xlu0 %v2199_v1, %s2622_s11 }
 0x178   : > { %v1546_v61 = vpop.permute.xlu1 %1545  ;;  %v1544_v24 = vpop.permute.xlu0 %1543 }
 0x179   : > { %1623 = vst.msk [vmem:[#allocation2 + $0x98] sm:$0xff] %vm1603_vm7, %v1546_v61  ;;  %1622 = vst.msk [vmem:[#allocation2 + $0x90] sm:$0xff] %vm1603_vm7, %v1544_v24 }
 0x17a   : > { %1168 = vrot.lane.b32.xlu1 %v2248_v21, %s2623_s12  ;;  %1166 = vrot.lane.b32.xlu0 %v2247_v60, %s2623_s12  ;;  %v3627_v21 = vld [vmem:[%s2714_s7 + $0xe2] sm:$0xff]  ;;  %v3630_v60 = vld [vmem:[%s2714_s7 + $0xda] sm:$0xff] }
 0x17c   : > { %v1514_v31 = vpop.permute.xlu1 %1513  ;;  %v1512_v19 = vpop.permute.xlu0 %1511 }
 0x17d   : > { %1607 = vst.msk [vmem:[#allocation2 + $0x18] sm:$0xff] %vm1603_vm7, %v1514_v31  ;;  %1606 = vst.msk [vmem:[#allocation2 + $0x10] sm:$0xff] %vm1603_vm7, %v1512_v19  ;;  %v3641_v19 = vld [vmem:[%s2714_s7 + $0x1a4] sm:$0xff] }
 0x17e   : > { %1136 = vrot.lane.b32.xlu1 %v2232_v25, %s2623_s12  ;;  %1134 = vrot.lane.b32.xlu0 %v2231_v28, %s2623_s12 }
 0x180   : > { %v1739_v23 = vpop.permute.xlu1 %1738  ;;  %v1737_v52 = vpop.permute.xlu0 %1736 }
 0x181   : > { %1816 = vst.msk [vmem:[#allocation2 + $0x98] sm:$0xff] %vm1796_vm8, %v1739_v23  ;;  %1815 = vst.msk [vmem:[#allocation2 + $0x90] sm:$0xff] %vm1796_vm8, %v1737_v52  ;;  %v3644_v23 = vld [vmem:[%s2714_s7 + $0x19c] sm:$0xff] }
 0x182   : > { %1364 = vrot.lane.b32.xlu1 %v3495_v20, %s2624_s13  ;;  %1362 = vrot.lane.b32.xlu0 %v3498_v22, %s2624_s13 }
 0x184   : > { %v1707_v53 = vpop.permute.xlu1 %1706  ;;  %v1705_v36 = vpop.permute.xlu0 %1704 }
 0x185   : > { %1800 = vst.msk [vmem:[#allocation2 + $0x18] sm:$0xff] %vm1796_vm8, %v1707_v53  ;;  %1799 = vst.msk [vmem:[#allocation2 + $0x10] sm:$0xff] %vm1796_vm8, %v1705_v36  ;;  %v3653_v36 = vld [vmem:[%s2714_s7 + $0xe4] sm:$0xff] }
 0x186   : > { %1332 = vrot.lane.b32.xlu1 %v2849_v34, %s2624_s13  ;;  %1330 = vrot.lane.b32.xlu0 %v2852_v35, %s2624_s13  ;;  %v3527_v34 = vld [vmem:[%s2714_s7 + $0xca] sm:$0xff]  ;;  %v3530_v35 = vld [vmem:[%s2714_s7 + $0xc2] sm:$0xff] }
 0x188   : > { %v775_v37 = vpop.permute.xlu1 %774  ;;  %v773_v40 = vpop.permute.xlu0 %772  ;;  %v1848_v41 = vld [vmem:[#allocation2 + $0x90] sm:$0xff]  ;;  %v1849_v50 = vld [vmem:[#allocation2 + $0x98] sm:$0xff] }
 0x189   : > { %850 = vst.msk [vmem:[#allocation2 + $0xa8] sm:$0xff] %vm828_vm3, %v775_v37  ;;  %849 = vst.msk [vmem:[#allocation2 + $0xa0] sm:$0xff] %vm828_vm3, %v773_v40  ;;  %v2430_v48 = vpack.c.bf16 %v1849_v50, %v1848_v41  ;;  %v3656_v37 = vld [vmem:[%s2714_s7 + $0xdc] sm:$0xff] }
 0x18a   : > { %1557 = vrot.lane.b32.xlu1 %v3513_v15, %s2625_s14  ;;  %1555 = vrot.lane.b32.xlu0 %v3516_v14, %s2625_s14 }
 0x18b   : > { %2432 = vmatprep.subr.msk.bf16.mxu0 %vm3420_vm10, %v2430_v48 }
 0x18c   : > { %v968_v49 = vpop.permute.xlu1 %967  ;;  %v966_v51 = vpop.permute.xlu0 %965  ;;  %v1832_v58 = vld [vmem:[#allocation2 + $0x10] sm:$0xff]  ;;  %v1833_v59 = vld [vmem:[#allocation2 + $0x18] sm:$0xff] }
 0x18d   : > { %1043 = vst.msk [vmem:[#allocation2 + $0xa8] sm:$0xff] %vm1021_vm4, %v968_v49  ;;  %1042 = vst.msk [vmem:[#allocation2 + $0xa0] sm:$0xff] %vm1021_vm4, %v966_v51  ;;  %v2433_v6 = vpack.c.bf16 %v1833_v59, %v1832_v58 }
 0x18e   : > { %1525 = vrot.lane.b32.xlu1 %v3527_v34, %s2625_s14  ;;  %1523 = vrot.lane.b32.xlu0 %v3530_v35, %s2625_s14 }
 0x18f   : > { %2435 = vmatpush3.bf16.xpose.msk.msra.mxu0 %vm3420_vm10, %v2433_v6 }
 0x190   : > { %v936_v29 = vpop.permute.xlu1 %935  ;;  %v934_v16 = vpop.permute.xlu0 %933 }
 0x191   : > { %1027 = vst.msk [vmem:[#allocation2 + $0x28] sm:$0xff] %vm1021_vm4, %v936_v29  ;;  %1026 = vst.msk [vmem:[#allocation2 + $0x20] sm:$0xff] %vm1021_vm4, %v934_v16  ;;  %v2267_v29 = vld [vmem:[%s2714_s7 + $0xf0] sm:$0xff] }
 0x192   : > { %1750 = vrot.lane.b32.xlu1 %v3541_v3, %s2626_s21  ;;  %1748 = vrot.lane.b32.xlu0 %v3544_v63, %s2626_s21 }
 0x194   : > { %v1161_v39 = vpop.permute.xlu1 %1160  ;;  %v1159_v32 = vpop.permute.xlu0 %1158 }
 0x195   : > { %1236 = vst.msk [vmem:[#allocation2 + $0xa8] sm:$0xff] %vm1214_vm5, %v1161_v39  ;;  %1235 = vst.msk [vmem:[#allocation2 + $0xa0] sm:$0xff] %vm1214_vm5, %v1159_v32  ;;  %v2315_v39 = vld [vmem:[%s2714_s7 + $0x1b2] sm:$0xff] }
 0x196   : > { %1718 = vrot.lane.b32.xlu1 %v3553_v17, %s2626_s21  ;;  %1716 = vrot.lane.b32.xlu0 %v3556_v38, %s2626_s21 }
 0x198   : > { %v1129_v46 = vpop.permute.xlu1 %1128  ;;  %v1127_v47 = vpop.permute.xlu0 %1126 }
 0x199   : > { %1220 = vst.msk [vmem:[#allocation2 + $0x28] sm:$0xff] %vm1214_vm5, %v1129_v46  ;;  %1219 = vst.msk [vmem:[#allocation2 + $0x20] sm:$0xff] %vm1214_vm5, %v1127_v47 }
 0x19a   : > { %786 = vrot.lane.b32.xlu1 %v3980_v56, %s2621_s10  ;;  %784 = vrot.lane.b32.xlu0 %v3981_v7, %s2621_s10  ;;  %v2250_v56 = vld [vmem:[%s2714_s7 + $0x174] sm:$0xff]  ;;  %v2249_v7 = vld [vmem:[%s2714_s7 + $0x16c] sm:$0xff] }
 0x19c   : > { %v1357_v10 = vpop.permute.xlu1 %1356  ;;  %v1355_v11 = vpop.permute.xlu0 %1354 }
 0x19d   : > { %1432 = vst.msk [vmem:[#allocation2 + $0xa8] sm:$0xff] %vm1410_vm6, %v1357_v10  ;;  %1431 = vst.msk [vmem:[#allocation2 + $0xa0] sm:$0xff] %vm1410_vm6, %v1355_v11 }
 0x19e   : > { %979 = vrot.lane.b32.xlu1 %v3413_v30, %s2622_s11  ;;  %977 = vrot.lane.b32.xlu0 %v3416_v0, %s2622_s11 }
 0x1a0   : > { %v1325_v4 = vpop.permute.xlu1 %1324  ;;  %v1323_v5 = vpop.permute.xlu0 %1322 }
 0x1a1   : > { %1416 = vst.msk [vmem:[#allocation2 + $0x28] sm:$0xff] %vm1410_vm6, %v1325_v4  ;;  %1415 = vst.msk [vmem:[#allocation2 + $0x20] sm:$0xff] %vm1410_vm6, %v1323_v5  ;;  %v2300_v4 = vld [vmem:[%s2714_s7 + $0xfa] sm:$0xff]  ;;  %v2299_v5 = vld [vmem:[%s2714_s7 + $0xf2] sm:$0xff] }
 0x1a2   : > { %947 = vrot.lane.b32.xlu1 %v3433_v33, %s2622_s11  ;;  %945 = vrot.lane.b32.xlu0 %v3436_v27, %s2622_s11  ;;  %v3595_v27 = vld [vmem:[%s2714_s7 + $0x1a0] sm:$0xff] }
 0x1a4   : > { %v1550_v30 = vpop.permute.xlu1 %1549  ;;  %v1548_v57 = vpop.permute.xlu0 %1547 }
 0x1a5   : > { %1625 = vst.msk [vmem:[#allocation2 + $0xa8] sm:$0xff] %vm1603_vm7, %v1550_v30  ;;  %1624 = vst.msk [vmem:[#allocation2 + $0xa0] sm:$0xff] %vm1603_vm7, %v1548_v57 }
 0x1a6   : > { %1172 = vrot.lane.b32.xlu1 %v2250_v56, %s2623_s12  ;;  %1170 = vrot.lane.b32.xlu0 %v2249_v7, %s2623_s12 }
 0x1a8   : > { %v1518_v0 = vpop.permute.xlu1 %1517  ;;  %v1516_v33 = vpop.permute.xlu0 %1515 }
 0x1a9   : > { %1609 = vst.msk [vmem:[#allocation2 + $0x28] sm:$0xff] %vm1603_vm7, %v1518_v0  ;;  %1608 = vst.msk [vmem:[#allocation2 + $0x20] sm:$0xff] %vm1603_vm7, %v1516_v33  ;;  %v2348_v33 = vld [vmem:[%s2714_s7 + $0x1bc] sm:$0xff] }
 0x1aa   : > { %1140 = vrot.lane.b32.xlu1 %v3453_v62, %s2623_s12  ;;  %1138 = vrot.lane.b32.xlu0 %v3456_v44, %s2623_s12  ;;  %v2266_v62 = vld [vmem:[%s2714_s7 + $0xe0] sm:$0xff]  ;;  %v2265_v44 = vld [vmem:[%s2714_s7 + $0xd8] sm:$0xff] }
 0x1ac   : > { %v1743_v54 = vpop.permute.xlu1 %1742  ;;  %v1741_v42 = vpop.permute.xlu0 %1740 }
 0x1ad   : > { %1818 = vst.msk [vmem:[#allocation2 + $0xa8] sm:$0xff] %vm1796_vm8, %v1743_v54  ;;  %1817 = vst.msk [vmem:[#allocation2 + $0xa0] sm:$0xff] %vm1796_vm8, %v1741_v42  ;;  %v2347_v54 = vld [vmem:[%s2714_s7 + $0x1b4] sm:$0xff] }
 0x1ae   : > { %1368 = vrot.lane.b32.xlu1 %v3595_v27, %s2624_s13  ;;  %1366 = vrot.lane.b32.xlu0 %v3598_v45, %s2624_s13 }
 0x1b0   : > { %v1711_v43 = vpop.permute.xlu1 %1710  ;;  %v1709_v55 = vpop.permute.xlu0 %1708 }
 0x1b1   : > { %1802 = vst.msk [vmem:[#allocation2 + $0x28] sm:$0xff] %vm1796_vm8, %v1711_v43  ;;  %1801 = vst.msk [vmem:[#allocation2 + $0x20] sm:$0xff] %vm1796_vm8, %v1709_v55  ;;  %v2331_v43 = vld [vmem:[%s2714_s7 + $0xf4] sm:$0xff] }
 0x1b2   : > { %1336 = vrot.lane.b32.xlu1 %v2266_v62, %s2624_s13  ;;  %1334 = vrot.lane.b32.xlu0 %v2265_v44, %s2624_s13  ;;  %v2332_v44 = vld [vmem:[%s2714_s7 + $0xfc] sm:$0xff] }
 0x1b4   : > { %v779_v12 = vpop.permute.xlu1 %778  ;;  %v777_v13 = vpop.permute.xlu0 %776  ;;  %v1850_v1 = vld [vmem:[#allocation2 + $0xa0] sm:$0xff]  ;;  %v1851_v18 = vld [vmem:[#allocation2 + $0xa8] sm:$0xff] }
 0x1b5   : > { %852 = vst.msk [vmem:[#allocation2 + $0xb8] sm:$0xff] %vm828_vm3, %v779_v12  ;;  %851 = vst.msk [vmem:[#allocation2 + $0xb0] sm:$0xff] %vm828_vm3, %v777_v13  ;;  %v2436_v2 = vpack.c.bf16 %v1851_v18, %v1850_v1 }
 0x1b6   : > { %1561 = vrot.lane.b32.xlu1 %v3613_v8, %s2625_s14  ;;  %1559 = vrot.lane.b32.xlu0 %v3616_v9, %s2625_s14 }
 0x1b7   : > { %2438 = vmatprep.subr.msk.bf16.mxu0 %vm3420_vm10, %v2436_v2 }
 0x1b8   : > { %v972_v61 = vpop.permute.xlu1 %971  ;;  %v970_v24 = vpop.permute.xlu0 %969  ;;  %v1834_v25 = vld [vmem:[#allocation2 + $0x20] sm:$0xff]  ;;  %v1835_v28 = vld [vmem:[#allocation2 + $0x28] sm:$0xff] }
 0x1b9   : > { %1045 = vst.msk [vmem:[#allocation2 + $0xb8] sm:$0xff] %vm1021_vm4, %v972_v61  ;;  %1044 = vst.msk [vmem:[#allocation2 + $0xb0] sm:$0xff] %vm1021_vm4, %v970_v24  ;;  %v2439_v31 = vpack.c.bf16 %v1835_v28, %v1834_v25 }
 0x1ba   : > { %1529 = vrot.lane.b32.xlu1 %v3627_v21, %s2625_s14  ;;  %1527 = vrot.lane.b32.xlu0 %v3630_v60, %s2625_s14 }
 0x1bb   : > { %2441 = vmatpush3.bf16.xpose.msk.msra.mxu0 %vm3420_vm10, %v2439_v31  ;;  %v2270_v31 = vld [vmem:[%s2714_s7 + $0x110] sm:$0xff] }
 0x1bc   : > { %v940_v52 = vpop.permute.xlu1 %939  ;;  %v938_v53 = vpop.permute.xlu0 %937 }
 0x1bd   : > { %1029 = vst.msk [vmem:[#allocation2 + $0x38] sm:$0xff] %vm1021_vm4, %v940_v52  ;;  %1028 = vst.msk [vmem:[#allocation2 + $0x30] sm:$0xff] %vm1021_vm4, %v938_v53  ;;  %v2318_v53 = vld [vmem:[%s2714_s7 + $0x1d2] sm:$0xff] }
 0x1be   : > { %1754 = vrot.lane.b32.xlu1 %v3641_v19, %s2626_s21  ;;  %1752 = vrot.lane.b32.xlu0 %v3644_v23, %s2626_s21 }
 0x1c0   : > { %v1165_v40 = vpop.permute.xlu1 %1164  ;;  %v1163_v41 = vpop.permute.xlu0 %1162 }
 0x1c1   : > { %1238 = vst.msk [vmem:[#allocation2 + $0xb8] sm:$0xff] %vm1214_vm5, %v1165_v40  ;;  %1237 = vst.msk [vmem:[#allocation2 + $0xb0] sm:$0xff] %vm1214_vm5, %v1163_v41 }
 0x1c2   : > { %1722 = vrot.lane.b32.xlu1 %v3653_v36, %s2626_s21  ;;  %1720 = vrot.lane.b32.xlu0 %v3656_v37, %s2626_s21 }
 0x1c4   : > { %v1133_v50 = vpop.permute.xlu1 %1132  ;;  %v1131_v48 = vpop.permute.xlu0 %1130 }
 0x1c5   : > { %1222 = vst.msk [vmem:[#allocation2 + $0x38] sm:$0xff] %vm1214_vm5, %v1133_v50  ;;  %1221 = vst.msk [vmem:[#allocation2 + $0x30] sm:$0xff] %vm1214_vm5, %v1131_v48 }
 0x1c6   : > { %790 = vrot.lane.b32.xlu1 %v3495_v20, %s2621_s10  ;;  %788 = vrot.lane.b32.xlu0 %v3498_v22, %s2621_s10 }
 0x1c8   : > { %v1361_v49 = vpop.permute.xlu1 %1360  ;;  %v1359_v51 = vpop.permute.xlu0 %1358 }
 0x1c9   : > { %1434 = vst.msk [vmem:[#allocation2 + $0xb8] sm:$0xff] %vm1410_vm6, %v1361_v49  ;;  %1433 = vst.msk [vmem:[#allocation2 + $0xb0] sm:$0xff] %vm1410_vm6, %v1359_v51  ;;  %v2302_v49 = vld [vmem:[%s2714_s7 + $0x112] sm:$0xff]  ;;  %v2301_v51 = vld [vmem:[%s2714_s7 + $0x10a] sm:$0xff] }
 0x1ca   : > { %983 = vrot.lane.b32.xlu1 %v3513_v15, %s2622_s11  ;;  %981 = vrot.lane.b32.xlu0 %v3516_v14, %s2622_s11 }
 0x1cc   : > { %v1329_v58 = vpop.permute.xlu1 %1328  ;;  %v1327_v59 = vpop.permute.xlu0 %1326 }
 0x1cd   : > { %1418 = vst.msk [vmem:[#allocation2 + $0x38] sm:$0xff] %vm1410_vm6, %v1329_v58  ;;  %1417 = vst.msk [vmem:[#allocation2 + $0x30] sm:$0xff] %vm1410_vm6, %v1327_v59 }
 0x1ce   : > { %951 = vrot.lane.b32.xlu1 %v3527_v34, %s2622_s11  ;;  %949 = vrot.lane.b32.xlu0 %v3530_v35, %s2622_s11  ;;  %v2284_v34 = vld [vmem:[%s2714_s7 + $0x1b8] sm:$0xff]  ;;  %v2283_v35 = vld [vmem:[%s2714_s7 + $0x1b0] sm:$0xff] }
 0x1d0   : > { %v1554_v20 = vpop.permute.xlu1 %1553  ;;  %v1552_v22 = vpop.permute.xlu0 %1551 }
 0x1d1   : > { %1627 = vst.msk [vmem:[#allocation2 + $0xb8] sm:$0xff] %vm1603_vm7, %v1554_v20  ;;  %1626 = vst.msk [vmem:[#allocation2 + $0xb0] sm:$0xff] %vm1603_vm7, %v1552_v22 }
 0x1d2   : > { %1176 = vrot.lane.b32.xlu1 %v3541_v3, %s2623_s12  ;;  %1174 = vrot.lane.b32.xlu0 %v3544_v63, %s2623_s12  ;;  %v2268_v63 = vld [vmem:[%s2714_s7 + $0xf8] sm:$0xff] }
 0x1d4   : > { %v1522_v15 = vpop.permute.xlu1 %1521  ;;  %v1520_v14 = vpop.permute.xlu0 %1519 }
 0x1d5   : > { %1611 = vst.msk [vmem:[#allocation2 + $0x38] sm:$0xff] %vm1603_vm7, %v1522_v15  ;;  %1610 = vst.msk [vmem:[#allocation2 + $0x30] sm:$0xff] %vm1603_vm7, %v1520_v14  ;;  %v2350_v14 = vld [vmem:[%s2714_s7 + $0x1d4] sm:$0xff] }
 0x1d6   : > { %1144 = vrot.lane.b32.xlu1 %v3553_v17, %s2623_s12  ;;  %1142 = vrot.lane.b32.xlu0 %v3556_v38, %s2623_s12  ;;  %v2316_v38 = vld [vmem:[%s2714_s7 + $0x1ba] sm:$0xff] }
 0x1d8   : > { %v1747_v6 = vpop.permute.xlu1 %1746  ;;  %v1745_v3 = vpop.permute.xlu0 %1744 }
 0x1d9   : > { %1820 = vst.msk [vmem:[#allocation2 + $0xb8] sm:$0xff] %vm1796_vm8, %v1747_v6  ;;  %1819 = vst.msk [vmem:[#allocation2 + $0xb0] sm:$0xff] %vm1796_vm8, %v1745_v3  ;;  %v2334_v3 = vld [vmem:[%s2714_s7 + $0x114] sm:$0xff] }
 0x1da   : > { %1372 = vrot.lane.b32.xlu1 %v2284_v34, %s2624_s13  ;;  %1370 = vrot.lane.b32.xlu0 %v2283_v35, %s2624_s13  ;;  %v2349_v34 = vld [vmem:[%s2714_s7 + $0x1cc] sm:$0xff] }
 0x1dc   : > { %v1715_v16 = vpop.permute.xlu1 %1714  ;;  %v1713_v17 = vpop.permute.xlu0 %1712 }
 0x1dd   : > { %1804 = vst.msk [vmem:[#allocation2 + $0x38] sm:$0xff] %vm1796_vm8, %v1715_v16  ;;  %1803 = vst.msk [vmem:[#allocation2 + $0x30] sm:$0xff] %vm1796_vm8, %v1713_v17 }
 0x1de   : > { %1340 = vrot.lane.b32.xlu1 %v2268_v63, %s2624_s13  ;;  %1338 = vrot.lane.b32.xlu0 %v2267_v29, %s2624_s13  ;;  %v2333_v63 = vld [vmem:[%s2714_s7 + $0x10c] sm:$0xff]  ;;  %v3803_v29 = vld [vmem:[%s3942_s1] sm:$0xff] }
 0x1df   : > { %2422 = vmatprep.mubr.msk.f32.mxu0 %vm1862_vm9, %v3803_v29 }
 0x1e0   : > { %v783_v32 = vpop.permute.xlu1 %782  ;;  %v781_v46 = vpop.permute.xlu0 %780  ;;  %v1852_v47 = vld [vmem:[#allocation2 + $0xb0] sm:$0xff]  ;;  %v1853_v10 = vld [vmem:[#allocation2 + $0xb8] sm:$0xff] }
 0x1e1   : > { %854 = vst.msk [vmem:[#allocation2 + $0xc8] sm:$0xff] %vm828_vm3, %v783_v32  ;;  %853 = vst.msk [vmem:[#allocation2 + $0xc0] sm:$0xff] %vm828_vm3, %v781_v46  ;;  %v2442_v11 = vpack.c.bf16 %v1853_v10, %v1852_v47  ;;  %v2033_v32 = vld [vmem:[%s3943_s2] sm:$0xff]  ;;  %v2627_v47 = vmov 0  }
 0x1e2   : > { %1565 = vrot.lane.b32.xlu1 %v2316_v38, %s2625_s14  ;;  %1563 = vrot.lane.b32.xlu0 %v2315_v39, %s2625_s14  ;;  %v2041_v46 = vld [vmem:[%s3944_s3] sm:$0xff] }
 0x1e3   : > { %2444 = vmatprep.subr.msk.bf16.mxu0 %vm3420_vm10, %v2442_v11  ;;  %2537 = vset.pattern.permute.xlu0 %v2627_v47 }
 0x1e4   : > { %v976_v56 = vpop.permute.xlu1 %975  ;;  %v974_v7 = vpop.permute.xlu0 %973  ;;  %v1836_v30 = vld [vmem:[#allocation2 + $0x30] sm:$0xff]  ;;  %v1837_v57 = vld [vmem:[#allocation2 + $0x38] sm:$0xff]  ;;  %2538 = vset.pattern.permute.xlu1 %v2627_v47 }
 0x1e5   : > { %1047 = vst.msk [vmem:[#allocation2 + $0xc8] sm:$0xff] %vm1021_vm4, %v976_v56  ;;  %1046 = vst.msk [vmem:[#allocation2 + $0xc0] sm:$0xff] %vm1021_vm4, %v974_v7  ;;  %v2445_v0 = vpack.c.bf16 %v1837_v57, %v1836_v30 }
 0x1e6   : > { %1533 = vrot.lane.b32.xlu1 %v2300_v4, %s2625_s14  ;;  %1531 = vrot.lane.b32.xlu0 %v2299_v5, %s2625_s14 }
 0x1e7   : > { %2447 = vmatpush3.bf16.xpose.msk.msra.mxu0 %vm3420_vm10, %v2445_v0 }
 0x1e8   : > { %v944_v42 = vpop.permute.xlu1 %943  ;;  %v942_v62 = vpop.permute.xlu0 %941 }
 0x1e9   : > { %1031 = vst.msk [vmem:[#allocation2 + $0x48] sm:$0xff] %vm1021_vm4, %v944_v42  ;;  %1030 = vst.msk [vmem:[#allocation2 + $0x40] sm:$0xff] %vm1021_vm4, %v942_v62 }
 0x1ea   : > { %1758 = vrot.lane.b32.xlu1 %v2348_v33, %s2626_s21  ;;  %1756 = vrot.lane.b32.xlu0 %v2347_v54, %s2626_s21 }
 0x1ec   : > { %v1169_v55 = vpop.permute.xlu1 %1168  ;;  %v1167_v12 = vpop.permute.xlu0 %1166 }
 0x1ed   : > { %1240 = vst.msk [vmem:[#allocation2 + $0xc8] sm:$0xff] %vm1214_vm5, %v1169_v55  ;;  %1239 = vst.msk [vmem:[#allocation2 + $0xc0] sm:$0xff] %vm1214_vm5, %v1167_v12 }
 0x1ee   : > { %1726 = vrot.lane.b32.xlu1 %v2332_v44, %s2626_s21  ;;  %1724 = vrot.lane.b32.xlu0 %v2331_v43, %s2626_s21 }
 0x1f0   : > { %v1137_v13 = vpop.permute.xlu1 %1136  ;;  %v1135_v1 = vpop.permute.xlu0 %1134 }
 0x1f1   : > { %1224 = vst.msk [vmem:[#allocation2 + $0x48] sm:$0xff] %vm1214_vm5, %v1137_v13  ;;  %1223 = vst.msk [vmem:[#allocation2 + $0x40] sm:$0xff] %vm1214_vm5, %v1135_v1 }
 0x1f2   : > { %794 = vrot.lane.b32.xlu1 %v3595_v27, %s2621_s10  ;;  %792 = vrot.lane.b32.xlu0 %v3598_v45, %s2621_s10 }
 0x1f4   : > { %v1365_v18 = vpop.permute.xlu1 %1364  ;;  %v1363_v2 = vpop.permute.xlu0 %1362 }
 0x1f5   : > { %1436 = vst.msk [vmem:[#allocation2 + $0xc8] sm:$0xff] %vm1410_vm6, %v1365_v18  ;;  %1435 = vst.msk [vmem:[#allocation2 + $0xc0] sm:$0xff] %vm1410_vm6, %v1363_v2 }
 0x1f6   : > { %987 = vrot.lane.b32.xlu1 %v3613_v8, %s2622_s11  ;;  %985 = vrot.lane.b32.xlu0 %v3616_v9, %s2622_s11 }
 0x1f8   : > { %v1333_v61 = vpop.permute.xlu1 %1332  ;;  %v1331_v24 = vpop.permute.xlu0 %1330 }
 0x1f9   : > { %1420 = vst.msk [vmem:[#allocation2 + $0x48] sm:$0xff] %vm1410_vm6, %v1333_v61  ;;  %1419 = vst.msk [vmem:[#allocation2 + $0x40] sm:$0xff] %vm1410_vm6, %v1331_v24 }
 0x1fa   : > { %955 = vrot.lane.b32.xlu1 %v3627_v21, %s2622_s11  ;;  %953 = vrot.lane.b32.xlu0 %v3630_v60, %s2622_s11  ;;  %v2286_v21 = vld [vmem:[%s2714_s7 + $0x1d0] sm:$0xff]  ;;  %v2285_v60 = vld [vmem:[%s2714_s7 + $0x1c8] sm:$0xff] }
 0x1fc   : > { %v1558_v27 = vpop.permute.xlu1 %1557  ;;  %v1556_v45 = vpop.permute.xlu0 %1555 }
 0x1fd   : > { %1629 = vst.msk [vmem:[#allocation2 + $0xc8] sm:$0xff] %vm1603_vm7, %v1558_v27  ;;  %1628 = vst.msk [vmem:[#allocation2 + $0xc0] sm:$0xff] %vm1603_vm7, %v1556_v45 }
 0x1fe   : > { %1180 = vrot.lane.b32.xlu1 %v3641_v19, %s2623_s12  ;;  %1178 = vrot.lane.b32.xlu0 %v3644_v23, %s2623_s12  ;;  %v2269_v19 = vld [vmem:[%s2714_s7 + $0x108] sm:$0xff] }
 0x200   : > { %v1526_v8 = vpop.permute.xlu1 %1525  ;;  %v1524_v9 = vpop.permute.xlu0 %1523 }
 0x201   : > { %1613 = vst.msk [vmem:[#allocation2 + $0x48] sm:$0xff] %vm1603_vm7, %v1526_v8  ;;  %1612 = vst.msk [vmem:[#allocation2 + $0x40] sm:$0xff] %vm1603_vm7, %v1524_v9 }
 0x202   : > { %1148 = vrot.lane.b32.xlu1 %v3653_v36, %s2623_s12  ;;  %1146 = vrot.lane.b32.xlu0 %v3656_v37, %s2623_s12  ;;  %v2317_v36 = vld [vmem:[%s2714_s7 + $0x1ca] sm:$0xff]  ;;  %s2157_s7 = sshll.u32 %s202_s6, 4 }
 0x203   : > { %s204_s9 = scalar_lea.vmem [#allocation3], %s2157_s7 }
 0x204   : > { %v1751_v25 = vpop.permute.xlu1 %1750  ;;  %v1749_v28 = vpop.permute.xlu0 %1748  ;;  %s2070_s10 = sshll.u32 %s204_s9, 4  ;;  %s3896_s10 = int_to_ptr.vmem [resolvable:$true] %s2070_s10 }
 0x205   : > { %1822 = vst.msk [vmem:[#allocation2 + $0xc8] sm:$0xff] %vm1796_vm8, %v1751_v25  ;;  %1821 = vst.msk [vmem:[#allocation2 + $0xc0] sm:$0xff] %vm1796_vm8, %v1749_v28  ;;  %p2546_p1 = scmp.lt.s32.totalorder %s3896_s10, %s2544_s22 }
 0x206   : > { %1376 = vrot.lane.b32.xlu1 %v2286_v21, %s2624_s13  ;;  %1374 = vrot.lane.b32.xlu0 %v2285_v60, %s2624_s13 }
 0x208   : > { %v1719_v23 = vpop.permute.xlu1 %1718  ;;  %v1717_v52 = vpop.permute.xlu0 %1716 }
 0x209   : > { %1806 = vst.msk [vmem:[#allocation2 + $0x48] sm:$0xff] %vm1796_vm8, %v1719_v23  ;;  %1805 = vst.msk [vmem:[#allocation2 + $0x40] sm:$0xff] %vm1796_vm8, %v1717_v52 }
 0x20a   : > { %1344 = vrot.lane.b32.xlu1 %v2270_v31, %s2624_s13  ;;  %1342 = vrot.lane.b32.xlu0 %v2269_v19, %s2624_s13  ;;  %s3894_s13 = scalar_lea.hbm %s3945_s4, %s2389_s8 }
 0x20c   : > { %v787_v37 = vpop.permute.xlu1 %786  ;;  %v785_v40 = vpop.permute.xlu0 %784  ;;  %v1854_v41 = vld [vmem:[#allocation2 + $0xc0] sm:$0xff]  ;;  %v1855_v50 = vld [vmem:[#allocation2 + $0xc8] sm:$0xff] }
 0x20d   : > { %856 = vst.msk [vmem:[#allocation2 + $0xd8] sm:$0xff] %vm828_vm3, %v787_v37  ;;  %855 = vst.msk [vmem:[#allocation2 + $0xd0] sm:$0xff] %vm828_vm3, %v785_v40  ;;  %v2448_v48 = vpack.c.bf16 %v1855_v50, %v1854_v41 }
 0x20e   : > { %1569 = vrot.lane.b32.xlu1 %v2318_v53, %s2625_s14  ;;  %1567 = vrot.lane.b32.xlu0 %v2317_v36, %s2625_s14 }
 0x20f   : > { %2450 = vmatprep.subr.msk.bf16.mxu0 %vm3420_vm10, %v2448_v48 }
 0x210   : > { %v980_v58 = vpop.permute.xlu1 %979  ;;  %v978_v59 = vpop.permute.xlu0 %977  ;;  %v1838_v20 = vld [vmem:[#allocation2 + $0x40] sm:$0xff]  ;;  %v1839_v22 = vld [vmem:[#allocation2 + $0x48] sm:$0xff] }
 0x211   : > { %1049 = vst.msk [vmem:[#allocation2 + $0xd8] sm:$0xff] %vm1021_vm4, %v980_v58  ;;  %1048 = vst.msk [vmem:[#allocation2 + $0xd0] sm:$0xff] %vm1021_vm4, %v978_v59  ;;  %v2451_v15 = vpack.c.bf16 %v1839_v22, %v1838_v20 }
 0x212   : > { %1537 = vrot.lane.b32.xlu1 %v2302_v49, %s2625_s14  ;;  %1535 = vrot.lane.b32.xlu0 %v2301_v51, %s2625_s14  ;;  %s2054_s14 = scalar_lea.sflag [#allocation4], %s202_s6 }
 0x213   : > { %2453 = vmatpush3.bf16.xpose.msk.msra.mxu0 %vm3420_vm10, %v2451_v15 }
 0x214   : > { %v948_v35 = vpop.permute.xlu1 %947  ;;  %v946_v6 = vpop.permute.xlu0 %945 }
 0x215   : > { %1033 = vst.msk [vmem:[#allocation2 + $0x58] sm:$0xff] %vm1021_vm4, %v948_v35  ;;  %1032 = vst.msk [vmem:[#allocation2 + $0x50] sm:$0xff] %vm1021_vm4, %v946_v6 }
 0x216   : > { %1762 = vrot.lane.b32.xlu1 %v2350_v14, %s2626_s21  ;;  %1760 = vrot.lane.b32.xlu0 %v2349_v34, %s2626_s21 }
 0x218   : > { %v1173_v16 = vpop.permute.xlu1 %1172  ;;  %v1171_v17 = vpop.permute.xlu0 %1170 }
 0x219   : > { %1242 = vst.msk [vmem:[#allocation2 + $0xd8] sm:$0xff] %vm1214_vm5, %v1173_v16  ;;  %1241 = vst.msk [vmem:[#allocation2 + $0xd0] sm:$0xff] %vm1214_vm5, %v1171_v17 }
 0x21a   : > { %1730 = vrot.lane.b32.xlu1 %v2334_v3, %s2626_s21  ;;  %1728 = vrot.lane.b32.xlu0 %v2333_v63, %s2626_s21  ;;  %s2539_s21 = scalar_lea.vmem %s3896_s10, 256 }
 0x21b   : > { %p2540_p12 = scmp.ne.s32.totalorder %s3896_s10, %s2539_s21  ;;  %p2547_p2 = scmp.lt.s32.totalorder %s2545_s24, %s2539_s21 }
 0x21c   : > { %v1141_v38 = vpop.permute.xlu1 %1140  ;;  %v1139_v39 = vpop.permute.xlu0 %1138 }
 0x21d   : > { %1226 = vst.msk [vmem:[#allocation2 + $0x58] sm:$0xff] %vm1214_vm5, %v1141_v38  ;;  %1225 = vst.msk [vmem:[#allocation2 + $0x50] sm:$0xff] %vm1214_vm5, %v1139_v39  ;;  %p2541_p13 = pnand %p2540_p12, %p2694_p4  ;;  %p2548_p3 = por %p2547_p2, %p2546_p1 }
 0x21e   : > { %2036 = vperm.xlu0 %2537, %v2033_v32   ;;  %2044 = vperm.xlu1 %2538, %v2041_v46  }
 0x21f   : > { %p2542_p0 = pneg %p2541_p13 }
 0x220   : > { %v1369_v10 = vpop.permute.xlu1 %1368  ;;  %v1367_v11 = vpop.permute.xlu0 %1366 }
 0x221   : > { %1438 = vst.msk [vmem:[#allocation2 + $0xd8] sm:$0xff] %vm1410_vm6, %v1369_v10  ;;  %1437 = vst.msk [vmem:[#allocation2 + $0xd0] sm:$0xff] %vm1410_vm6, %v1367_v11  ;;  %p2549_p5 = pnand %p2548_p3, %p2542_p0 }
 0x224   : > { %v1337_v4 = vpop.permute.xlu1 %1336  ;;  %v1335_v5 = vpop.permute.xlu0 %1334 }
 0x225   : > { %1422 = vst.msk [vmem:[#allocation2 + $0x58] sm:$0xff] %vm1410_vm6, %v1337_v4  ;;  %1421 = vst.msk [vmem:[#allocation2 + $0x50] sm:$0xff] %vm1410_vm6, %v1335_v5 }
 0x228   : > { %v1562_v56 = vpop.permute.xlu1 %1561  ;;  %v1560_v7 = vpop.permute.xlu0 %1559 }
 0x229   : > { %1631 = vst.msk [vmem:[#allocation2 + $0xd8] sm:$0xff] %vm1603_vm7, %v1562_v56  ;;  %1630 = vst.msk [vmem:[#allocation2 + $0xd0] sm:$0xff] %vm1603_vm7, %v1560_v7 }
 0x22c   : > { %v1530_v30 = vpop.permute.xlu1 %1529  ;;  %v1528_v57 = vpop.permute.xlu0 %1527 }
 0x22d   : > { %1615 = vst.msk [vmem:[#allocation2 + $0x58] sm:$0xff] %vm1603_vm7, %v1530_v30  ;;  %1614 = vst.msk [vmem:[#allocation2 + $0x50] sm:$0xff] %vm1603_vm7, %v1528_v57 }
 0x230   : > { %v1755_v0 = vpop.permute.xlu1 %1754  ;;  %v1753_v33 = vpop.permute.xlu0 %1752 }
 0x231   : > { %1824 = vst.msk [vmem:[#allocation2 + $0xd8] sm:$0xff] %vm1796_vm8, %v1755_v0  ;;  %1823 = vst.msk [vmem:[#allocation2 + $0xd0] sm:$0xff] %vm1796_vm8, %v1753_v33 }
 0x234   : > { %v1723_v54 = vpop.permute.xlu1 %1722  ;;  %v1721_v42 = vpop.permute.xlu0 %1720 }
 0x235   : > { %1808 = vst.msk [vmem:[#allocation2 + $0x58] sm:$0xff] %vm1796_vm8, %v1723_v54  ;;  %1807 = vst.msk [vmem:[#allocation2 + $0x50] sm:$0xff] %vm1796_vm8, %v1721_v42 }
 0x238   : > { %v791_v62 = vpop.permute.xlu1 %790  ;;  %v789_v44 = vpop.permute.xlu0 %788  ;;  %v1856_v43 = vld [vmem:[#allocation2 + $0xd0] sm:$0xff]  ;;  %v1857_v55 = vld [vmem:[#allocation2 + $0xd8] sm:$0xff] }
 0x239   : > { %858 = vst.msk [vmem:[#allocation2 + $0xe8] sm:$0xff] %vm828_vm3, %v791_v62  ;;  %857 = vst.msk [vmem:[#allocation2 + $0xe0] sm:$0xff] %vm828_vm3, %v789_v44  ;;  %v2454_v12 = vpack.c.bf16 %v1857_v55, %v1856_v43 }
 0x23b   : > { %2456 = vmatprep.subr.msk.bf16.mxu0 %vm3420_vm10, %v2454_v12 }
 0x23c   : > { %v984_v13 = vpop.permute.xlu1 %983  ;;  %v982_v1 = vpop.permute.xlu0 %981  ;;  %v1840_v18 = vld [vmem:[#allocation2 + $0x50] sm:$0xff]  ;;  %v1841_v2 = vld [vmem:[#allocation2 + $0x58] sm:$0xff] }
 0x23d   : > { %1051 = vst.msk [vmem:[#allocation2 + $0xe8] sm:$0xff] %vm1021_vm4, %v984_v13  ;;  %1050 = vst.msk [vmem:[#allocation2 + $0xe0] sm:$0xff] %vm1021_vm4, %v982_v1  ;;  %v2457_v61 = vpack.c.bf16 %v1841_v2, %v1840_v18 }
 0x23f   : > { %2459 = vmatpush3.bf16.xpose.msk.msra.mxu0 %vm3420_vm10, %v2457_v61 }
 0x240   : > { %v952_v24 = vpop.permute.xlu1 %951  ;;  %v950_v27 = vpop.permute.xlu0 %949 }
 0x241   : > { %1035 = vst.msk [vmem:[#allocation2 + $0x68] sm:$0xff] %vm1021_vm4, %v952_v24  ;;  %1034 = vst.msk [vmem:[#allocation2 + $0x60] sm:$0xff] %vm1021_vm4, %v950_v27 }
 0x244   : > { %v1177_v45 = vpop.permute.xlu1 %1176  ;;  %v1175_v8 = vpop.permute.xlu0 %1174 }
 0x245   : > { %1244 = vst.msk [vmem:[#allocation2 + $0xe8] sm:$0xff] %vm1214_vm5, %v1177_v45  ;;  %1243 = vst.msk [vmem:[#allocation2 + $0xe0] sm:$0xff] %vm1214_vm5, %v1175_v8 }
 0x248   : > { %v1145_v9 = vpop.permute.xlu1 %1144  ;;  %v1143_v21 = vpop.permute.xlu0 %1142 }
 0x249   : > { %1228 = vst.msk [vmem:[#allocation2 + $0x68] sm:$0xff] %vm1214_vm5, %v1145_v9  ;;  %1227 = vst.msk [vmem:[#allocation2 + $0x60] sm:$0xff] %vm1214_vm5, %v1143_v21 }
 0x24c   : > { %v1373_v60 = vpop.permute.xlu1 %1372  ;;  %v1371_v25 = vpop.permute.xlu0 %1370 }
 0x24d   : > { %1440 = vst.msk [vmem:[#allocation2 + $0xe8] sm:$0xff] %vm1410_vm6, %v1373_v60  ;;  %1439 = vst.msk [vmem:[#allocation2 + $0xe0] sm:$0xff] %vm1410_vm6, %v1371_v25 }
 0x250   : > { %v1341_v28 = vpop.permute.xlu1 %1340  ;;  %v1339_v31 = vpop.permute.xlu0 %1338 }
 0x251   : > { %1424 = vst.msk [vmem:[#allocation2 + $0x68] sm:$0xff] %vm1410_vm6, %v1341_v28  ;;  %1423 = vst.msk [vmem:[#allocation2 + $0x60] sm:$0xff] %vm1410_vm6, %v1339_v31 }
 0x254   : > { %v1566_v19 = vpop.permute.xlu1 %1565  ;;  %v1564_v23 = vpop.permute.xlu0 %1563 }
 0x255   : > { %1633 = vst.msk [vmem:[#allocation2 + $0xe8] sm:$0xff] %vm1603_vm7, %v1566_v19  ;;  %1632 = vst.msk [vmem:[#allocation2 + $0xe0] sm:$0xff] %vm1603_vm7, %v1564_v23 }
 0x258   : > { %v1534_v52 = vpop.permute.xlu1 %1533  ;;  %v1532_v53 = vpop.permute.xlu0 %1531 }
 0x259   : > { %1617 = vst.msk [vmem:[#allocation2 + $0x68] sm:$0xff] %vm1603_vm7, %v1534_v52  ;;  %1616 = vst.msk [vmem:[#allocation2 + $0x60] sm:$0xff] %vm1603_vm7, %v1532_v53 }
 0x25c   : > { %v1759_v36 = vpop.permute.xlu1 %1758  ;;  %v1757_v37 = vpop.permute.xlu0 %1756 }
 0x25d   : > { %1826 = vst.msk [vmem:[#allocation2 + $0xe8] sm:$0xff] %vm1796_vm8, %v1759_v36  ;;  %1825 = vst.msk [vmem:[#allocation2 + $0xe0] sm:$0xff] %vm1796_vm8, %v1757_v37 }
 0x260   : > { %v1727_v40 = vpop.permute.xlu1 %1726  ;;  %v1725_v41 = vpop.permute.xlu0 %1724 }
 0x261   : > { %1810 = vst.msk [vmem:[#allocation2 + $0x68] sm:$0xff] %vm1796_vm8, %v1727_v40  ;;  %1809 = vst.msk [vmem:[#allocation2 + $0x60] sm:$0xff] %vm1796_vm8, %v1725_v41 }
 0x264   : > { %v795_v50 = vpop.permute.xlu1 %794  ;;  %v793_v48 = vpop.permute.xlu0 %792  ;;  %v1858_v49 = vld [vmem:[#allocation2 + $0xe0] sm:$0xff]  ;;  %v1859_v51 = vld [vmem:[#allocation2 + $0xe8] sm:$0xff] }
 0x265   : > { %860 = vst.msk [vmem:[#allocation2 + $0xf8] sm:$0xff] %vm828_vm3, %v795_v50  ;;  %859 = vst.msk [vmem:[#allocation2 + $0xf0] sm:$0xff] %vm828_vm3, %v793_v48  ;;  %v2460_v58 = vpack.c.bf16 %v1859_v51, %v1858_v49 }
 0x267   : > { %2462 = vmatprep.subr.msk.bf16.mxu0 %vm3420_vm10, %v2460_v58 }
 0x268   : > { %v988_v59 = vpop.permute.xlu1 %987  ;;  %v986_v20 = vpop.permute.xlu0 %985  ;;  %v1842_v22 = vld [vmem:[#allocation2 + $0x60] sm:$0xff]  ;;  %v1843_v15 = vld [vmem:[#allocation2 + $0x68] sm:$0xff] }
 0x269   : > { %1053 = vst.msk [vmem:[#allocation2 + $0xf8] sm:$0xff] %vm1021_vm4, %v988_v59  ;;  %1052 = vst.msk [vmem:[#allocation2 + $0xf0] sm:$0xff] %vm1021_vm4, %v986_v20  ;;  %v2463_v14 = vpack.c.bf16 %v1843_v15, %v1842_v22 }
 0x26b   : > { %2465 = vmatpush3.bf16.xpose.msk.msra.mxu0 %vm3420_vm10, %v2463_v14 }
 0x26c   : > { %v956_v34 = vpop.permute.xlu1 %955  ;;  %v954_v35 = vpop.permute.xlu0 %953 }
 0x26d   : > { %1037 = vst.msk [vmem:[#allocation2 + $0x78] sm:$0xff] %vm1021_vm4, %v956_v34  ;;  %1036 = vst.msk [vmem:[#allocation2 + $0x70] sm:$0xff] %vm1021_vm4, %v954_v35 }
 0x270   : > { %v1181_v6 = vpop.permute.xlu1 %1180  ;;  %v1179_v3 = vpop.permute.xlu0 %1178 }
 0x271   : > { %1246 = vst.msk [vmem:[#allocation2 + $0xf8] sm:$0xff] %vm1214_vm5, %v1181_v6  ;;  %1245 = vst.msk [vmem:[#allocation2 + $0xf0] sm:$0xff] %vm1214_vm5, %v1179_v3 }
 0x274   : > { %v1149_v63 = vpop.permute.xlu1 %1148  ;;  %v1147_v16 = vpop.permute.xlu0 %1146 }
 0x275   : > { %1230 = vst.msk [vmem:[#allocation2 + $0x78] sm:$0xff] %vm1214_vm5, %v1149_v63  ;;  %1229 = vst.msk [vmem:[#allocation2 + $0x70] sm:$0xff] %vm1214_vm5, %v1147_v16 }
 0x278   : > { %v1377_v17 = vpop.permute.xlu1 %1376  ;;  %v1375_v38 = vpop.permute.xlu0 %1374 }
 0x279   : > { %1442 = vst.msk [vmem:[#allocation2 + $0xf8] sm:$0xff] %vm1410_vm6, %v1377_v17  ;;  %1441 = vst.msk [vmem:[#allocation2 + $0xf0] sm:$0xff] %vm1410_vm6, %v1375_v38 }
 0x27c   : > { %v1345_v39 = vpop.permute.xlu1 %1344  ;;  %v1343_v32 = vpop.permute.xlu0 %1342 }
 0x27d   : > { %1426 = vst.msk [vmem:[#allocation2 + $0x78] sm:$0xff] %vm1410_vm6, %v1345_v39  ;;  %1425 = vst.msk [vmem:[#allocation2 + $0x70] sm:$0xff] %vm1410_vm6, %v1343_v32 }
 0x280   : > { %v1570_v46 = vpop.permute.xlu1 %1569  ;;  %v1568_v47 = vpop.permute.xlu0 %1567 }
 0x281   : > { %1635 = vst.msk [vmem:[#allocation2 + $0xf8] sm:$0xff] %vm1603_vm7, %v1570_v46  ;;  %1634 = vst.msk [vmem:[#allocation2 + $0xf0] sm:$0xff] %vm1603_vm7, %v1568_v47 }
 0x284   : > { %v1538_v10 = vpop.permute.xlu1 %1537  ;;  %v1536_v11 = vpop.permute.xlu0 %1535 }
 0x285   : > { %1619 = vst.msk [vmem:[#allocation2 + $0x78] sm:$0xff] %vm1603_vm7, %v1538_v10  ;;  %1618 = vst.msk [vmem:[#allocation2 + $0x70] sm:$0xff] %vm1603_vm7, %v1536_v11 }
 0x288   : > { %v1763_v4 = vpop.permute.xlu1 %1762  ;;  %v1761_v5 = vpop.permute.xlu0 %1760 }
 0x289   : > { %1828 = vst.msk [vmem:[#allocation2 + $0xf8] sm:$0xff] %vm1796_vm8, %v1763_v4  ;;  %1827 = vst.msk [vmem:[#allocation2 + $0xf0] sm:$0xff] %vm1796_vm8, %v1761_v5 }
 0x28c   : > { %v1731_v56 = vpop.permute.xlu1 %1730  ;;  %v1729_v7 = vpop.permute.xlu0 %1728 }
 0x28d   : > { %1812 = vst.msk [vmem:[#allocation2 + $0x78] sm:$0xff] %vm1796_vm8, %v1731_v56  ;;  %1811 = vst.msk [vmem:[#allocation2 + $0x70] sm:$0xff] %vm1796_vm8, %v1729_v7 }
 0x290   : > { %v1860_v30 = vld [vmem:[#allocation2 + $0xf0] sm:$0xff]  ;;  %v1861_v57 = vld [vmem:[#allocation2 + $0xf8] sm:$0xff] }
 0x291   : > { %v2466_v0 = vpack.c.bf16 %v1861_v57, %v1860_v30 }
 0x293   : > { %2468 = vmatprep.subr.msk.bf16.mxu0 %vm3420_vm10, %v2466_v0 }
 0x294   : > { %v1844_v33 = vld [vmem:[#allocation2 + $0x70] sm:$0xff]  ;;  %v1845_v54 = vld [vmem:[#allocation2 + $0x78] sm:$0xff] }
 0x295   : > { %v2469_v42 = vpack.c.bf16 %v1845_v54, %v1844_v33 }
 0x297   : > { %2471 = vmatpush3.bf16.xpose.msk.msra.mxu0 %vm3420_vm10, %v2469_v42 }
 0x29d   : > { %v2037_v62 = vpop.permute.xlu0 %2036  ;;  %v2045_v43 = vpop.permute.xlu1 %2044 }
 0x29e   : > { %2423 = vmatmul.mubr.msk.f32.vlgmr.msra.gmra.mrb[0].mxu0 %vm1862_vm9, %v3803_v29 }
 0x371   : > { %v2028_v44 = vpop.f32.mrb[0].mxu0 }
 0x372   : > { %v2039_v55 = vmul.f32 %v2037_v62, %v2028_v44  ;;  %v2030_v12 = vpop.f32.mrb[1].mxu0 }
 0x373   : > { %v2040_v13 = vmul.f32 %v2037_v62, %v2030_v12 }
 0x374   : > { %v2047_v1 = vadd.f32 %v2045_v43, %v2039_v55 }
 0x375   : > { %v2048_v18 = vadd.f32 %v2045_v43, %v2040_v13 }
 0x376   : > { %v2049_v2 = vmax.f32 %v2047_v1, 0.0 }
 0x377   : > { %v2050_v26 = vmax.f32 %v2048_v18, 0.0 }
 0x378   : > { %2051 = vst [vmem:[%s204_s9] sm:$0xff] %v2049_v2 }
 0x379   : > { %2052 = vst [vmem:[%s204_s9 + $0x8] sm:$0xff] %v2050_v26 }
 0x37a   : > { %2552 = shalt.err (!%p2549_p5)
}
 0x37b   : > { %s2553_s26 = scalar_lea.hbm %s3894_s13, 256  ;;  %s2557_s5 = scalar_lea.hbm %s3945_s4, 512 }
 0x37c   : > { %p2554_p6 = scmp.ne.s32.totalorder %s3894_s13, %s2553_s26  ;;  %p2558_p10 = scmp.lt.u32.totalorder %s3894_s13, %s3945_s4 }
 0x37d   : > { %p2559_p11 = scmp.lt.u32.totalorder %s2557_s5, %s2553_s26  ;;  %p2561_p13 = scmp.lt.u32.totalorder %s2553_s26, %s3894_s13 }
 0x37e   : > { %p2555_p7 = pnand %p2554_p6, %p2694_p4 }
 0x37f   : > { %p2560_p12 = por %p2559_p11, %p2558_p10 }
 0x380   : > { %p2556_p9 = pneg %p2555_p7 }
 0x381   : > { %p2562_p0 = por %p2561_p13, %p2560_p12 }
 0x383   : > { %p2563_p1 = pnand %p2562_p0, %p2556_p9 }
 0x385   : > { %2566 = shalt.err (!%p2563_p1)
}
 0x386   : > { %2473 = dma.vmem_to_hbm [thread:$0]  (%p2694_p4), %s3896_s10, 256, %s3894_s13, %s2054_s14  }
 0x387 PF: > { %p2479_p2 = scmp.ge.s32.totalorder %s2617_s20, 2  ;;  %s2082_s8 = sand.u32 1, %s2597_s15  }
 0x388   : > { %s2083_s9 = scalar_lea.sflag [#allocation4], %s2082_s8 }
 0x389   : > { %p2476_p3 = pnand %p2479_p2, %p2701_p8 }
 0x38b   : > { %2592 = dma.done.wait (!%p2476_p3), %s2083_s9, 256  }
 0x38c   : > { %2594 = vsyncadd (!%p2476_p3), %s2083_s9, 4294967040  ;;  %s17_s20 = sadd.s32 1, %s2617_s20   ;;  %s3984_s15 = smov %s2601_s16 }
 0x38d   : > { %p14_p5 = scmp.ge.s32.totalorder %s17_s20, 4   ;;  %s3985_s16 = smov %s2605_s17 }
 0x38e   : > { %s3986_s17 = smov %s2707_s28  ;;  %s3987_s18 = smov %s2613_s19 }
 0x38f   : > { %s3988_s19 = smov %s3990_s23  ;;  %16 = sbr.rel (!%p14_p5) target bundleno = 4 (0x4), region = 74 }
 0x396   :  { %2088 = vsyncpa [#allocation4], 1 }
 0x397   :  { %2090 = vsyncpa [#allocation4 + $0x1], 1 }

// kernel: tpu_custom_call.1
= control target key start
LH: loop header
LB: loop body
LE: loop exit
PB: predicated region body
PF: predicated region fallthrough
CT: control target
= control target key end

     0   :  { %9 = vsyncpa [#allocation4], 0  ;;  %s3939_s0 = inlined_call_operand.vmem [shape: f32[2,20,20,4], index: 0, kind: input, shape index: {}]   ;;  %s3940_s1 = inlined_call_operand.vmem [shape: f32[8,36], index: 1, kind: input, shape index: {}]   ;;  %s3941_s2 = inlined_call_operand.vmem [shape: f32[8,1], index: 2, kind: input, shape index: {}]   ;;  %s3942_s3 = inlined_call_operand.vmem [shape: f32[8,1], index: 3, kind: input, shape index: {}]   ;;  %s3943_s4 = inlined_call_operand.hbm [shape: f32[2,8,256], index: 4, kind: output, shape index: {}]  }
   0x1   :  { %11 = vsyncpa [#allocation4 + $0x1], 0  ;;  %s2652_s15 = smov 0   ;;  %s2654_s16 = smov 0  }
   0x2   :  { %s2656_s17 = smov 0   ;;  %s2658_s18 = smov 0  }
   0x3   :  { %s2660_s19 = smov 0   ;;  %s2662_s20 = smov 0  }
   0x4 LB: > { %s2150_s21 = sadd.s32 4294967295, %s2615_s20   ;;  %s2151_s22 = sadd.s32 4294967294, %s2615_s20   ;;  %s2615_s20 = sphi %s2662_s20, %s17_s20   ;;  %s2611_s19 = sphi %s2660_s19, %s3986_s19   ;;  %s2607_s18 = sphi %s2658_s18, %s3985_s18   ;;  %s2603_s17 = sphi %s2656_s17, %s3984_s17   ;;  %s2599_s16 = sphi %s2654_s16, %s3983_s16   ;;  %s2595_s15 = sphi %s2652_s15, %s3982_s15  }
   0x5   : > { %s29_s23 = sadd.s32 1, %s2611_s19  ;;  %s127_s24 = sadd.s32 1, %s2603_s17 }
   0x6   : > { %p31_p0 = scmp.ge.s32.totalorder %s29_s23, 2  ;;  %p137_p1 = scmp.ne.s32.totalorder %s2603_s17, %s2599_s16 }
   0x7   : > { %p138_p2 = scmp.eq.s32.totalorder %s2150_s21, 1  ;;  %p143_p3 = scmp.ne.s32.totalorder %s2599_s16, %s2595_s15 }
   0x8   : > { %s3988_s23 = smov (%p31_p0, %s29_s23), 0  ;;  %p144_p5 = scmp.eq.s32.totalorder %s2151_s22, 1 }
   0x9   : > { %p2692_p4 = por %p138_p2, %p137_p1  ;;  %s122_s26 = ssub.s32 %s2611_s19, %s3988_s23 }
   0xa   : > { %p2154_p6 = scmp.ge.s32.totalorder %s2615_s20, 1  ;;  %p125_p7 = scmp.eq.s32.totalorder %s122_s26, 0 }
   0xb   : > { %p2699_p8 = por %p144_p5, %p143_p3  ;;  %p179_p9 = scmp.lt.s32.totalorder %s2615_s20, 3 }
   0xc   : > { %s2705_s28 = scalar_select %p125_p7, %s2603_s17, %s127_s24  }
   0xd   : > { %p180_p10 = pnand %p2154_p6, %p179_p9 }
   0xf   : > { %183 = sbr.rel (%p180_p10) target bundleno = 903 (0x387), region = 36 }
  0x16   : > { %p205_p11 = scmp.lt.s32.totalorder %s2607_s18, 1  ;;  %s2617_s8 = smov 4   ;;  %vm246_vm0 = vcmask 31744   ;;  %vm439_vm1 = vcmask 64544   ;;  %vm632_vm2 = vcmask 97344   ;;  %vm828_vm3 = vcmask 130144  }
  0x17   : > { %s2618_s9 = smov 8   ;;  %s2619_s10 = smov 12   ;;  %vm1021_vm4 = vcmask 162944   ;;  %vm1214_vm5 = vcmask 195744   ;;  %vm1410_vm6 = vcmask 228544   ;;  %vm1603_vm7 = vcmask 261344  }
  0x18   : > { %s206_s29 = scalar_select %p205_p11, %s2607_s18, 1  ;;  %vm1796_vm8 = vcmask 294144   ;;  %vm1862_vm9 = vcmask 293888  }
  0x19   : > { %s2620_s11 = smov 16   ;;  %s2621_s12 = smov 20   ;;  %vm3418_vm10 = vmpackc.low %vm1862_vm9, %vm1862_vm9 }
  0x1a   : > { %s2470_s30 = smul.u32 480, %s206_s29  ;;  %s2622_s13 = smov 24  }
  0x1b   : > { %s2623_s14 = smov 28   ;;  %s2624_s21 = smov 32  }
  0x1c   : > { %s2712_s7 = scalar_lea.vmem %s3939_s0, %s2470_s30  ;;  %s202_s6 = sand.u32 1, %s2599_s16  }
  0x1d   : > { %v281_v0 = vld [vmem:[%s2712_s7 + $0x1a] sm:$0xff]  ;;  %v279_v1 = vld [vmem:[%s2712_s7 + $0x2] sm:$0xff]  ;;  %v280_v3 = vld [vmem:[%s2712_s7 + $0xa] sm:$0xff] }
  0x1e   : > { %347 = vrot.lane.b32.xlu1 %v281_v0, %s2617_s8  ;;  %343 = vrot.lane.b32.xlu0 %v279_v1, %s2617_s8  ;;  %v282_v2 = vld [vmem:[%s2712_s7 + $0x22] sm:$0xff]  ;;  %v2723_v4 = vld [vmem:[%s2712_s7 + $0x3a] sm:$0xff] }
  0x1f   : > { %v2726_v5 = vld [vmem:[%s2712_s7 + $0x32] sm:$0xff]  ;;  %v2736_v7 = vld [vmem:[%s2712_s7 + $0x4a] sm:$0xff]  ;;  %v2746_v9 = vld [vmem:[%s2712_s7 + $0x62] sm:$0xff] }
  0x20   : > { %v2733_v6 = vld [vmem:[%s2712_s7 + $0x52] sm:$0xff]  ;;  %v2743_v8 = vld [vmem:[%s2712_s7 + $0x6a] sm:$0xff]  ;;  %v2753_v10 = vld [vmem:[%s2712_s7 + $0x82] sm:$0xff] }
  0x21   : > { %v2756_v11 = vld [vmem:[%s2712_s7 + $0x7a] sm:$0xff]  ;;  %v2768_v15 = vld [vmem:[%s2712_s7 + $0x92] sm:$0xff]  ;;  %v215_v17 = vld [vmem:[%s2712_s7 + $0x8] sm:$0xff] }
  0x22   : > { %349 = vrot.lane.b32.xlu1 %v282_v2, %s2617_s8  ;;  %345 = vrot.lane.b32.xlu0 %v280_v3, %s2617_s8  ;;  %v216_v12 = vld [vmem:[%s2712_s7 + $0x18] sm:$0xff]  ;;  %v214_v13 = vld [vmem:[%s2712_s7] sm:$0xff]  ;;  %3961 = vst [vmem:[#allocation7_spill] sm:$0xff] %v2768_v15  ;;  %248 = vst.msk [vmem:[#allocation2 + $0x8] sm:$0xff] %vm246_vm0, %v215_v17 }
  0x23   : > { %v2765_v14 = vld [vmem:[%s2712_s7 + $0x9a] sm:$0xff]  ;;  %249 = vst.msk [vmem:[#allocation2 + $0x10] sm:$0xff] %vm246_vm0, %v216_v12  ;;  %247 = vst.msk [vmem:[#allocation2] sm:$0xff] %vm246_vm0, %v214_v13  ;;  %v294_v18 = vld [vmem:[%s2712_s7 + $0xb2] sm:$0xff] }
  0x24   : > { %3960 = vst [vmem:[#allocation6_spill] sm:$0xff] %v2765_v14  ;;  %v217_v16 = vld [vmem:[%s2712_s7 + $0x20] sm:$0xff]  ;;  %v2778_v19 = vld [vmem:[%s2712_s7 + $0x38] sm:$0xff]  ;;  %v2781_v20 = vld [vmem:[%s2712_s7 + $0x30] sm:$0xff] }
  0x25   : > { %250 = vst.msk [vmem:[#allocation2 + $0x18] sm:$0xff] %vm246_vm0, %v217_v16  ;;  %v293_v21 = vld [vmem:[%s2712_s7 + $0xaa] sm:$0xff]  ;;  %252 = vst.msk [vmem:[#allocation2 + $0x28] sm:$0xff] %vm246_vm0, %v2778_v19  ;;  %v2804_v25 = vld [vmem:[%s2712_s7 + $0x60] sm:$0xff] }
  0x26   : > { %353 = vrot.lane.b32.xlu1 %v2723_v4, %s2617_s8  ;;  %351 = vrot.lane.b32.xlu0 %v2726_v5, %s2617_s8  ;;  %251 = vst.msk [vmem:[#allocation2 + $0x20] sm:$0xff] %vm246_vm0, %v2781_v20  ;;  %v2793_v22 = vld [vmem:[%s2712_s7 + $0x50] sm:$0xff]  ;;  %v2798_v23 = vld [vmem:[%s2712_s7 + $0x48] sm:$0xff]  ;;  %255 = vst.msk [vmem:[#allocation2 + $0x40] sm:$0xff] %vm246_vm0, %v2804_v25 }
  0x27   : > { %254 = vst.msk [vmem:[#allocation2 + $0x38] sm:$0xff] %vm246_vm0, %v2793_v22  ;;  %v2801_v24 = vld [vmem:[%s2712_s7 + $0x68] sm:$0xff]  ;;  %253 = vst.msk [vmem:[#allocation2 + $0x30] sm:$0xff] %vm246_vm0, %v2798_v23  ;;  %v2813_v26 = vld [vmem:[%s2712_s7 + $0x80] sm:$0xff] }
  0x28   : > { %256 = vst.msk [vmem:[#allocation2 + $0x48] sm:$0xff] %vm246_vm0, %v2801_v24  ;;  %v2816_v27 = vld [vmem:[%s2712_s7 + $0x78] sm:$0xff]  ;;  %v296_v29 = vld [vmem:[%s2712_s7 + $0xca] sm:$0xff]  ;;  %v295_v30 = vld [vmem:[%s2712_s7 + $0xc2] sm:$0xff] }
  0x29   : > { %v2819_v28 = vld [vmem:[%s2712_s7 + $0x98] sm:$0xff]  ;;  %258 = vst.msk [vmem:[#allocation2 + $0x58] sm:$0xff] %vm246_vm0, %v2813_v26  ;;  %257 = vst.msk [vmem:[#allocation2 + $0x50] sm:$0xff] %vm246_vm0, %v2816_v27  ;;  %v2830_v31 = vld [vmem:[%s2712_s7 + $0x90] sm:$0xff] }
  0x2a   : > { %357 = vrot.lane.b32.xlu1 %v2733_v6, %s2617_s8  ;;  %355 = vrot.lane.b32.xlu0 %v2736_v7, %s2617_s8  ;;  %260 = vst.msk [vmem:[#allocation2 + $0x68] sm:$0xff] %vm246_vm0, %v2819_v28  ;;  %v2833_v32 = vld [vmem:[%s2712_s7 + $0xb0] sm:$0xff]  ;;  %v2836_v33 = vld [vmem:[%s2712_s7 + $0xa8] sm:$0xff]  ;;  %259 = vst.msk [vmem:[#allocation2 + $0x60] sm:$0xff] %vm246_vm0, %v2830_v31 }
  0x2b   : > { %262 = vst.msk [vmem:[#allocation2 + $0x78] sm:$0xff] %vm246_vm0, %v2833_v32  ;;  %261 = vst.msk [vmem:[#allocation2 + $0x70] sm:$0xff] %vm246_vm0, %v2836_v33  ;;  %v2847_v34 = vld [vmem:[%s2712_s7 + $0xc8] sm:$0xff]  ;;  %v2850_v35 = vld [vmem:[%s2712_s7 + $0xc0] sm:$0xff] }
  0x2c   : > { %264 = vst.msk [vmem:[#allocation2 + $0x88] sm:$0xff] %vm246_vm0, %v2847_v34  ;;  %263 = vst.msk [vmem:[#allocation2 + $0x80] sm:$0xff] %vm246_vm0, %v2850_v35  ;;  %v2857_v36 = vld [vmem:[%s2712_s7 + $0xe0] sm:$0xff]  ;;  %v2860_v37 = vld [vmem:[%s2712_s7 + $0xd8] sm:$0xff] }
  0x2d   : > { %v2863_v38 = vld [vmem:[%s2712_s7 + $0xf8] sm:$0xff]  ;;  %266 = vst.msk [vmem:[#allocation2 + $0x98] sm:$0xff] %vm246_vm0, %v2857_v36  ;;  %265 = vst.msk [vmem:[#allocation2 + $0x90] sm:$0xff] %vm246_vm0, %v2860_v37  ;;  %v2872_v39 = vld [vmem:[%s2712_s7 + $0xf0] sm:$0xff] }
  0x2e   : > { %361 = vrot.lane.b32.xlu1 %v2743_v8, %s2617_s8  ;;  %359 = vrot.lane.b32.xlu0 %v2746_v9, %s2617_s8  ;;  %268 = vst.msk [vmem:[#allocation2 + $0xa8] sm:$0xff] %vm246_vm0, %v2863_v38  ;;  %v2875_v40 = vld [vmem:[%s2712_s7 + $0x110] sm:$0xff]  ;;  %v2878_v41 = vld [vmem:[%s2712_s7 + $0x108] sm:$0xff]  ;;  %267 = vst.msk [vmem:[#allocation2 + $0xa0] sm:$0xff] %vm246_vm0, %v2872_v39 }
  0x2f   : > { %270 = vst.msk [vmem:[#allocation2 + $0xb8] sm:$0xff] %vm246_vm0, %v2875_v40  ;;  %269 = vst.msk [vmem:[#allocation2 + $0xb0] sm:$0xff] %vm246_vm0, %v2878_v41  ;;  %v298_v42 = vld [vmem:[%s2712_s7 + $0xe2] sm:$0xff]  ;;  %v297_v43 = vld [vmem:[%s2712_s7 + $0xda] sm:$0xff] }
  0x30   : > { %v2891_v44 = vld [vmem:[%s2712_s7 + $0x128] sm:$0xff]  ;;  %v2894_v45 = vld [vmem:[%s2712_s7 + $0x120] sm:$0xff]  ;;  %v2906_v47 = vld [vmem:[%s2712_s7 + $0xf2] sm:$0xff] }
  0x31   : > { %272 = vst.msk [vmem:[#allocation2 + $0xc8] sm:$0xff] %vm246_vm0, %v2891_v44  ;;  %271 = vst.msk [vmem:[#allocation2 + $0xc0] sm:$0xff] %vm246_vm0, %v2894_v45  ;;  %v2903_v46 = vld [vmem:[%s2712_s7 + $0xfa] sm:$0xff]  ;;  %v2923_v50 = vld [vmem:[%s2712_s7 + $0x112] sm:$0xff] }
  0x32   : > { %365 = vrot.lane.b32.xlu1 %v2753_v10, %s2617_s8  ;;  %363 = vrot.lane.b32.xlu0 %v2756_v11, %s2617_s8  ;;  %v2909_v48 = vld [vmem:[%s2712_s7 + $0x140] sm:$0xff]  ;;  %v2912_v49 = vld [vmem:[%s2712_s7 + $0x138] sm:$0xff] }
  0x33   : > { %274 = vst.msk [vmem:[#allocation2 + $0xd8] sm:$0xff] %vm246_vm0, %v2909_v48  ;;  %273 = vst.msk [vmem:[#allocation2 + $0xd0] sm:$0xff] %vm246_vm0, %v2912_v49  ;;  %v2926_v51 = vld [vmem:[%s2712_s7 + $0x10a] sm:$0xff]  ;;  %v2929_v52 = vld [vmem:[%s2712_s7 + $0x158] sm:$0xff] }
  0x34   : > { %3962 = vst [vmem:[#allocation8_spill] sm:$0xff] %v2929_v52  ;;  %v2932_v53 = vld [vmem:[%s2712_s7 + $0x150] sm:$0xff]  ;;  %276 = vst.msk [vmem:[#allocation2 + $0xe8] sm:$0xff] %vm246_vm0, %v2929_v52  ;;  %v2946_v55 = vld [vmem:[%s2712_s7 + $0x122] sm:$0xff] }
  0x35   : > { %3963 = vst [vmem:[#allocation9_spill] sm:$0xff] %v2932_v53  ;;  %275 = vst.msk [vmem:[#allocation2 + $0xe0] sm:$0xff] %vm246_vm0, %v2932_v53  ;;  %v2943_v54 = vld [vmem:[%s2712_s7 + $0x12a] sm:$0xff]  ;;  %v2963_v58 = vld [vmem:[%s2712_s7 + $0x142] sm:$0xff] }
  0x36   : > { %369 = vrot.lane.b32.xlu1 %v2765_v14, %s2617_s8  ;;  %367 = vrot.lane.b32.xlu0 %v2768_v15, %s2617_s8  ;;  %v2949_v56 = vld [vmem:[%s2712_s7 + $0x170] sm:$0xff]  ;;  %v2952_v57 = vld [vmem:[%s2712_s7 + $0x168] sm:$0xff] }
  0x37   : > { %3964 = vst [vmem:[#allocation10_spill] sm:$0xff] %v2949_v56  ;;  %3965 = vst [vmem:[#allocation11_spill] sm:$0xff] %v2952_v57  ;;  %v2966_v59 = vld [vmem:[%s2712_s7 + $0x13a] sm:$0xff]  ;;  %v2976_v61 = vld [vmem:[%s2712_s7 + $0x152] sm:$0xff] }
  0x38   : > { %278 = vst.msk [vmem:[#allocation2 + $0xf8] sm:$0xff] %vm246_vm0, %v2949_v56  ;;  %277 = vst.msk [vmem:[#allocation2 + $0xf0] sm:$0xff] %vm246_vm0, %v2952_v57  ;;  %v2973_v60 = vld [vmem:[%s2712_s7 + $0x15a] sm:$0xff]  ;;  %v310_v62 = vld [vmem:[%s2712_s7 + $0x172] sm:$0xff] }
  0x39   : > { %3966 = vst [vmem:[#allocation12_spill] sm:$0xff] %v2973_v60  ;;  %3967 = vst [vmem:[#allocation13_spill] sm:$0xff] %v2976_v61  ;;  %v309_v63 = vld [vmem:[%s2712_s7 + $0x16a] sm:$0xff]  ;;  %v474_v3 = vld [vmem:[%s2712_s7 + $0x1c] sm:$0xff] }
  0x3a   : > { %373 = vrot.lane.b32.xlu1 %v294_v18, %s2617_s8  ;;  %371 = vrot.lane.b32.xlu0 %v293_v21, %s2617_s8  ;;  %v473_v0 = vld [vmem:[%s2712_s7 + $0xc] sm:$0xff]  ;;  %v472_v1 = vld [vmem:[%s2712_s7 + $0x4] sm:$0xff] }
  0x3b   : > { %v475_v2 = vld [vmem:[%s2712_s7 + $0x24] sm:$0xff]  ;;  %v2995_v12 = vld [vmem:[%s2712_s7 + $0x3c] sm:$0xff]  ;;  %v2998_v13 = vld [vmem:[%s2712_s7 + $0x34] sm:$0xff] }
  0x3c   : > { %v3005_v16 = vld [vmem:[%s2712_s7 + $0x54] sm:$0xff]  ;;  %v3008_v17 = vld [vmem:[%s2712_s7 + $0x4c] sm:$0xff]  ;;  %v3018_v21 = vld [vmem:[%s2712_s7 + $0x64] sm:$0xff] }
  0x3d   : > { %v3015_v18 = vld [vmem:[%s2712_s7 + $0x6c] sm:$0xff]  ;;  %v3057_v57 = vld [vmem:[%s2712_s7 + $0xfc] sm:$0xff]  ;;  %v3102_v14 = vld [vmem:[%s2712_s7 + $0x154] sm:$0xff] }
  0x3e   : > { %377 = vrot.lane.b32.xlu1 %v296_v29, %s2617_s8  ;;  %375 = vrot.lane.b32.xlu0 %v295_v30, %s2617_s8  ;;  %v3025_v29 = vld [vmem:[%s2712_s7 + $0x84] sm:$0xff]  ;;  %v3028_v30 = vld [vmem:[%s2712_s7 + $0x7c] sm:$0xff] }
  0x3f   : > { %v3090_v56 = vld [vmem:[%s2712_s7 + $0x13c] sm:$0xff] }
  0x40   : > { %v3099_v15 = vld [vmem:[%s2712_s7 + $0x15c] sm:$0xff] }
  0x42   : > { %381 = vrot.lane.b32.xlu1 %v298_v42, %s2617_s8  ;;  %379 = vrot.lane.b32.xlu0 %v297_v43, %s2617_s8  ;;  %v3035_v42 = vld [vmem:[%s2712_s7 + $0x9c] sm:$0xff]  ;;  %v3038_v43 = vld [vmem:[%s2712_s7 + $0x94] sm:$0xff] }
  0x43   : > { %3968 = vst [vmem:[#allocation14_spill] sm:$0xff] %v3035_v42  ;;  %3969 = vst [vmem:[#allocation15_spill] sm:$0xff] %v3038_v43 }
  0x46   : > { %385 = vrot.lane.b32.xlu1 %v2903_v46, %s2617_s8  ;;  %383 = vrot.lane.b32.xlu0 %v2906_v47, %s2617_s8 }
  0x4a   : > { %389 = vrot.lane.b32.xlu1 %v2923_v50, %s2617_s8  ;;  %387 = vrot.lane.b32.xlu0 %v2926_v51, %s2617_s8 }
  0x4e   : > { %393 = vrot.lane.b32.xlu1 %v2943_v54, %s2617_s8  ;;  %391 = vrot.lane.b32.xlu0 %v2946_v55, %s2617_s8 }
  0x52   : > { %397 = vrot.lane.b32.xlu1 %v2963_v58, %s2617_s8  ;;  %395 = vrot.lane.b32.xlu0 %v2966_v59, %s2617_s8 }
  0x56   : > { %401 = vrot.lane.b32.xlu1 %v2973_v60, %s2617_s8  ;;  %399 = vrot.lane.b32.xlu0 %v2976_v61, %s2617_s8 }
  0x5a   : > { %405 = vrot.lane.b32.xlu1 %v310_v62, %s2617_s8  ;;  %403 = vrot.lane.b32.xlu0 %v309_v63, %s2617_s8  ;;  %v487_v62 = vld [vmem:[%s2712_s7 + $0xb4] sm:$0xff]  ;;  %v486_v63 = vld [vmem:[%s2712_s7 + $0xac] sm:$0xff]  ;;  %s2387_s8 = sshll.u32 %s2607_s18, 8  ;;  %s2626_s18 = smov [#allocation3]  }
  0x5b   : > { %s2541_s22 = sshll.u32 %s2626_s18, 4  ;;  %s2542_s22 = int_to_ptr.vmem [resolvable:$false] %s2541_s22 }
  0x5c   : > { %s2543_s24 = scalar_lea.vmem %s2542_s22, 512 }
  0x5e   : > { %538 = vrot.lane.b32.xlu1 %v473_v0, %s2618_s9  ;;  %536 = vrot.lane.b32.xlu0 %v472_v1, %s2618_s9  ;;  %v489_v0 = vld [vmem:[%s2712_s7 + $0xcc] sm:$0xff]  ;;  %v488_v1 = vld [vmem:[%s2712_s7 + $0xc4] sm:$0xff] }
  0x62   : > { %542 = vrot.lane.b32.xlu1 %v475_v2, %s2618_s9  ;;  %540 = vrot.lane.b32.xlu0 %v474_v3, %s2618_s9  ;;  %v491_v2 = vld [vmem:[%s2712_s7 + $0xe4] sm:$0xff]  ;;  %v490_v3 = vld [vmem:[%s2712_s7 + $0xdc] sm:$0xff] }
  0x66   : > { %546 = vrot.lane.b32.xlu1 %v2995_v12, %s2618_s9  ;;  %544 = vrot.lane.b32.xlu0 %v2998_v13, %s2618_s9 }
  0x6a   : > { %550 = vrot.lane.b32.xlu1 %v3005_v16, %s2618_s9  ;;  %548 = vrot.lane.b32.xlu0 %v3008_v17, %s2618_s9 }
  0x6e   : > { %554 = vrot.lane.b32.xlu1 %v3015_v18, %s2618_s9  ;;  %552 = vrot.lane.b32.xlu0 %v3018_v21, %s2618_s9 }
  0x72   : > { %558 = vrot.lane.b32.xlu1 %v3025_v29, %s2618_s9  ;;  %556 = vrot.lane.b32.xlu0 %v3028_v30, %s2618_s9 }
  0x76   : > { %562 = vrot.lane.b32.xlu1 %v3035_v42, %s2618_s9  ;;  %560 = vrot.lane.b32.xlu0 %v3038_v43, %s2618_s9 }
  0x7a   : > { %566 = vrot.lane.b32.xlu1 %v487_v62, %s2618_s9  ;;  %564 = vrot.lane.b32.xlu0 %v486_v63, %s2618_s9  ;;  %v3060_v62 = vld [vmem:[%s2712_s7 + $0xf4] sm:$0xff] }
  0x7b   : > { %v3067_v63 = vld [vmem:[%s2712_s7 + $0x114] sm:$0xff] }
  0x7e   : > { %570 = vrot.lane.b32.xlu1 %v489_v0, %s2618_s9  ;;  %568 = vrot.lane.b32.xlu0 %v488_v1, %s2618_s9  ;;  %v3070_v0 = vld [vmem:[%s2712_s7 + $0x10c] sm:$0xff] }
  0x7f   : > { %v3077_v1 = vld [vmem:[%s2712_s7 + $0x12c] sm:$0xff] }
  0x82   : > { %574 = vrot.lane.b32.xlu1 %v491_v2, %s2618_s9  ;;  %572 = vrot.lane.b32.xlu0 %v490_v3, %s2618_s9  ;;  %v3080_v2 = vld [vmem:[%s2712_s7 + $0x124] sm:$0xff] }
  0x83   : > { %v3087_v3 = vld [vmem:[%s2712_s7 + $0x144] sm:$0xff] }
  0x86   : > { %578 = vrot.lane.b32.xlu1 %v3057_v57, %s2618_s9  ;;  %576 = vrot.lane.b32.xlu0 %v3060_v62, %s2618_s9 }
  0x8a   : > { %582 = vrot.lane.b32.xlu1 %v3067_v63, %s2618_s9  ;;  %580 = vrot.lane.b32.xlu0 %v3070_v0, %s2618_s9 }
  0x8e   : > { %586 = vrot.lane.b32.xlu1 %v3077_v1, %s2618_s9  ;;  %584 = vrot.lane.b32.xlu0 %v3080_v2, %s2618_s9 }
  0x90   : > { %v348_v43 = vpop.permute.xlu1 %347  ;;  %v344_v42 = vpop.permute.xlu0 %343 }
  0x91   : > { %442 = vst.msk [vmem:[#allocation2 + $0x10] sm:$0xff] %vm439_vm1, %v348_v43  ;;  %440 = vst.msk [vmem:[#allocation2] sm:$0xff] %vm439_vm1, %v344_v42  ;;  %v3111_v42 = vld [vmem:[%s2712_s7 + $0x174] sm:$0xff]  ;;  %v3114_v43 = vld [vmem:[%s2712_s7 + $0x16c] sm:$0xff] }
  0x92   : > { %590 = vrot.lane.b32.xlu1 %v3087_v3, %s2618_s9  ;;  %588 = vrot.lane.b32.xlu0 %v3090_v56, %s2618_s9 }
  0x94   : > { %v350_v61 = vpop.permute.xlu1 %349  ;;  %v346_v60 = vpop.permute.xlu0 %345 }
  0x95   : > { %443 = vst.msk [vmem:[#allocation2 + $0x18] sm:$0xff] %vm439_vm1, %v350_v61  ;;  %441 = vst.msk [vmem:[#allocation2 + $0x8] sm:$0xff] %vm439_vm1, %v346_v60 }
  0x96   : > { %594 = vrot.lane.b32.xlu1 %v3099_v15, %s2618_s9  ;;  %592 = vrot.lane.b32.xlu0 %v3102_v14, %s2618_s9 }
  0x98   : > { %v354_v53 = vpop.permute.xlu1 %353  ;;  %v352_v52 = vpop.permute.xlu0 %351 }
  0x99   : > { %445 = vst.msk [vmem:[#allocation2 + $0x28] sm:$0xff] %vm439_vm1, %v354_v53  ;;  %444 = vst.msk [vmem:[#allocation2 + $0x20] sm:$0xff] %vm439_vm1, %v352_v52 }
  0x9a   : > { %598 = vrot.lane.b32.xlu1 %v3111_v42, %s2618_s9  ;;  %596 = vrot.lane.b32.xlu0 %v3114_v43, %s2618_s9 }
  0x9c   : > { %v358_v60 = vpop.permute.xlu1 %357  ;;  %v356_v61 = vpop.permute.xlu0 %355 }
  0x9d   : > { %447 = vst.msk [vmem:[#allocation2 + $0x38] sm:$0xff] %vm439_vm1, %v358_v60  ;;  %446 = vst.msk [vmem:[#allocation2 + $0x30] sm:$0xff] %vm439_vm1, %v356_v61 }
  0x9e   : > { %734 = vrot.lane.b32.xlu1 %v2778_v19, %s2619_s10  ;;  %732 = vrot.lane.b32.xlu0 %v2781_v20, %s2619_s10 }
  0xa0   : > { %v362_v52 = vpop.permute.xlu1 %361  ;;  %v360_v53 = vpop.permute.xlu0 %359 }
  0xa1   : > { %449 = vst.msk [vmem:[#allocation2 + $0x48] sm:$0xff] %vm439_vm1, %v362_v52  ;;  %448 = vst.msk [vmem:[#allocation2 + $0x40] sm:$0xff] %vm439_vm1, %v360_v53 }
  0xa2   : > { %738 = vrot.lane.b32.xlu1 %v2793_v22, %s2619_s10  ;;  %736 = vrot.lane.b32.xlu0 %v2798_v23, %s2619_s10 }
  0xa4   : > { %v366_v60 = vpop.permute.xlu1 %365  ;;  %v364_v61 = vpop.permute.xlu0 %363 }
  0xa5   : > { %451 = vst.msk [vmem:[#allocation2 + $0x58] sm:$0xff] %vm439_vm1, %v366_v60  ;;  %450 = vst.msk [vmem:[#allocation2 + $0x50] sm:$0xff] %vm439_vm1, %v364_v61 }
  0xa6   : > { %742 = vrot.lane.b32.xlu1 %v2801_v24, %s2619_s10  ;;  %740 = vrot.lane.b32.xlu0 %v2804_v25, %s2619_s10 }
  0xa8   : > { %v370_v19 = vpop.permute.xlu1 %369  ;;  %v368_v20 = vpop.permute.xlu0 %367 }
  0xa9   : > { %453 = vst.msk [vmem:[#allocation2 + $0x68] sm:$0xff] %vm439_vm1, %v370_v19  ;;  %452 = vst.msk [vmem:[#allocation2 + $0x60] sm:$0xff] %vm439_vm1, %v368_v20 }
  0xaa   : > { %746 = vrot.lane.b32.xlu1 %v2813_v26, %s2619_s10  ;;  %744 = vrot.lane.b32.xlu0 %v2816_v27, %s2619_s10 }
  0xac   : > { %v374_v22 = vpop.permute.xlu1 %373  ;;  %v372_v23 = vpop.permute.xlu0 %371 }
  0xad   : > { %455 = vst.msk [vmem:[#allocation2 + $0x78] sm:$0xff] %vm439_vm1, %v374_v22  ;;  %454 = vst.msk [vmem:[#allocation2 + $0x70] sm:$0xff] %vm439_vm1, %v372_v23 }
  0xae   : > { %750 = vrot.lane.b32.xlu1 %v2819_v28, %s2619_s10  ;;  %748 = vrot.lane.b32.xlu0 %v2830_v31, %s2619_s10 }
  0xb0   : > { %v378_v52 = vpop.permute.xlu1 %377  ;;  %v376_v53 = vpop.permute.xlu0 %375 }
  0xb1   : > { %457 = vst.msk [vmem:[#allocation2 + $0x88] sm:$0xff] %vm439_vm1, %v378_v52  ;;  %456 = vst.msk [vmem:[#allocation2 + $0x80] sm:$0xff] %vm439_vm1, %v376_v53 }
  0xb2   : > { %754 = vrot.lane.b32.xlu1 %v2833_v32, %s2619_s10  ;;  %752 = vrot.lane.b32.xlu0 %v2836_v33, %s2619_s10 }
  0xb4   : > { %v382_v60 = vpop.permute.xlu1 %381  ;;  %v380_v61 = vpop.permute.xlu0 %379 }
  0xb5   : > { %459 = vst.msk [vmem:[#allocation2 + $0x98] sm:$0xff] %vm439_vm1, %v382_v60  ;;  %458 = vst.msk [vmem:[#allocation2 + $0x90] sm:$0xff] %vm439_vm1, %v380_v61 }
  0xb6   : > { %758 = vrot.lane.b32.xlu1 %v2847_v34, %s2619_s10  ;;  %756 = vrot.lane.b32.xlu0 %v2850_v35, %s2619_s10 }
  0xb8   : > { %v386_v19 = vpop.permute.xlu1 %385  ;;  %v384_v20 = vpop.permute.xlu0 %383 }
  0xb9   : > { %461 = vst.msk [vmem:[#allocation2 + $0xa8] sm:$0xff] %vm439_vm1, %v386_v19  ;;  %460 = vst.msk [vmem:[#allocation2 + $0xa0] sm:$0xff] %vm439_vm1, %v384_v20 }
  0xba   : > { %762 = vrot.lane.b32.xlu1 %v2857_v36, %s2619_s10  ;;  %760 = vrot.lane.b32.xlu0 %v2860_v37, %s2619_s10 }
  0xbc   : > { %v390_v22 = vpop.permute.xlu1 %389  ;;  %v388_v23 = vpop.permute.xlu0 %387 }
  0xbd   : > { %463 = vst.msk [vmem:[#allocation2 + $0xb8] sm:$0xff] %vm439_vm1, %v390_v22  ;;  %462 = vst.msk [vmem:[#allocation2 + $0xb0] sm:$0xff] %vm439_vm1, %v388_v23 }
  0xbe   : > { %766 = vrot.lane.b32.xlu1 %v2863_v38, %s2619_s10  ;;  %764 = vrot.lane.b32.xlu0 %v2872_v39, %s2619_s10 }
  0xc0   : > { %v394_v52 = vpop.permute.xlu1 %393  ;;  %v392_v53 = vpop.permute.xlu0 %391 }
  0xc1   : > { %465 = vst.msk [vmem:[#allocation2 + $0xc8] sm:$0xff] %vm439_vm1, %v394_v52  ;;  %464 = vst.msk [vmem:[#allocation2 + $0xc0] sm:$0xff] %vm439_vm1, %v392_v53 }
  0xc2   : > { %959 = vrot.lane.b32.xlu1 %v2903_v46, %s2620_s11  ;;  %957 = vrot.lane.b32.xlu0 %v2906_v47, %s2620_s11 }
  0xc4   : > { %v398_v36 = vpop.permute.xlu1 %397  ;;  %v396_v37 = vpop.permute.xlu0 %395 }
  0xc5   : > { %467 = vst.msk [vmem:[#allocation2 + $0xd8] sm:$0xff] %vm439_vm1, %v398_v36  ;;  %466 = vst.msk [vmem:[#allocation2 + $0xd0] sm:$0xff] %vm439_vm1, %v396_v37 }
  0xc6   : > { %927 = vrot.lane.b32.xlu1 %v2723_v4, %s2620_s11  ;;  %925 = vrot.lane.b32.xlu0 %v2726_v5, %s2620_s11 }
  0xc8   : > { %v402_v38 = vpop.permute.xlu1 %401  ;;  %v400_v39 = vpop.permute.xlu0 %399 }
  0xc9   : > { %469 = vst.msk [vmem:[#allocation2 + $0xe8] sm:$0xff] %vm439_vm1, %v402_v38  ;;  %468 = vst.msk [vmem:[#allocation2 + $0xe0] sm:$0xff] %vm439_vm1, %v400_v39 }
  0xca   : > { %1152 = vrot.lane.b32.xlu1 %v3057_v57, %s2621_s12  ;;  %1150 = vrot.lane.b32.xlu0 %v3060_v62, %s2621_s12 }
  0xcc   : > { %v406_v46 = vpop.permute.xlu1 %405  ;;  %v404_v47 = vpop.permute.xlu0 %403 }
  0xcd   : > { %471 = vst.msk [vmem:[#allocation2 + $0xf8] sm:$0xff] %vm439_vm1, %v406_v46  ;;  %470 = vst.msk [vmem:[#allocation2 + $0xf0] sm:$0xff] %vm439_vm1, %v404_v47 }
  0xce   : > { %1120 = vrot.lane.b32.xlu1 %v2995_v12, %s2621_s12  ;;  %1118 = vrot.lane.b32.xlu0 %v2998_v13, %s2621_s12 }
  0xd0   : > { %v539_v4 = vpop.permute.xlu1 %538  ;;  %v537_v5 = vpop.permute.xlu0 %536 }
  0xd1   : > { %634 = vst.msk [vmem:[#allocation2 + $0x8] sm:$0xff] %vm632_vm2, %v539_v4  ;;  %633 = vst.msk [vmem:[#allocation2] sm:$0xff] %vm632_vm2, %v537_v5 }
  0xd2   : > { %1348 = vrot.lane.b32.xlu1 %v2891_v44, %s2622_s13  ;;  %1346 = vrot.lane.b32.xlu0 %v2894_v45, %s2622_s13 }
  0xd4   : > { %v543_v57 = vpop.permute.xlu1 %542  ;;  %v541_v62 = vpop.permute.xlu0 %540 }
  0xd5   : > { %636 = vst.msk [vmem:[#allocation2 + $0x18] sm:$0xff] %vm632_vm2, %v543_v57  ;;  %635 = vst.msk [vmem:[#allocation2 + $0x10] sm:$0xff] %vm632_vm2, %v541_v62 }
  0xd6   : > { %1316 = vrot.lane.b32.xlu1 %v2801_v24, %s2622_s13  ;;  %1314 = vrot.lane.b32.xlu0 %v2804_v25, %s2622_s13 }
  0xd8   : > { %v547_v12 = vpop.permute.xlu1 %546  ;;  %v545_v13 = vpop.permute.xlu0 %544 }
  0xd9   : > { %638 = vst.msk [vmem:[#allocation2 + $0x28] sm:$0xff] %vm632_vm2, %v547_v12  ;;  %637 = vst.msk [vmem:[#allocation2 + $0x20] sm:$0xff] %vm632_vm2, %v545_v13 }
  0xda   : > { %1541 = vrot.lane.b32.xlu1 %v2943_v54, %s2623_s14  ;;  %1539 = vrot.lane.b32.xlu0 %v2946_v55, %s2623_s14 }
  0xdc   : > { %v551_v60 = vpop.permute.xlu1 %550  ;;  %v549_v61 = vpop.permute.xlu0 %548 }
  0xdd   : > { %640 = vst.msk [vmem:[#allocation2 + $0x38] sm:$0xff] %vm632_vm2, %v551_v60  ;;  %639 = vst.msk [vmem:[#allocation2 + $0x30] sm:$0xff] %vm632_vm2, %v549_v61  ;;  %v3972_v60 = vld [vmem:[#allocation12_spill] sm:$0xff]  ;;  %v3973_v61 = vld [vmem:[#allocation13_spill] sm:$0xff] }
  0xde   : > { %1509 = vrot.lane.b32.xlu1 %v2743_v8, %s2623_s14  ;;  %1507 = vrot.lane.b32.xlu0 %v2746_v9, %s2623_s14 }
  0xe0   : > { %v555_v24 = vpop.permute.xlu1 %554  ;;  %v553_v25 = vpop.permute.xlu0 %552 }
  0xe1   : > { %642 = vst.msk [vmem:[#allocation2 + $0x48] sm:$0xff] %vm632_vm2, %v555_v24  ;;  %641 = vst.msk [vmem:[#allocation2 + $0x40] sm:$0xff] %vm632_vm2, %v553_v25 }
  0xe2   : > { %1734 = vrot.lane.b32.xlu1 %v3077_v1, %s2624_s21  ;;  %1732 = vrot.lane.b32.xlu0 %v3080_v2, %s2624_s21 }
  0xe4   : > { %v559_v19 = vpop.permute.xlu1 %558  ;;  %v557_v20 = vpop.permute.xlu0 %556 }
  0xe5   : > { %644 = vst.msk [vmem:[#allocation2 + $0x58] sm:$0xff] %vm632_vm2, %v559_v19  ;;  %643 = vst.msk [vmem:[#allocation2 + $0x50] sm:$0xff] %vm632_vm2, %v557_v20 }
  0xe6   : > { %1702 = vrot.lane.b32.xlu1 %v3015_v18, %s2624_s21  ;;  %1700 = vrot.lane.b32.xlu0 %v3018_v21, %s2624_s21 }
  0xe8   : > { %v563_v22 = vpop.permute.xlu1 %562  ;;  %v561_v23 = vpop.permute.xlu0 %560 }
  0xe9   : > { %646 = vst.msk [vmem:[#allocation2 + $0x68] sm:$0xff] %vm632_vm2, %v563_v22  ;;  %645 = vst.msk [vmem:[#allocation2 + $0x60] sm:$0xff] %vm632_vm2, %v561_v23 }
  0xea   : > { %770 = vrot.lane.b32.xlu1 %v2875_v40, %s2619_s10  ;;  %768 = vrot.lane.b32.xlu0 %v2878_v41, %s2619_s10 }
  0xec   : > { %v567_v52 = vpop.permute.xlu1 %566  ;;  %v565_v53 = vpop.permute.xlu0 %564 }
  0xed   : > { %648 = vst.msk [vmem:[#allocation2 + $0x78] sm:$0xff] %vm632_vm2, %v567_v52  ;;  %647 = vst.msk [vmem:[#allocation2 + $0x70] sm:$0xff] %vm632_vm2, %v565_v53  ;;  %v3976_v52 = vld [vmem:[#allocation14_spill] sm:$0xff]  ;;  %v3977_v53 = vld [vmem:[#allocation15_spill] sm:$0xff] }
  0xee   : > { %963 = vrot.lane.b32.xlu1 %v2923_v50, %s2620_s11  ;;  %961 = vrot.lane.b32.xlu0 %v2926_v51, %s2620_s11 }
  0xf0   : > { %v571_v36 = vpop.permute.xlu1 %570  ;;  %v569_v37 = vpop.permute.xlu0 %568 }
  0xf1   : > { %650 = vst.msk [vmem:[#allocation2 + $0x88] sm:$0xff] %vm632_vm2, %v571_v36  ;;  %649 = vst.msk [vmem:[#allocation2 + $0x80] sm:$0xff] %vm632_vm2, %v569_v37 }
  0xf2   : > { %931 = vrot.lane.b32.xlu1 %v2733_v6, %s2620_s11  ;;  %929 = vrot.lane.b32.xlu0 %v2736_v7, %s2620_s11 }
  0xf4   : > { %v575_v40 = vpop.permute.xlu1 %574  ;;  %v573_v41 = vpop.permute.xlu0 %572 }
  0xf5   : > { %652 = vst.msk [vmem:[#allocation2 + $0x98] sm:$0xff] %vm632_vm2, %v575_v40  ;;  %651 = vst.msk [vmem:[#allocation2 + $0x90] sm:$0xff] %vm632_vm2, %v573_v41  ;;  %v2196_v40 = vld [vmem:[%s2712_s7 + $0x82] sm:$0xff]  ;;  %v2195_v41 = vld [vmem:[%s2712_s7 + $0x7a] sm:$0xff] }
  0xf6   : > { %1156 = vrot.lane.b32.xlu1 %v3067_v63, %s2621_s12  ;;  %1154 = vrot.lane.b32.xlu0 %v3070_v0, %s2621_s12 }
  0xf8   : > { %v579_v50 = vpop.permute.xlu1 %578  ;;  %v577_v51 = vpop.permute.xlu0 %576 }
  0xf9   : > { %654 = vst.msk [vmem:[#allocation2 + $0xa8] sm:$0xff] %vm632_vm2, %v579_v50  ;;  %653 = vst.msk [vmem:[#allocation2 + $0xa0] sm:$0xff] %vm632_vm2, %v577_v51 }
  0xfa   : > { %1124 = vrot.lane.b32.xlu1 %v3005_v16, %s2621_s12  ;;  %1122 = vrot.lane.b32.xlu0 %v3008_v17, %s2621_s12 }
  0xfc   : > { %v583_v6 = vpop.permute.xlu1 %582  ;;  %v581_v7 = vpop.permute.xlu0 %580 }
  0xfd   : > { %656 = vst.msk [vmem:[#allocation2 + $0xb8] sm:$0xff] %vm632_vm2, %v583_v6  ;;  %655 = vst.msk [vmem:[#allocation2 + $0xb0] sm:$0xff] %vm632_vm2, %v581_v7  ;;  %v3979_v7 = vld [vmem:[#allocation11_spill] sm:$0xff] }
  0xfe   : > { %1352 = vrot.lane.b32.xlu1 %v2909_v48, %s2622_s13  ;;  %1350 = vrot.lane.b32.xlu0 %v2912_v49, %s2622_s13 }
 0x100   : > { %v587_v63 = vpop.permute.xlu1 %586  ;;  %v585_v0 = vpop.permute.xlu0 %584 }
 0x101   : > { %658 = vst.msk [vmem:[#allocation2 + $0xc8] sm:$0xff] %vm632_vm2, %v587_v63  ;;  %657 = vst.msk [vmem:[#allocation2 + $0xc0] sm:$0xff] %vm632_vm2, %v585_v0  ;;  %v3414_v0 = vld [vmem:[%s2712_s7 + $0x16a] sm:$0xff] }
 0x102   : > { %1320 = vrot.lane.b32.xlu1 %v2813_v26, %s2622_s13  ;;  %1318 = vrot.lane.b32.xlu0 %v2816_v27, %s2622_s13 }
 0x104   : > { %v591_v16 = vpop.permute.xlu1 %590  ;;  %v589_v17 = vpop.permute.xlu0 %588 }
 0x105   : > { %660 = vst.msk [vmem:[#allocation2 + $0xd8] sm:$0xff] %vm632_vm2, %v591_v16  ;;  %659 = vst.msk [vmem:[#allocation2 + $0xd0] sm:$0xff] %vm632_vm2, %v589_v17 }
 0x106   : > { %1545 = vrot.lane.b32.xlu1 %v2963_v58, %s2623_s14  ;;  %1543 = vrot.lane.b32.xlu0 %v2966_v59, %s2623_s14 }
 0x108   : > { %v595_v38 = vpop.permute.xlu1 %594  ;;  %v593_v39 = vpop.permute.xlu0 %592 }
 0x109   : > { %662 = vst.msk [vmem:[#allocation2 + $0xe8] sm:$0xff] %vm632_vm2, %v595_v38  ;;  %661 = vst.msk [vmem:[#allocation2 + $0xe0] sm:$0xff] %vm632_vm2, %v593_v39 }
 0x10a   : > { %1513 = vrot.lane.b32.xlu1 %v2753_v10, %s2623_s14  ;;  %1511 = vrot.lane.b32.xlu0 %v2756_v11, %s2623_s14 }
 0x10c   : > { %v599_v26 = vpop.permute.xlu1 %598  ;;  %v597_v27 = vpop.permute.xlu0 %596 }
 0x10d   : > { %664 = vst.msk [vmem:[#allocation2 + $0xf8] sm:$0xff] %vm632_vm2, %v599_v26  ;;  %663 = vst.msk [vmem:[#allocation2 + $0xf0] sm:$0xff] %vm632_vm2, %v597_v27  ;;  %v3434_v27 = vld [vmem:[%s2712_s7 + $0xaa] sm:$0xff] }
 0x10e   : > { %1738 = vrot.lane.b32.xlu1 %v3087_v3, %s2624_s21  ;;  %1736 = vrot.lane.b32.xlu0 %v3090_v56, %s2624_s21 }
 0x110   : > { %v735_v46 = vpop.permute.xlu1 %734  ;;  %v733_v47 = vpop.permute.xlu0 %732 }
 0x111   : > { %830 = vst.msk [vmem:[#allocation2 + $0x8] sm:$0xff] %vm828_vm3, %v735_v46  ;;  %829 = vst.msk [vmem:[#allocation2] sm:$0xff] %vm828_vm3, %v733_v47 }
 0x112   : > { %1706 = vrot.lane.b32.xlu1 %v3025_v29, %s2624_s21  ;;  %1704 = vrot.lane.b32.xlu0 %v3028_v30, %s2624_s21 }
 0x114   : > { %v739_v10 = vpop.permute.xlu1 %738  ;;  %v737_v11 = vpop.permute.xlu0 %736 }
 0x115   : > { %832 = vst.msk [vmem:[#allocation2 + $0x18] sm:$0xff] %vm828_vm3, %v739_v10  ;;  %831 = vst.msk [vmem:[#allocation2 + $0x10] sm:$0xff] %vm828_vm3, %v737_v11 }
 0x116   : > { %774 = vrot.lane.b32.xlu1 %v2891_v44, %s2619_s10  ;;  %772 = vrot.lane.b32.xlu0 %v2894_v45, %s2619_s10 }
 0x118   : > { %v743_v4 = vpop.permute.xlu1 %742  ;;  %v741_v5 = vpop.permute.xlu0 %740 }
 0x119   : > { %834 = vst.msk [vmem:[#allocation2 + $0x28] sm:$0xff] %vm828_vm3, %v743_v4  ;;  %833 = vst.msk [vmem:[#allocation2 + $0x20] sm:$0xff] %vm828_vm3, %v741_v5 }
 0x11a   : > { %967 = vrot.lane.b32.xlu1 %v2943_v54, %s2620_s11  ;;  %965 = vrot.lane.b32.xlu0 %v2946_v55, %s2620_s11 }
 0x11c   : > { %v747_v57 = vpop.permute.xlu1 %746  ;;  %v745_v62 = vpop.permute.xlu0 %744 }
 0x11d   : > { %836 = vst.msk [vmem:[#allocation2 + $0x38] sm:$0xff] %vm828_vm3, %v747_v57  ;;  %835 = vst.msk [vmem:[#allocation2 + $0x30] sm:$0xff] %vm828_vm3, %v745_v62  ;;  %v3451_v62 = vld [vmem:[%s2712_s7 + $0xb4] sm:$0xff] }
 0x11e   : > { %935 = vrot.lane.b32.xlu1 %v2743_v8, %s2620_s11  ;;  %933 = vrot.lane.b32.xlu0 %v2746_v9, %s2620_s11 }
 0x120   : > { %v751_v44 = vpop.permute.xlu1 %750  ;;  %v749_v45 = vpop.permute.xlu0 %748 }
 0x121   : > { %838 = vst.msk [vmem:[#allocation2 + $0x48] sm:$0xff] %vm828_vm3, %v751_v44  ;;  %837 = vst.msk [vmem:[#allocation2 + $0x40] sm:$0xff] %vm828_vm3, %v749_v45  ;;  %v3454_v44 = vld [vmem:[%s2712_s7 + $0xac] sm:$0xff] }
 0x122   : > { %1160 = vrot.lane.b32.xlu1 %v3077_v1, %s2621_s12  ;;  %1158 = vrot.lane.b32.xlu0 %v3080_v2, %s2621_s12  ;;  %v3970_v1 = vld [vmem:[#allocation8_spill] sm:$0xff]  ;;  %v3971_v2 = vld [vmem:[#allocation9_spill] sm:$0xff] }
 0x124   : > { %v755_v54 = vpop.permute.xlu1 %754  ;;  %v753_v55 = vpop.permute.xlu0 %752 }
 0x125   : > { %840 = vst.msk [vmem:[#allocation2 + $0x58] sm:$0xff] %vm828_vm3, %v755_v54  ;;  %839 = vst.msk [vmem:[#allocation2 + $0x50] sm:$0xff] %vm828_vm3, %v753_v55  ;;  %v2214_v55 = vld [vmem:[%s2712_s7 + $0x15a] sm:$0xff] }
 0x126   : > { %1128 = vrot.lane.b32.xlu1 %v3015_v18, %s2621_s12  ;;  %1126 = vrot.lane.b32.xlu0 %v3018_v21, %s2621_s12 }
 0x128   : > { %v759_v8 = vpop.permute.xlu1 %758  ;;  %v757_v9 = vpop.permute.xlu0 %756 }
 0x129   : > { %842 = vst.msk [vmem:[#allocation2 + $0x68] sm:$0xff] %vm828_vm3, %v759_v8  ;;  %841 = vst.msk [vmem:[#allocation2 + $0x60] sm:$0xff] %vm828_vm3, %v757_v9  ;;  %v2213_v8 = vld [vmem:[%s2712_s7 + $0x152] sm:$0xff] }
 0x12a   : > { %1356 = vrot.lane.b32.xlu1 %v3970_v1, %s2622_s13  ;;  %1354 = vrot.lane.b32.xlu0 %v3971_v2, %s2622_s13 }
 0x12c   : > { %v763_v12 = vpop.permute.xlu1 %762  ;;  %v761_v13 = vpop.permute.xlu0 %760 }
 0x12d   : > { %844 = vst.msk [vmem:[#allocation2 + $0x78] sm:$0xff] %vm828_vm3, %v763_v12  ;;  %843 = vst.msk [vmem:[#allocation2 + $0x70] sm:$0xff] %vm828_vm3, %v761_v13  ;;  %v2198_v13 = vld [vmem:[%s2712_s7 + $0x9a] sm:$0xff] }
 0x12e   : > { %1324 = vrot.lane.b32.xlu1 %v2819_v28, %s2622_s13  ;;  %1322 = vrot.lane.b32.xlu0 %v2830_v31, %s2622_s13  ;;  %v3974_v28 = vld [vmem:[#allocation6_spill] sm:$0xff]  ;;  %v3975_v31 = vld [vmem:[#allocation7_spill] sm:$0xff] }
 0x130   : > { %v767_v18 = vpop.permute.xlu1 %766  ;;  %v765_v21 = vpop.permute.xlu0 %764 }
 0x131   : > { %846 = vst.msk [vmem:[#allocation2 + $0x88] sm:$0xff] %vm828_vm3, %v767_v18  ;;  %845 = vst.msk [vmem:[#allocation2 + $0x80] sm:$0xff] %vm828_vm3, %v765_v21  ;;  %v2246_v21 = vld [vmem:[%s2712_s7 + $0x15c] sm:$0xff] }
 0x132   : > { %1549 = vrot.lane.b32.xlu1 %v3972_v60, %s2623_s14  ;;  %1547 = vrot.lane.b32.xlu0 %v3973_v61, %s2623_s14  ;;  %v2245_v60 = vld [vmem:[%s2712_s7 + $0x154] sm:$0xff] }
 0x134   : > { %v960_v24 = vpop.permute.xlu1 %959  ;;  %v958_v25 = vpop.permute.xlu0 %957 }
 0x135   : > { %1039 = vst.msk [vmem:[#allocation2 + $0x88] sm:$0xff] %vm1021_vm4, %v960_v24  ;;  %1038 = vst.msk [vmem:[#allocation2 + $0x80] sm:$0xff] %vm1021_vm4, %v958_v25  ;;  %v2230_v25 = vld [vmem:[%s2712_s7 + $0x9c] sm:$0xff] }
 0x136   : > { %1517 = vrot.lane.b32.xlu1 %v3974_v28, %s2623_s14  ;;  %1515 = vrot.lane.b32.xlu0 %v3975_v31, %s2623_s14  ;;  %v2229_v28 = vld [vmem:[%s2712_s7 + $0x94] sm:$0xff] }
 0x138   : > { %v928_v19 = vpop.permute.xlu1 %927  ;;  %v926_v20 = vpop.permute.xlu0 %925 }
 0x139   : > { %1023 = vst.msk [vmem:[#allocation2 + $0x8] sm:$0xff] %vm1021_vm4, %v928_v19  ;;  %1022 = vst.msk [vmem:[#allocation2] sm:$0xff] %vm1021_vm4, %v926_v20  ;;  %v3493_v20 = vld [vmem:[%s2712_s7 + $0x188] sm:$0xff] }
 0x13a   : > { %1742 = vrot.lane.b32.xlu1 %v3099_v15, %s2624_s21  ;;  %1740 = vrot.lane.b32.xlu0 %v3102_v14, %s2624_s21 }
 0x13c   : > { %v1153_v22 = vpop.permute.xlu1 %1152  ;;  %v1151_v23 = vpop.permute.xlu0 %1150 }
 0x13d   : > { %1232 = vst.msk [vmem:[#allocation2 + $0x88] sm:$0xff] %vm1214_vm5, %v1153_v22  ;;  %1231 = vst.msk [vmem:[#allocation2 + $0x80] sm:$0xff] %vm1214_vm5, %v1151_v23  ;;  %v3496_v22 = vld [vmem:[%s2712_s7 + $0x180] sm:$0xff] }
 0x13e   : > { %1710 = vrot.lane.b32.xlu1 %v3976_v52, %s2624_s21  ;;  %1708 = vrot.lane.b32.xlu0 %v3977_v53, %s2624_s21 }
 0x140   : > { %v1121_v36 = vpop.permute.xlu1 %1120  ;;  %v1119_v15 = vpop.permute.xlu0 %1118 }
 0x141   : > { %1216 = vst.msk [vmem:[#allocation2 + $0x8] sm:$0xff] %vm1214_vm5, %v1121_v36  ;;  %1215 = vst.msk [vmem:[#allocation2] sm:$0xff] %vm1214_vm5, %v1119_v15  ;;  %v3511_v15 = vld [vmem:[%s2712_s7 + $0x18a] sm:$0xff] }
 0x142   : > { %778 = vrot.lane.b32.xlu1 %v2909_v48, %s2619_s10  ;;  %776 = vrot.lane.b32.xlu0 %v2912_v49, %s2619_s10 }
 0x144   : > { %v1349_v14 = vpop.permute.xlu1 %1348  ;;  %v1347_v37 = vpop.permute.xlu0 %1346 }
 0x145   : > { %1428 = vst.msk [vmem:[#allocation2 + $0x88] sm:$0xff] %vm1410_vm6, %v1349_v14  ;;  %1427 = vst.msk [vmem:[#allocation2 + $0x80] sm:$0xff] %vm1410_vm6, %v1347_v37  ;;  %v3514_v14 = vld [vmem:[%s2712_s7 + $0x182] sm:$0xff] }
 0x146   : > { %971 = vrot.lane.b32.xlu1 %v2963_v58, %s2620_s11  ;;  %969 = vrot.lane.b32.xlu0 %v2966_v59, %s2620_s11 }
 0x148   : > { %v1317_v50 = vpop.permute.xlu1 %1316  ;;  %v1315_v48 = vpop.permute.xlu0 %1314 }
 0x149   : > { %1412 = vst.msk [vmem:[#allocation2 + $0x8] sm:$0xff] %vm1410_vm6, %v1317_v50  ;;  %1411 = vst.msk [vmem:[#allocation2] sm:$0xff] %vm1410_vm6, %v1315_v48 }
 0x14a   : > { %939 = vrot.lane.b32.xlu1 %v2196_v40, %s2620_s11  ;;  %937 = vrot.lane.b32.xlu0 %v2195_v41, %s2620_s11 }
 0x14c   : > { %v1542_v49 = vpop.permute.xlu1 %1541  ;;  %v1540_v51 = vpop.permute.xlu0 %1539 }
 0x14d   : > { %1621 = vst.msk [vmem:[#allocation2 + $0x88] sm:$0xff] %vm1603_vm7, %v1542_v49  ;;  %1620 = vst.msk [vmem:[#allocation2 + $0x80] sm:$0xff] %vm1603_vm7, %v1540_v51 }
 0x14e   : > { %1164 = vrot.lane.b32.xlu1 %v3087_v3, %s2621_s12  ;;  %1162 = vrot.lane.b32.xlu0 %v3090_v56, %s2621_s12  ;;  %v3978_v56 = vld [vmem:[#allocation10_spill] sm:$0xff] }
 0x150   : > { %v1510_v58 = vpop.permute.xlu1 %1509  ;;  %v1508_v59 = vpop.permute.xlu0 %1507 }
 0x151   : > { %1605 = vst.msk [vmem:[#allocation2 + $0x8] sm:$0xff] %vm1603_vm7, %v1510_v58  ;;  %1604 = vst.msk [vmem:[#allocation2] sm:$0xff] %vm1603_vm7, %v1508_v59 }
 0x152   : > { %1132 = vrot.lane.b32.xlu1 %v3025_v29, %s2621_s12  ;;  %1130 = vrot.lane.b32.xlu0 %v3028_v30, %s2621_s12  ;;  %v3411_v30 = vld [vmem:[%s2712_s7 + $0x172] sm:$0xff] }
 0x154   : > { %v1735_v6 = vpop.permute.xlu1 %1734  ;;  %v1733_v3 = vpop.permute.xlu0 %1732 }
 0x155   : > { %1814 = vst.msk [vmem:[#allocation2 + $0x88] sm:$0xff] %vm1796_vm8, %v1735_v6  ;;  %1813 = vst.msk [vmem:[#allocation2 + $0x80] sm:$0xff] %vm1796_vm8, %v1733_v3  ;;  %v3539_v3 = vld [vmem:[%s2712_s7 + $0x18c] sm:$0xff] }
 0x156   : > { %1360 = vrot.lane.b32.xlu1 %v3978_v56, %s2622_s13  ;;  %1358 = vrot.lane.b32.xlu0 %v3979_v7, %s2622_s13 }
 0x158   : > { %v1703_v63 = vpop.permute.xlu1 %1702  ;;  %v1701_v29 = vpop.permute.xlu0 %1700 }
 0x159   : > { %1798 = vst.msk [vmem:[#allocation2 + $0x8] sm:$0xff] %vm1796_vm8, %v1703_v63  ;;  %1797 = vst.msk [vmem:[#allocation2] sm:$0xff] %vm1796_vm8, %v1701_v29  ;;  %v3542_v63 = vld [vmem:[%s2712_s7 + $0x184] sm:$0xff] }
 0x15a   : > { %1328 = vrot.lane.b32.xlu1 %v2833_v32, %s2622_s13  ;;  %1326 = vrot.lane.b32.xlu0 %v2836_v33, %s2622_s13  ;;  %v3431_v33 = vld [vmem:[%s2712_s7 + $0xb2] sm:$0xff] }
 0x15c   : > { %v771_v16 = vpop.permute.xlu1 %770  ;;  %v769_v17 = vpop.permute.xlu0 %768  ;;  %v1846_v38 = vld [vmem:[#allocation2 + $0x80] sm:$0xff]  ;;  %v1847_v39 = vld [vmem:[#allocation2 + $0x88] sm:$0xff] }
 0x15d   : > { %848 = vst.msk [vmem:[#allocation2 + $0x98] sm:$0xff] %vm828_vm3, %v771_v16  ;;  %847 = vst.msk [vmem:[#allocation2 + $0x90] sm:$0xff] %vm828_vm3, %v769_v17  ;;  %v2422_v32 = vpack.c.bf16 %v1847_v39, %v1846_v38  ;;  %v3551_v17 = vld [vmem:[%s2712_s7 + $0xcc] sm:$0xff]  ;;  %v3554_v38 = vld [vmem:[%s2712_s7 + $0xc4] sm:$0xff] }
 0x15e   : > { %1553 = vrot.lane.b32.xlu1 %v3411_v30, %s2623_s14  ;;  %1551 = vrot.lane.b32.xlu0 %v3414_v0, %s2623_s14 }
 0x15f   : > { %2424 = vmatprep.subr.msk.bf16.mxu0 %vm3418_vm10, %v2422_v32 }
 0x160   : > { %v964_v46 = vpop.permute.xlu1 %963  ;;  %v962_v47 = vpop.permute.xlu0 %961  ;;  %v1830_v10 = vld [vmem:[#allocation2] sm:$0xff]  ;;  %v1831_v11 = vld [vmem:[#allocation2 + $0x8] sm:$0xff] }
 0x161   : > { %1041 = vst.msk [vmem:[#allocation2 + $0x98] sm:$0xff] %vm1021_vm4, %v964_v46  ;;  %1040 = vst.msk [vmem:[#allocation2 + $0x90] sm:$0xff] %vm1021_vm4, %v962_v47  ;;  %v2425_v4 = vpack.c.bf16 %v1831_v11, %v1830_v10 }
 0x162   : > { %1521 = vrot.lane.b32.xlu1 %v3431_v33, %s2623_s14  ;;  %1519 = vrot.lane.b32.xlu0 %v3434_v27, %s2623_s14 }
 0x163   : > { %2427 = vmatpush3.bf16.xpose.msk.msra.mxu0 %vm3418_vm10, %v2425_v4 }
 0x164   : > { %v932_v5 = vpop.permute.xlu1 %931  ;;  %v930_v57 = vpop.permute.xlu0 %929 }
 0x165   : > { %1025 = vst.msk [vmem:[#allocation2 + $0x18] sm:$0xff] %vm1021_vm4, %v932_v5  ;;  %1024 = vst.msk [vmem:[#allocation2 + $0x10] sm:$0xff] %vm1021_vm4, %v930_v57 }
 0x166   : > { %1746 = vrot.lane.b32.xlu1 %v3111_v42, %s2624_s21  ;;  %1744 = vrot.lane.b32.xlu0 %v3114_v43, %s2624_s21 }
 0x168   : > { %v1157_v45 = vpop.permute.xlu1 %1156  ;;  %v1155_v54 = vpop.permute.xlu0 %1154 }
 0x169   : > { %1234 = vst.msk [vmem:[#allocation2 + $0x98] sm:$0xff] %vm1214_vm5, %v1157_v45  ;;  %1233 = vst.msk [vmem:[#allocation2 + $0x90] sm:$0xff] %vm1214_vm5, %v1155_v54  ;;  %v3596_v45 = vld [vmem:[%s2712_s7 + $0x198] sm:$0xff] }
 0x16a   : > { %1714 = vrot.lane.b32.xlu1 %v3451_v62, %s2624_s21  ;;  %1712 = vrot.lane.b32.xlu0 %v3454_v44, %s2624_s21 }
 0x16c   : > { %v1125_v42 = vpop.permute.xlu1 %1124  ;;  %v1123_v43 = vpop.permute.xlu0 %1122 }
 0x16d   : > { %1218 = vst.msk [vmem:[#allocation2 + $0x18] sm:$0xff] %vm1214_vm5, %v1125_v42  ;;  %1217 = vst.msk [vmem:[#allocation2 + $0x10] sm:$0xff] %vm1214_vm5, %v1123_v43 }
 0x16e   : > { %782 = vrot.lane.b32.xlu1 %v3970_v1, %s2619_s10  ;;  %780 = vrot.lane.b32.xlu0 %v3971_v2, %s2619_s10  ;;  %v2197_v1 = vld [vmem:[%s2712_s7 + $0x92] sm:$0xff] }
 0x170   : > { %v1353_v9 = vpop.permute.xlu1 %1352  ;;  %v1351_v12 = vpop.permute.xlu0 %1350 }
 0x171   : > { %1430 = vst.msk [vmem:[#allocation2 + $0x98] sm:$0xff] %vm1410_vm6, %v1353_v9  ;;  %1429 = vst.msk [vmem:[#allocation2 + $0x90] sm:$0xff] %vm1410_vm6, %v1351_v12  ;;  %v3614_v9 = vld [vmem:[%s2712_s7 + $0x19a] sm:$0xff] }
 0x172   : > { %975 = vrot.lane.b32.xlu1 %v2214_v55, %s2620_s11  ;;  %973 = vrot.lane.b32.xlu0 %v2213_v8, %s2620_s11  ;;  %v3611_v8 = vld [vmem:[%s2712_s7 + $0x1a2] sm:$0xff] }
 0x174   : > { %v1321_v18 = vpop.permute.xlu1 %1320  ;;  %v1319_v2 = vpop.permute.xlu0 %1318 }
 0x175   : > { %1414 = vst.msk [vmem:[#allocation2 + $0x18] sm:$0xff] %vm1410_vm6, %v1321_v18  ;;  %1413 = vst.msk [vmem:[#allocation2 + $0x10] sm:$0xff] %vm1410_vm6, %v1319_v2 }
 0x176   : > { %943 = vrot.lane.b32.xlu1 %v2198_v13, %s2620_s11  ;;  %941 = vrot.lane.b32.xlu0 %v2197_v1, %s2620_s11 }
 0x178   : > { %v1546_v61 = vpop.permute.xlu1 %1545  ;;  %v1544_v24 = vpop.permute.xlu0 %1543 }
 0x179   : > { %1623 = vst.msk [vmem:[#allocation2 + $0x98] sm:$0xff] %vm1603_vm7, %v1546_v61  ;;  %1622 = vst.msk [vmem:[#allocation2 + $0x90] sm:$0xff] %vm1603_vm7, %v1544_v24 }
 0x17a   : > { %1168 = vrot.lane.b32.xlu1 %v2246_v21, %s2621_s12  ;;  %1166 = vrot.lane.b32.xlu0 %v2245_v60, %s2621_s12  ;;  %v3625_v21 = vld [vmem:[%s2712_s7 + $0xe2] sm:$0xff]  ;;  %v3628_v60 = vld [vmem:[%s2712_s7 + $0xda] sm:$0xff] }
 0x17c   : > { %v1514_v31 = vpop.permute.xlu1 %1513  ;;  %v1512_v19 = vpop.permute.xlu0 %1511 }
 0x17d   : > { %1607 = vst.msk [vmem:[#allocation2 + $0x18] sm:$0xff] %vm1603_vm7, %v1514_v31  ;;  %1606 = vst.msk [vmem:[#allocation2 + $0x10] sm:$0xff] %vm1603_vm7, %v1512_v19  ;;  %v3639_v19 = vld [vmem:[%s2712_s7 + $0x1a4] sm:$0xff] }
 0x17e   : > { %1136 = vrot.lane.b32.xlu1 %v2230_v25, %s2621_s12  ;;  %1134 = vrot.lane.b32.xlu0 %v2229_v28, %s2621_s12 }
 0x180   : > { %v1739_v23 = vpop.permute.xlu1 %1738  ;;  %v1737_v52 = vpop.permute.xlu0 %1736 }
 0x181   : > { %1816 = vst.msk [vmem:[#allocation2 + $0x98] sm:$0xff] %vm1796_vm8, %v1739_v23  ;;  %1815 = vst.msk [vmem:[#allocation2 + $0x90] sm:$0xff] %vm1796_vm8, %v1737_v52  ;;  %v3642_v23 = vld [vmem:[%s2712_s7 + $0x19c] sm:$0xff] }
 0x182   : > { %1364 = vrot.lane.b32.xlu1 %v3493_v20, %s2622_s13  ;;  %1362 = vrot.lane.b32.xlu0 %v3496_v22, %s2622_s13 }
 0x184   : > { %v1707_v53 = vpop.permute.xlu1 %1706  ;;  %v1705_v36 = vpop.permute.xlu0 %1704 }
 0x185   : > { %1800 = vst.msk [vmem:[#allocation2 + $0x18] sm:$0xff] %vm1796_vm8, %v1707_v53  ;;  %1799 = vst.msk [vmem:[#allocation2 + $0x10] sm:$0xff] %vm1796_vm8, %v1705_v36  ;;  %v3651_v36 = vld [vmem:[%s2712_s7 + $0xe4] sm:$0xff] }
 0x186   : > { %1332 = vrot.lane.b32.xlu1 %v2847_v34, %s2622_s13  ;;  %1330 = vrot.lane.b32.xlu0 %v2850_v35, %s2622_s13  ;;  %v3525_v34 = vld [vmem:[%s2712_s7 + $0xca] sm:$0xff]  ;;  %v3528_v35 = vld [vmem:[%s2712_s7 + $0xc2] sm:$0xff] }
 0x188   : > { %v775_v37 = vpop.permute.xlu1 %774  ;;  %v773_v40 = vpop.permute.xlu0 %772  ;;  %v1848_v41 = vld [vmem:[#allocation2 + $0x90] sm:$0xff]  ;;  %v1849_v50 = vld [vmem:[#allocation2 + $0x98] sm:$0xff] }
 0x189   : > { %850 = vst.msk [vmem:[#allocation2 + $0xa8] sm:$0xff] %vm828_vm3, %v775_v37  ;;  %849 = vst.msk [vmem:[#allocation2 + $0xa0] sm:$0xff] %vm828_vm3, %v773_v40  ;;  %v2428_v48 = vpack.c.bf16 %v1849_v50, %v1848_v41  ;;  %v3654_v37 = vld [vmem:[%s2712_s7 + $0xdc] sm:$0xff] }
 0x18a   : > { %1557 = vrot.lane.b32.xlu1 %v3511_v15, %s2623_s14  ;;  %1555 = vrot.lane.b32.xlu0 %v3514_v14, %s2623_s14 }
 0x18b   : > { %2430 = vmatprep.subr.msk.bf16.mxu0 %vm3418_vm10, %v2428_v48 }
 0x18c   : > { %v968_v49 = vpop.permute.xlu1 %967  ;;  %v966_v51 = vpop.permute.xlu0 %965  ;;  %v1832_v58 = vld [vmem:[#allocation2 + $0x10] sm:$0xff]  ;;  %v1833_v59 = vld [vmem:[#allocation2 + $0x18] sm:$0xff] }
 0x18d   : > { %1043 = vst.msk [vmem:[#allocation2 + $0xa8] sm:$0xff] %vm1021_vm4, %v968_v49  ;;  %1042 = vst.msk [vmem:[#allocation2 + $0xa0] sm:$0xff] %vm1021_vm4, %v966_v51  ;;  %v2431_v6 = vpack.c.bf16 %v1833_v59, %v1832_v58 }
 0x18e   : > { %1525 = vrot.lane.b32.xlu1 %v3525_v34, %s2623_s14  ;;  %1523 = vrot.lane.b32.xlu0 %v3528_v35, %s2623_s14 }
 0x18f   : > { %2433 = vmatpush3.bf16.xpose.msk.msra.mxu0 %vm3418_vm10, %v2431_v6 }
 0x190   : > { %v936_v29 = vpop.permute.xlu1 %935  ;;  %v934_v16 = vpop.permute.xlu0 %933 }
 0x191   : > { %1027 = vst.msk [vmem:[#allocation2 + $0x28] sm:$0xff] %vm1021_vm4, %v936_v29  ;;  %1026 = vst.msk [vmem:[#allocation2 + $0x20] sm:$0xff] %vm1021_vm4, %v934_v16  ;;  %v2265_v29 = vld [vmem:[%s2712_s7 + $0xf0] sm:$0xff] }
 0x192   : > { %1750 = vrot.lane.b32.xlu1 %v3539_v3, %s2624_s21  ;;  %1748 = vrot.lane.b32.xlu0 %v3542_v63, %s2624_s21 }
 0x194   : > { %v1161_v39 = vpop.permute.xlu1 %1160  ;;  %v1159_v32 = vpop.permute.xlu0 %1158 }
 0x195   : > { %1236 = vst.msk [vmem:[#allocation2 + $0xa8] sm:$0xff] %vm1214_vm5, %v1161_v39  ;;  %1235 = vst.msk [vmem:[#allocation2 + $0xa0] sm:$0xff] %vm1214_vm5, %v1159_v32  ;;  %v2313_v39 = vld [vmem:[%s2712_s7 + $0x1b2] sm:$0xff] }
 0x196   : > { %1718 = vrot.lane.b32.xlu1 %v3551_v17, %s2624_s21  ;;  %1716 = vrot.lane.b32.xlu0 %v3554_v38, %s2624_s21 }
 0x198   : > { %v1129_v46 = vpop.permute.xlu1 %1128  ;;  %v1127_v47 = vpop.permute.xlu0 %1126 }
 0x199   : > { %1220 = vst.msk [vmem:[#allocation2 + $0x28] sm:$0xff] %vm1214_vm5, %v1129_v46  ;;  %1219 = vst.msk [vmem:[#allocation2 + $0x20] sm:$0xff] %vm1214_vm5, %v1127_v47 }
 0x19a   : > { %786 = vrot.lane.b32.xlu1 %v3978_v56, %s2619_s10  ;;  %784 = vrot.lane.b32.xlu0 %v3979_v7, %s2619_s10  ;;  %v2248_v56 = vld [vmem:[%s2712_s7 + $0x174] sm:$0xff]  ;;  %v2247_v7 = vld [vmem:[%s2712_s7 + $0x16c] sm:$0xff] }
 0x19c   : > { %v1357_v10 = vpop.permute.xlu1 %1356  ;;  %v1355_v11 = vpop.permute.xlu0 %1354 }
 0x19d   : > { %1432 = vst.msk [vmem:[#allocation2 + $0xa8] sm:$0xff] %vm1410_vm6, %v1357_v10  ;;  %1431 = vst.msk [vmem:[#allocation2 + $0xa0] sm:$0xff] %vm1410_vm6, %v1355_v11 }
 0x19e   : > { %979 = vrot.lane.b32.xlu1 %v3411_v30, %s2620_s11  ;;  %977 = vrot.lane.b32.xlu0 %v3414_v0, %s2620_s11 }
 0x1a0   : > { %v1325_v4 = vpop.permute.xlu1 %1324  ;;  %v1323_v5 = vpop.permute.xlu0 %1322 }
 0x1a1   : > { %1416 = vst.msk [vmem:[#allocation2 + $0x28] sm:$0xff] %vm1410_vm6, %v1325_v4  ;;  %1415 = vst.msk [vmem:[#allocation2 + $0x20] sm:$0xff] %vm1410_vm6, %v1323_v5  ;;  %v2298_v4 = vld [vmem:[%s2712_s7 + $0xfa] sm:$0xff]  ;;  %v2297_v5 = vld [vmem:[%s2712_s7 + $0xf2] sm:$0xff] }
 0x1a2   : > { %947 = vrot.lane.b32.xlu1 %v3431_v33, %s2620_s11  ;;  %945 = vrot.lane.b32.xlu0 %v3434_v27, %s2620_s11  ;;  %v3593_v27 = vld [vmem:[%s2712_s7 + $0x1a0] sm:$0xff] }
 0x1a4   : > { %v1550_v30 = vpop.permute.xlu1 %1549  ;;  %v1548_v57 = vpop.permute.xlu0 %1547 }
 0x1a5   : > { %1625 = vst.msk [vmem:[#allocation2 + $0xa8] sm:$0xff] %vm1603_vm7, %v1550_v30  ;;  %1624 = vst.msk [vmem:[#allocation2 + $0xa0] sm:$0xff] %vm1603_vm7, %v1548_v57 }
 0x1a6   : > { %1172 = vrot.lane.b32.xlu1 %v2248_v56, %s2621_s12  ;;  %1170 = vrot.lane.b32.xlu0 %v2247_v7, %s2621_s12 }
 0x1a8   : > { %v1518_v0 = vpop.permute.xlu1 %1517  ;;  %v1516_v33 = vpop.permute.xlu0 %1515 }
 0x1a9   : > { %1609 = vst.msk [vmem:[#allocation2 + $0x28] sm:$0xff] %vm1603_vm7, %v1518_v0  ;;  %1608 = vst.msk [vmem:[#allocation2 + $0x20] sm:$0xff] %vm1603_vm7, %v1516_v33  ;;  %v2346_v33 = vld [vmem:[%s2712_s7 + $0x1bc] sm:$0xff] }
 0x1aa   : > { %1140 = vrot.lane.b32.xlu1 %v3451_v62, %s2621_s12  ;;  %1138 = vrot.lane.b32.xlu0 %v3454_v44, %s2621_s12  ;;  %v2264_v62 = vld [vmem:[%s2712_s7 + $0xe0] sm:$0xff]  ;;  %v2263_v44 = vld [vmem:[%s2712_s7 + $0xd8] sm:$0xff] }
 0x1ac   : > { %v1743_v54 = vpop.permute.xlu1 %1742  ;;  %v1741_v42 = vpop.permute.xlu0 %1740 }
 0x1ad   : > { %1818 = vst.msk [vmem:[#allocation2 + $0xa8] sm:$0xff] %vm1796_vm8, %v1743_v54  ;;  %1817 = vst.msk [vmem:[#allocation2 + $0xa0] sm:$0xff] %vm1796_vm8, %v1741_v42  ;;  %v2345_v54 = vld [vmem:[%s2712_s7 + $0x1b4] sm:$0xff] }
 0x1ae   : > { %1368 = vrot.lane.b32.xlu1 %v3593_v27, %s2622_s13  ;;  %1366 = vrot.lane.b32.xlu0 %v3596_v45, %s2622_s13 }
 0x1b0   : > { %v1711_v43 = vpop.permute.xlu1 %1710  ;;  %v1709_v55 = vpop.permute.xlu0 %1708 }
 0x1b1   : > { %1802 = vst.msk [vmem:[#allocation2 + $0x28] sm:$0xff] %vm1796_vm8, %v1711_v43  ;;  %1801 = vst.msk [vmem:[#allocation2 + $0x20] sm:$0xff] %vm1796_vm8, %v1709_v55  ;;  %v2329_v43 = vld [vmem:[%s2712_s7 + $0xf4] sm:$0xff] }
 0x1b2   : > { %1336 = vrot.lane.b32.xlu1 %v2264_v62, %s2622_s13  ;;  %1334 = vrot.lane.b32.xlu0 %v2263_v44, %s2622_s13  ;;  %v2330_v44 = vld [vmem:[%s2712_s7 + $0xfc] sm:$0xff] }
 0x1b4   : > { %v779_v12 = vpop.permute.xlu1 %778  ;;  %v777_v13 = vpop.permute.xlu0 %776  ;;  %v1850_v1 = vld [vmem:[#allocation2 + $0xa0] sm:$0xff]  ;;  %v1851_v18 = vld [vmem:[#allocation2 + $0xa8] sm:$0xff] }
 0x1b5   : > { %852 = vst.msk [vmem:[#allocation2 + $0xb8] sm:$0xff] %vm828_vm3, %v779_v12  ;;  %851 = vst.msk [vmem:[#allocation2 + $0xb0] sm:$0xff] %vm828_vm3, %v777_v13  ;;  %v2434_v2 = vpack.c.bf16 %v1851_v18, %v1850_v1 }
 0x1b6   : > { %1561 = vrot.lane.b32.xlu1 %v3611_v8, %s2623_s14  ;;  %1559 = vrot.lane.b32.xlu0 %v3614_v9, %s2623_s14 }
 0x1b7   : > { %2436 = vmatprep.subr.msk.bf16.mxu0 %vm3418_vm10, %v2434_v2 }
 0x1b8   : > { %v972_v61 = vpop.permute.xlu1 %971  ;;  %v970_v24 = vpop.permute.xlu0 %969  ;;  %v1834_v25 = vld [vmem:[#allocation2 + $0x20] sm:$0xff]  ;;  %v1835_v28 = vld [vmem:[#allocation2 + $0x28] sm:$0xff] }
 0x1b9   : > { %1045 = vst.msk [vmem:[#allocation2 + $0xb8] sm:$0xff] %vm1021_vm4, %v972_v61  ;;  %1044 = vst.msk [vmem:[#allocation2 + $0xb0] sm:$0xff] %vm1021_vm4, %v970_v24  ;;  %v2437_v31 = vpack.c.bf16 %v1835_v28, %v1834_v25 }
 0x1ba   : > { %1529 = vrot.lane.b32.xlu1 %v3625_v21, %s2623_s14  ;;  %1527 = vrot.lane.b32.xlu0 %v3628_v60, %s2623_s14 }
 0x1bb   : > { %2439 = vmatpush3.bf16.xpose.msk.msra.mxu0 %vm3418_vm10, %v2437_v31  ;;  %v2268_v31 = vld [vmem:[%s2712_s7 + $0x110] sm:$0xff] }
 0x1bc   : > { %v940_v52 = vpop.permute.xlu1 %939  ;;  %v938_v53 = vpop.permute.xlu0 %937 }
 0x1bd   : > { %1029 = vst.msk [vmem:[#allocation2 + $0x38] sm:$0xff] %vm1021_vm4, %v940_v52  ;;  %1028 = vst.msk [vmem:[#allocation2 + $0x30] sm:$0xff] %vm1021_vm4, %v938_v53  ;;  %v2316_v53 = vld [vmem:[%s2712_s7 + $0x1d2] sm:$0xff] }
 0x1be   : > { %1754 = vrot.lane.b32.xlu1 %v3639_v19, %s2624_s21  ;;  %1752 = vrot.lane.b32.xlu0 %v3642_v23, %s2624_s21 }
 0x1c0   : > { %v1165_v40 = vpop.permute.xlu1 %1164  ;;  %v1163_v41 = vpop.permute.xlu0 %1162 }
 0x1c1   : > { %1238 = vst.msk [vmem:[#allocation2 + $0xb8] sm:$0xff] %vm1214_vm5, %v1165_v40  ;;  %1237 = vst.msk [vmem:[#allocation2 + $0xb0] sm:$0xff] %vm1214_vm5, %v1163_v41 }
 0x1c2   : > { %1722 = vrot.lane.b32.xlu1 %v3651_v36, %s2624_s21  ;;  %1720 = vrot.lane.b32.xlu0 %v3654_v37, %s2624_s21 }
 0x1c4   : > { %v1133_v50 = vpop.permute.xlu1 %1132  ;;  %v1131_v48 = vpop.permute.xlu0 %1130 }
 0x1c5   : > { %1222 = vst.msk [vmem:[#allocation2 + $0x38] sm:$0xff] %vm1214_vm5, %v1133_v50  ;;  %1221 = vst.msk [vmem:[#allocation2 + $0x30] sm:$0xff] %vm1214_vm5, %v1131_v48 }
 0x1c6   : > { %790 = vrot.lane.b32.xlu1 %v3493_v20, %s2619_s10  ;;  %788 = vrot.lane.b32.xlu0 %v3496_v22, %s2619_s10 }
 0x1c8   : > { %v1361_v49 = vpop.permute.xlu1 %1360  ;;  %v1359_v51 = vpop.permute.xlu0 %1358 }
 0x1c9   : > { %1434 = vst.msk [vmem:[#allocation2 + $0xb8] sm:$0xff] %vm1410_vm6, %v1361_v49  ;;  %1433 = vst.msk [vmem:[#allocation2 + $0xb0] sm:$0xff] %vm1410_vm6, %v1359_v51  ;;  %v2300_v49 = vld [vmem:[%s2712_s7 + $0x112] sm:$0xff]  ;;  %v2299_v51 = vld [vmem:[%s2712_s7 + $0x10a] sm:$0xff] }
 0x1ca   : > { %983 = vrot.lane.b32.xlu1 %v3511_v15, %s2620_s11  ;;  %981 = vrot.lane.b32.xlu0 %v3514_v14, %s2620_s11 }
 0x1cc   : > { %v1329_v58 = vpop.permute.xlu1 %1328  ;;  %v1327_v59 = vpop.permute.xlu0 %1326 }
 0x1cd   : > { %1418 = vst.msk [vmem:[#allocation2 + $0x38] sm:$0xff] %vm1410_vm6, %v1329_v58  ;;  %1417 = vst.msk [vmem:[#allocation2 + $0x30] sm:$0xff] %vm1410_vm6, %v1327_v59 }
 0x1ce   : > { %951 = vrot.lane.b32.xlu1 %v3525_v34, %s2620_s11  ;;  %949 = vrot.lane.b32.xlu0 %v3528_v35, %s2620_s11  ;;  %v2282_v34 = vld [vmem:[%s2712_s7 + $0x1b8] sm:$0xff]  ;;  %v2281_v35 = vld [vmem:[%s2712_s7 + $0x1b0] sm:$0xff] }
 0x1d0   : > { %v1554_v20 = vpop.permute.xlu1 %1553  ;;  %v1552_v22 = vpop.permute.xlu0 %1551 }
 0x1d1   : > { %1627 = vst.msk [vmem:[#allocation2 + $0xb8] sm:$0xff] %vm1603_vm7, %v1554_v20  ;;  %1626 = vst.msk [vmem:[#allocation2 + $0xb0] sm:$0xff] %vm1603_vm7, %v1552_v22 }
 0x1d2   : > { %1176 = vrot.lane.b32.xlu1 %v3539_v3, %s2621_s12  ;;  %1174 = vrot.lane.b32.xlu0 %v3542_v63, %s2621_s12  ;;  %v2266_v63 = vld [vmem:[%s2712_s7 + $0xf8] sm:$0xff] }
 0x1d4   : > { %v1522_v15 = vpop.permute.xlu1 %1521  ;;  %v1520_v14 = vpop.permute.xlu0 %1519 }
 0x1d5   : > { %1611 = vst.msk [vmem:[#allocation2 + $0x38] sm:$0xff] %vm1603_vm7, %v1522_v15  ;;  %1610 = vst.msk [vmem:[#allocation2 + $0x30] sm:$0xff] %vm1603_vm7, %v1520_v14  ;;  %v2348_v14 = vld [vmem:[%s2712_s7 + $0x1d4] sm:$0xff] }
 0x1d6   : > { %1144 = vrot.lane.b32.xlu1 %v3551_v17, %s2621_s12  ;;  %1142 = vrot.lane.b32.xlu0 %v3554_v38, %s2621_s12  ;;  %v2314_v38 = vld [vmem:[%s2712_s7 + $0x1ba] sm:$0xff] }
 0x1d8   : > { %v1747_v6 = vpop.permute.xlu1 %1746  ;;  %v1745_v3 = vpop.permute.xlu0 %1744 }
 0x1d9   : > { %1820 = vst.msk [vmem:[#allocation2 + $0xb8] sm:$0xff] %vm1796_vm8, %v1747_v6  ;;  %1819 = vst.msk [vmem:[#allocation2 + $0xb0] sm:$0xff] %vm1796_vm8, %v1745_v3  ;;  %v2332_v3 = vld [vmem:[%s2712_s7 + $0x114] sm:$0xff] }
 0x1da   : > { %1372 = vrot.lane.b32.xlu1 %v2282_v34, %s2622_s13  ;;  %1370 = vrot.lane.b32.xlu0 %v2281_v35, %s2622_s13  ;;  %v2347_v34 = vld [vmem:[%s2712_s7 + $0x1cc] sm:$0xff] }
 0x1dc   : > { %v1715_v16 = vpop.permute.xlu1 %1714  ;;  %v1713_v17 = vpop.permute.xlu0 %1712 }
 0x1dd   : > { %1804 = vst.msk [vmem:[#allocation2 + $0x38] sm:$0xff] %vm1796_vm8, %v1715_v16  ;;  %1803 = vst.msk [vmem:[#allocation2 + $0x30] sm:$0xff] %vm1796_vm8, %v1713_v17 }
 0x1de   : > { %1340 = vrot.lane.b32.xlu1 %v2266_v63, %s2622_s13  ;;  %1338 = vrot.lane.b32.xlu0 %v2265_v29, %s2622_s13  ;;  %v2331_v63 = vld [vmem:[%s2712_s7 + $0x10c] sm:$0xff]  ;;  %v3801_v29 = vld [vmem:[%s3940_s1] sm:$0xff] }
 0x1df   : > { %2420 = vmatprep.mubr.msk.f32.mxu0 %vm1862_vm9, %v3801_v29 }
 0x1e0   : > { %v783_v32 = vpop.permute.xlu1 %782  ;;  %v781_v46 = vpop.permute.xlu0 %780  ;;  %v1852_v47 = vld [vmem:[#allocation2 + $0xb0] sm:$0xff]  ;;  %v1853_v10 = vld [vmem:[#allocation2 + $0xb8] sm:$0xff] }
 0x1e1   : > { %854 = vst.msk [vmem:[#allocation2 + $0xc8] sm:$0xff] %vm828_vm3, %v783_v32  ;;  %853 = vst.msk [vmem:[#allocation2 + $0xc0] sm:$0xff] %vm828_vm3, %v781_v46  ;;  %v2440_v11 = vpack.c.bf16 %v1853_v10, %v1852_v47  ;;  %v2033_v32 = vld [vmem:[%s3941_s2] sm:$0xff]  ;;  %v2625_v47 = vmov 0  }
 0x1e2   : > { %1565 = vrot.lane.b32.xlu1 %v2314_v38, %s2623_s14  ;;  %1563 = vrot.lane.b32.xlu0 %v2313_v39, %s2623_s14  ;;  %v2041_v46 = vld [vmem:[%s3942_s3] sm:$0xff] }
 0x1e3   : > { %2442 = vmatprep.subr.msk.bf16.mxu0 %vm3418_vm10, %v2440_v11  ;;  %2535 = vset.pattern.permute.xlu0 %v2625_v47 }
 0x1e4   : > { %v976_v56 = vpop.permute.xlu1 %975  ;;  %v974_v7 = vpop.permute.xlu0 %973  ;;  %v1836_v30 = vld [vmem:[#allocation2 + $0x30] sm:$0xff]  ;;  %v1837_v57 = vld [vmem:[#allocation2 + $0x38] sm:$0xff]  ;;  %2536 = vset.pattern.permute.xlu1 %v2625_v47 }
 0x1e5   : > { %1047 = vst.msk [vmem:[#allocation2 + $0xc8] sm:$0xff] %vm1021_vm4, %v976_v56  ;;  %1046 = vst.msk [vmem:[#allocation2 + $0xc0] sm:$0xff] %vm1021_vm4, %v974_v7  ;;  %v2443_v0 = vpack.c.bf16 %v1837_v57, %v1836_v30 }
 0x1e6   : > { %1533 = vrot.lane.b32.xlu1 %v2298_v4, %s2623_s14  ;;  %1531 = vrot.lane.b32.xlu0 %v2297_v5, %s2623_s14 }
 0x1e7   : > { %2445 = vmatpush3.bf16.xpose.msk.msra.mxu0 %vm3418_vm10, %v2443_v0 }
 0x1e8   : > { %v944_v42 = vpop.permute.xlu1 %943  ;;  %v942_v62 = vpop.permute.xlu0 %941 }
 0x1e9   : > { %1031 = vst.msk [vmem:[#allocation2 + $0x48] sm:$0xff] %vm1021_vm4, %v944_v42  ;;  %1030 = vst.msk [vmem:[#allocation2 + $0x40] sm:$0xff] %vm1021_vm4, %v942_v62 }
 0x1ea   : > { %1758 = vrot.lane.b32.xlu1 %v2346_v33, %s2624_s21  ;;  %1756 = vrot.lane.b32.xlu0 %v2345_v54, %s2624_s21 }
 0x1ec   : > { %v1169_v55 = vpop.permute.xlu1 %1168  ;;  %v1167_v12 = vpop.permute.xlu0 %1166 }
 0x1ed   : > { %1240 = vst.msk [vmem:[#allocation2 + $0xc8] sm:$0xff] %vm1214_vm5, %v1169_v55  ;;  %1239 = vst.msk [vmem:[#allocation2 + $0xc0] sm:$0xff] %vm1214_vm5, %v1167_v12 }
 0x1ee   : > { %1726 = vrot.lane.b32.xlu1 %v2330_v44, %s2624_s21  ;;  %1724 = vrot.lane.b32.xlu0 %v2329_v43, %s2624_s21 }
 0x1f0   : > { %v1137_v13 = vpop.permute.xlu1 %1136  ;;  %v1135_v1 = vpop.permute.xlu0 %1134 }
 0x1f1   : > { %1224 = vst.msk [vmem:[#allocation2 + $0x48] sm:$0xff] %vm1214_vm5, %v1137_v13  ;;  %1223 = vst.msk [vmem:[#allocation2 + $0x40] sm:$0xff] %vm1214_vm5, %v1135_v1 }
 0x1f2   : > { %794 = vrot.lane.b32.xlu1 %v3593_v27, %s2619_s10  ;;  %792 = vrot.lane.b32.xlu0 %v3596_v45, %s2619_s10 }
 0x1f4   : > { %v1365_v18 = vpop.permute.xlu1 %1364  ;;  %v1363_v2 = vpop.permute.xlu0 %1362 }
 0x1f5   : > { %1436 = vst.msk [vmem:[#allocation2 + $0xc8] sm:$0xff] %vm1410_vm6, %v1365_v18  ;;  %1435 = vst.msk [vmem:[#allocation2 + $0xc0] sm:$0xff] %vm1410_vm6, %v1363_v2 }
 0x1f6   : > { %987 = vrot.lane.b32.xlu1 %v3611_v8, %s2620_s11  ;;  %985 = vrot.lane.b32.xlu0 %v3614_v9, %s2620_s11 }
 0x1f8   : > { %v1333_v61 = vpop.permute.xlu1 %1332  ;;  %v1331_v24 = vpop.permute.xlu0 %1330 }
 0x1f9   : > { %1420 = vst.msk [vmem:[#allocation2 + $0x48] sm:$0xff] %vm1410_vm6, %v1333_v61  ;;  %1419 = vst.msk [vmem:[#allocation2 + $0x40] sm:$0xff] %vm1410_vm6, %v1331_v24 }
 0x1fa   : > { %955 = vrot.lane.b32.xlu1 %v3625_v21, %s2620_s11  ;;  %953 = vrot.lane.b32.xlu0 %v3628_v60, %s2620_s11  ;;  %v2284_v21 = vld [vmem:[%s2712_s7 + $0x1d0] sm:$0xff]  ;;  %v2283_v60 = vld [vmem:[%s2712_s7 + $0x1c8] sm:$0xff] }
 0x1fc   : > { %v1558_v27 = vpop.permute.xlu1 %1557  ;;  %v1556_v45 = vpop.permute.xlu0 %1555 }
 0x1fd   : > { %1629 = vst.msk [vmem:[#allocation2 + $0xc8] sm:$0xff] %vm1603_vm7, %v1558_v27  ;;  %1628 = vst.msk [vmem:[#allocation2 + $0xc0] sm:$0xff] %vm1603_vm7, %v1556_v45 }
 0x1fe   : > { %1180 = vrot.lane.b32.xlu1 %v3639_v19, %s2621_s12  ;;  %1178 = vrot.lane.b32.xlu0 %v3642_v23, %s2621_s12  ;;  %v2267_v19 = vld [vmem:[%s2712_s7 + $0x108] sm:$0xff] }
 0x200   : > { %v1526_v8 = vpop.permute.xlu1 %1525  ;;  %v1524_v9 = vpop.permute.xlu0 %1523 }
 0x201   : > { %1613 = vst.msk [vmem:[#allocation2 + $0x48] sm:$0xff] %vm1603_vm7, %v1526_v8  ;;  %1612 = vst.msk [vmem:[#allocation2 + $0x40] sm:$0xff] %vm1603_vm7, %v1524_v9 }
 0x202   : > { %1148 = vrot.lane.b32.xlu1 %v3651_v36, %s2621_s12  ;;  %1146 = vrot.lane.b32.xlu0 %v3654_v37, %s2621_s12  ;;  %v2315_v36 = vld [vmem:[%s2712_s7 + $0x1ca] sm:$0xff]  ;;  %s2155_s7 = sshll.u32 %s202_s6, 4 }
 0x203   : > { %s204_s9 = scalar_lea.vmem [#allocation3], %s2155_s7 }
 0x204   : > { %v1751_v25 = vpop.permute.xlu1 %1750  ;;  %v1749_v28 = vpop.permute.xlu0 %1748  ;;  %s2070_s10 = sshll.u32 %s204_s9, 4  ;;  %s3894_s10 = int_to_ptr.vmem [resolvable:$true] %s2070_s10 }
 0x205   : > { %1822 = vst.msk [vmem:[#allocation2 + $0xc8] sm:$0xff] %vm1796_vm8, %v1751_v25  ;;  %1821 = vst.msk [vmem:[#allocation2 + $0xc0] sm:$0xff] %vm1796_vm8, %v1749_v28  ;;  %p2544_p1 = scmp.lt.s32.totalorder %s3894_s10, %s2542_s22 }
 0x206   : > { %1376 = vrot.lane.b32.xlu1 %v2284_v21, %s2622_s13  ;;  %1374 = vrot.lane.b32.xlu0 %v2283_v60, %s2622_s13 }
 0x208   : > { %v1719_v23 = vpop.permute.xlu1 %1718  ;;  %v1717_v52 = vpop.permute.xlu0 %1716 }
 0x209   : > { %1806 = vst.msk [vmem:[#allocation2 + $0x48] sm:$0xff] %vm1796_vm8, %v1719_v23  ;;  %1805 = vst.msk [vmem:[#allocation2 + $0x40] sm:$0xff] %vm1796_vm8, %v1717_v52 }
 0x20a   : > { %1344 = vrot.lane.b32.xlu1 %v2268_v31, %s2622_s13  ;;  %1342 = vrot.lane.b32.xlu0 %v2267_v19, %s2622_s13  ;;  %s3892_s13 = scalar_lea.hbm %s3943_s4, %s2387_s8 }
 0x20c   : > { %v787_v37 = vpop.permute.xlu1 %786  ;;  %v785_v40 = vpop.permute.xlu0 %784  ;;  %v1854_v41 = vld [vmem:[#allocation2 + $0xc0] sm:$0xff]  ;;  %v1855_v50 = vld [vmem:[#allocation2 + $0xc8] sm:$0xff] }
 0x20d   : > { %856 = vst.msk [vmem:[#allocation2 + $0xd8] sm:$0xff] %vm828_vm3, %v787_v37  ;;  %855 = vst.msk [vmem:[#allocation2 + $0xd0] sm:$0xff] %vm828_vm3, %v785_v40  ;;  %v2446_v48 = vpack.c.bf16 %v1855_v50, %v1854_v41 }
 0x20e   : > { %1569 = vrot.lane.b32.xlu1 %v2316_v53, %s2623_s14  ;;  %1567 = vrot.lane.b32.xlu0 %v2315_v36, %s2623_s14 }
 0x20f   : > { %2448 = vmatprep.subr.msk.bf16.mxu0 %vm3418_vm10, %v2446_v48 }
 0x210   : > { %v980_v58 = vpop.permute.xlu1 %979  ;;  %v978_v59 = vpop.permute.xlu0 %977  ;;  %v1838_v20 = vld [vmem:[#allocation2 + $0x40] sm:$0xff]  ;;  %v1839_v22 = vld [vmem:[#allocation2 + $0x48] sm:$0xff] }
 0x211   : > { %1049 = vst.msk [vmem:[#allocation2 + $0xd8] sm:$0xff] %vm1021_vm4, %v980_v58  ;;  %1048 = vst.msk [vmem:[#allocation2 + $0xd0] sm:$0xff] %vm1021_vm4, %v978_v59  ;;  %v2449_v15 = vpack.c.bf16 %v1839_v22, %v1838_v20 }
 0x212   : > { %1537 = vrot.lane.b32.xlu1 %v2300_v49, %s2623_s14  ;;  %1535 = vrot.lane.b32.xlu0 %v2299_v51, %s2623_s14  ;;  %s2054_s14 = scalar_lea.sflag [#allocation4], %s202_s6 }
 0x213   : > { %2451 = vmatpush3.bf16.xpose.msk.msra.mxu0 %vm3418_vm10, %v2449_v15 }
 0x214   : > { %v948_v35 = vpop.permute.xlu1 %947  ;;  %v946_v6 = vpop.permute.xlu0 %945 }
 0x215   : > { %1033 = vst.msk [vmem:[#allocation2 + $0x58] sm:$0xff] %vm1021_vm4, %v948_v35  ;;  %1032 = vst.msk [vmem:[#allocation2 + $0x50] sm:$0xff] %vm1021_vm4, %v946_v6 }
 0x216   : > { %1762 = vrot.lane.b32.xlu1 %v2348_v14, %s2624_s21  ;;  %1760 = vrot.lane.b32.xlu0 %v2347_v34, %s2624_s21 }
 0x218   : > { %v1173_v16 = vpop.permute.xlu1 %1172  ;;  %v1171_v17 = vpop.permute.xlu0 %1170 }
 0x219   : > { %1242 = vst.msk [vmem:[#allocation2 + $0xd8] sm:$0xff] %vm1214_vm5, %v1173_v16  ;;  %1241 = vst.msk [vmem:[#allocation2 + $0xd0] sm:$0xff] %vm1214_vm5, %v1171_v17 }
 0x21a   : > { %1730 = vrot.lane.b32.xlu1 %v2332_v3, %s2624_s21  ;;  %1728 = vrot.lane.b32.xlu0 %v2331_v63, %s2624_s21  ;;  %s2537_s21 = scalar_lea.vmem %s3894_s10, 256 }
 0x21b   : > { %p2538_p12 = scmp.ne.s32.totalorder %s3894_s10, %s2537_s21  ;;  %p2545_p2 = scmp.lt.s32.totalorder %s2543_s24, %s2537_s21 }
 0x21c   : > { %v1141_v38 = vpop.permute.xlu1 %1140  ;;  %v1139_v39 = vpop.permute.xlu0 %1138 }
 0x21d   : > { %1226 = vst.msk [vmem:[#allocation2 + $0x58] sm:$0xff] %vm1214_vm5, %v1141_v38  ;;  %1225 = vst.msk [vmem:[#allocation2 + $0x50] sm:$0xff] %vm1214_vm5, %v1139_v39  ;;  %p2539_p13 = pnand %p2538_p12, %p2692_p4  ;;  %p2546_p3 = por %p2545_p2, %p2544_p1 }
 0x21e   : > { %2036 = vperm.xlu0 %2535, %v2033_v32   ;;  %2044 = vperm.xlu1 %2536, %v2041_v46  }
 0x21f   : > { %p2540_p0 = pneg %p2539_p13 }
 0x220   : > { %v1369_v10 = vpop.permute.xlu1 %1368  ;;  %v1367_v11 = vpop.permute.xlu0 %1366 }
 0x221   : > { %1438 = vst.msk [vmem:[#allocation2 + $0xd8] sm:$0xff] %vm1410_vm6, %v1369_v10  ;;  %1437 = vst.msk [vmem:[#allocation2 + $0xd0] sm:$0xff] %vm1410_vm6, %v1367_v11  ;;  %p2547_p5 = pnand %p2546_p3, %p2540_p0 }
 0x224   : > { %v1337_v4 = vpop.permute.xlu1 %1336  ;;  %v1335_v5 = vpop.permute.xlu0 %1334 }
 0x225   : > { %1422 = vst.msk [vmem:[#allocation2 + $0x58] sm:$0xff] %vm1410_vm6, %v1337_v4  ;;  %1421 = vst.msk [vmem:[#allocation2 + $0x50] sm:$0xff] %vm1410_vm6, %v1335_v5 }
 0x228   : > { %v1562_v56 = vpop.permute.xlu1 %1561  ;;  %v1560_v7 = vpop.permute.xlu0 %1559 }
 0x229   : > { %1631 = vst.msk [vmem:[#allocation2 + $0xd8] sm:$0xff] %vm1603_vm7, %v1562_v56  ;;  %1630 = vst.msk [vmem:[#allocation2 + $0xd0] sm:$0xff] %vm1603_vm7, %v1560_v7 }
 0x22c   : > { %v1530_v30 = vpop.permute.xlu1 %1529  ;;  %v1528_v57 = vpop.permute.xlu0 %1527 }
 0x22d   : > { %1615 = vst.msk [vmem:[#allocation2 + $0x58] sm:$0xff] %vm1603_vm7, %v1530_v30  ;;  %1614 = vst.msk [vmem:[#allocation2 + $0x50] sm:$0xff] %vm1603_vm7, %v1528_v57 }
 0x230   : > { %v1755_v0 = vpop.permute.xlu1 %1754  ;;  %v1753_v33 = vpop.permute.xlu0 %1752 }
 0x231   : > { %1824 = vst.msk [vmem:[#allocation2 + $0xd8] sm:$0xff] %vm1796_vm8, %v1755_v0  ;;  %1823 = vst.msk [vmem:[#allocation2 + $0xd0] sm:$0xff] %vm1796_vm8, %v1753_v33 }
 0x234   : > { %v1723_v54 = vpop.permute.xlu1 %1722  ;;  %v1721_v42 = vpop.permute.xlu0 %1720 }
 0x235   : > { %1808 = vst.msk [vmem:[#allocation2 + $0x58] sm:$0xff] %vm1796_vm8, %v1723_v54  ;;  %1807 = vst.msk [vmem:[#allocation2 + $0x50] sm:$0xff] %vm1796_vm8, %v1721_v42 }
 0x238   : > { %v791_v62 = vpop.permute.xlu1 %790  ;;  %v789_v44 = vpop.permute.xlu0 %788  ;;  %v1856_v43 = vld [vmem:[#allocation2 + $0xd0] sm:$0xff]  ;;  %v1857_v55 = vld [vmem:[#allocation2 + $0xd8] sm:$0xff] }
 0x239   : > { %858 = vst.msk [vmem:[#allocation2 + $0xe8] sm:$0xff] %vm828_vm3, %v791_v62  ;;  %857 = vst.msk [vmem:[#allocation2 + $0xe0] sm:$0xff] %vm828_vm3, %v789_v44  ;;  %v2452_v12 = vpack.c.bf16 %v1857_v55, %v1856_v43 }
 0x23b   : > { %2454 = vmatprep.subr.msk.bf16.mxu0 %vm3418_vm10, %v2452_v12 }
 0x23c   : > { %v984_v13 = vpop.permute.xlu1 %983  ;;  %v982_v1 = vpop.permute.xlu0 %981  ;;  %v1840_v18 = vld [vmem:[#allocation2 + $0x50] sm:$0xff]  ;;  %v1841_v2 = vld [vmem:[#allocation2 + $0x58] sm:$0xff] }
 0x23d   : > { %1051 = vst.msk [vmem:[#allocation2 + $0xe8] sm:$0xff] %vm1021_vm4, %v984_v13  ;;  %1050 = vst.msk [vmem:[#allocation2 + $0xe0] sm:$0xff] %vm1021_vm4, %v982_v1  ;;  %v2455_v61 = vpack.c.bf16 %v1841_v2, %v1840_v18 }
 0x23f   : > { %2457 = vmatpush3.bf16.xpose.msk.msra.mxu0 %vm3418_vm10, %v2455_v61 }
 0x240   : > { %v952_v24 = vpop.permute.xlu1 %951  ;;  %v950_v27 = vpop.permute.xlu0 %949 }
 0x241   : > { %1035 = vst.msk [vmem:[#allocation2 + $0x68] sm:$0xff] %vm1021_vm4, %v952_v24  ;;  %1034 = vst.msk [vmem:[#allocation2 + $0x60] sm:$0xff] %vm1021_vm4, %v950_v27 }
 0x244   : > { %v1177_v45 = vpop.permute.xlu1 %1176  ;;  %v1175_v8 = vpop.permute.xlu0 %1174 }
 0x245   : > { %1244 = vst.msk [vmem:[#allocation2 + $0xe8] sm:$0xff] %vm1214_vm5, %v1177_v45  ;;  %1243 = vst.msk [vmem:[#allocation2 + $0xe0] sm:$0xff] %vm1214_vm5, %v1175_v8 }
 0x248   : > { %v1145_v9 = vpop.permute.xlu1 %1144  ;;  %v1143_v21 = vpop.permute.xlu0 %1142 }
 0x249   : > { %1228 = vst.msk [vmem:[#allocation2 + $0x68] sm:$0xff] %vm1214_vm5, %v1145_v9  ;;  %1227 = vst.msk [vmem:[#allocation2 + $0x60] sm:$0xff] %vm1214_vm5, %v1143_v21 }
 0x24c   : > { %v1373_v60 = vpop.permute.xlu1 %1372  ;;  %v1371_v25 = vpop.permute.xlu0 %1370 }
 0x24d   : > { %1440 = vst.msk [vmem:[#allocation2 + $0xe8] sm:$0xff] %vm1410_vm6, %v1373_v60  ;;  %1439 = vst.msk [vmem:[#allocation2 + $0xe0] sm:$0xff] %vm1410_vm6, %v1371_v25 }
 0x250   : > { %v1341_v28 = vpop.permute.xlu1 %1340  ;;  %v1339_v31 = vpop.permute.xlu0 %1338 }
 0x251   : > { %1424 = vst.msk [vmem:[#allocation2 + $0x68] sm:$0xff] %vm1410_vm6, %v1341_v28  ;;  %1423 = vst.msk [vmem:[#allocation2 + $0x60] sm:$0xff] %vm1410_vm6, %v1339_v31 }
 0x254   : > { %v1566_v19 = vpop.permute.xlu1 %1565  ;;  %v1564_v23 = vpop.permute.xlu0 %1563 }
 0x255   : > { %1633 = vst.msk [vmem:[#allocation2 + $0xe8] sm:$0xff] %vm1603_vm7, %v1566_v19  ;;  %1632 = vst.msk [vmem:[#allocation2 + $0xe0] sm:$0xff] %vm1603_vm7, %v1564_v23 }
 0x258   : > { %v1534_v52 = vpop.permute.xlu1 %1533  ;;  %v1532_v53 = vpop.permute.xlu0 %1531 }
 0x259   : > { %1617 = vst.msk [vmem:[#allocation2 + $0x68] sm:$0xff] %vm1603_vm7, %v1534_v52  ;;  %1616 = vst.msk [vmem:[#allocation2 + $0x60] sm:$0xff] %vm1603_vm7, %v1532_v53 }
 0x25c   : > { %v1759_v36 = vpop.permute.xlu1 %1758  ;;  %v1757_v37 = vpop.permute.xlu0 %1756 }
 0x25d   : > { %1826 = vst.msk [vmem:[#allocation2 + $0xe8] sm:$0xff] %vm1796_vm8, %v1759_v36  ;;  %1825 = vst.msk [vmem:[#allocation2 + $0xe0] sm:$0xff] %vm1796_vm8, %v1757_v37 }
 0x260   : > { %v1727_v40 = vpop.permute.xlu1 %1726  ;;  %v1725_v41 = vpop.permute.xlu0 %1724 }
 0x261   : > { %1810 = vst.msk [vmem:[#allocation2 + $0x68] sm:$0xff] %vm1796_vm8, %v1727_v40  ;;  %1809 = vst.msk [vmem:[#allocation2 + $0x60] sm:$0xff] %vm1796_vm8, %v1725_v41 }
 0x264   : > { %v795_v50 = vpop.permute.xlu1 %794  ;;  %v793_v48 = vpop.permute.xlu0 %792  ;;  %v1858_v49 = vld [vmem:[#allocation2 + $0xe0] sm:$0xff]  ;;  %v1859_v51 = vld [vmem:[#allocation2 + $0xe8] sm:$0xff] }
 0x265   : > { %860 = vst.msk [vmem:[#allocation2 + $0xf8] sm:$0xff] %vm828_vm3, %v795_v50  ;;  %859 = vst.msk [vmem:[#allocation2 + $0xf0] sm:$0xff] %vm828_vm3, %v793_v48  ;;  %v2458_v58 = vpack.c.bf16 %v1859_v51, %v1858_v49 }
 0x267   : > { %2460 = vmatprep.subr.msk.bf16.mxu0 %vm3418_vm10, %v2458_v58 }
 0x268   : > { %v988_v59 = vpop.permute.xlu1 %987  ;;  %v986_v20 = vpop.permute.xlu0 %985  ;;  %v1842_v22 = vld [vmem:[#allocation2 + $0x60] sm:$0xff]  ;;  %v1843_v15 = vld [vmem:[#allocation2 + $0x68] sm:$0xff] }
 0x269   : > { %1053 = vst.msk [vmem:[#allocation2 + $0xf8] sm:$0xff] %vm1021_vm4, %v988_v59  ;;  %1052 = vst.msk [vmem:[#allocation2 + $0xf0] sm:$0xff] %vm1021_vm4, %v986_v20  ;;  %v2461_v14 = vpack.c.bf16 %v1843_v15, %v1842_v22 }
 0x26b   : > { %2463 = vmatpush3.bf16.xpose.msk.msra.mxu0 %vm3418_vm10, %v2461_v14 }
 0x26c   : > { %v956_v34 = vpop.permute.xlu1 %955  ;;  %v954_v35 = vpop.permute.xlu0 %953 }
 0x26d   : > { %1037 = vst.msk [vmem:[#allocation2 + $0x78] sm:$0xff] %vm1021_vm4, %v956_v34  ;;  %1036 = vst.msk [vmem:[#allocation2 + $0x70] sm:$0xff] %vm1021_vm4, %v954_v35 }
 0x270   : > { %v1181_v6 = vpop.permute.xlu1 %1180  ;;  %v1179_v3 = vpop.permute.xlu0 %1178 }
 0x271   : > { %1246 = vst.msk [vmem:[#allocation2 + $0xf8] sm:$0xff] %vm1214_vm5, %v1181_v6  ;;  %1245 = vst.msk [vmem:[#allocation2 + $0xf0] sm:$0xff] %vm1214_vm5, %v1179_v3 }
 0x274   : > { %v1149_v63 = vpop.permute.xlu1 %1148  ;;  %v1147_v16 = vpop.permute.xlu0 %1146 }
 0x275   : > { %1230 = vst.msk [vmem:[#allocation2 + $0x78] sm:$0xff] %vm1214_vm5, %v1149_v63  ;;  %1229 = vst.msk [vmem:[#allocation2 + $0x70] sm:$0xff] %vm1214_vm5, %v1147_v16 }
 0x278   : > { %v1377_v17 = vpop.permute.xlu1 %1376  ;;  %v1375_v38 = vpop.permute.xlu0 %1374 }
 0x279   : > { %1442 = vst.msk [vmem:[#allocation2 + $0xf8] sm:$0xff] %vm1410_vm6, %v1377_v17  ;;  %1441 = vst.msk [vmem:[#allocation2 + $0xf0] sm:$0xff] %vm1410_vm6, %v1375_v38 }
 0x27c   : > { %v1345_v39 = vpop.permute.xlu1 %1344  ;;  %v1343_v32 = vpop.permute.xlu0 %1342 }
 0x27d   : > { %1426 = vst.msk [vmem:[#allocation2 + $0x78] sm:$0xff] %vm1410_vm6, %v1345_v39  ;;  %1425 = vst.msk [vmem:[#allocation2 + $0x70] sm:$0xff] %vm1410_vm6, %v1343_v32 }
 0x280   : > { %v1570_v46 = vpop.permute.xlu1 %1569  ;;  %v1568_v47 = vpop.permute.xlu0 %1567 }
 0x281   : > { %1635 = vst.msk [vmem:[#allocation2 + $0xf8] sm:$0xff] %vm1603_vm7, %v1570_v46  ;;  %1634 = vst.msk [vmem:[#allocation2 + $0xf0] sm:$0xff] %vm1603_vm7, %v1568_v47 }
 0x284   : > { %v1538_v10 = vpop.permute.xlu1 %1537  ;;  %v1536_v11 = vpop.permute.xlu0 %1535 }
 0x285   : > { %1619 = vst.msk [vmem:[#allocation2 + $0x78] sm:$0xff] %vm1603_vm7, %v1538_v10  ;;  %1618 = vst.msk [vmem:[#allocation2 + $0x70] sm:$0xff] %vm1603_vm7, %v1536_v11 }
 0x288   : > { %v1763_v4 = vpop.permute.xlu1 %1762  ;;  %v1761_v5 = vpop.permute.xlu0 %1760 }
 0x289   : > { %1828 = vst.msk [vmem:[#allocation2 + $0xf8] sm:$0xff] %vm1796_vm8, %v1763_v4  ;;  %1827 = vst.msk [vmem:[#allocation2 + $0xf0] sm:$0xff] %vm1796_vm8, %v1761_v5 }
 0x28c   : > { %v1731_v56 = vpop.permute.xlu1 %1730  ;;  %v1729_v7 = vpop.permute.xlu0 %1728 }
 0x28d   : > { %1812 = vst.msk [vmem:[#allocation2 + $0x78] sm:$0xff] %vm1796_vm8, %v1731_v56  ;;  %1811 = vst.msk [vmem:[#allocation2 + $0x70] sm:$0xff] %vm1796_vm8, %v1729_v7 }
 0x290   : > { %v1860_v30 = vld [vmem:[#allocation2 + $0xf0] sm:$0xff]  ;;  %v1861_v57 = vld [vmem:[#allocation2 + $0xf8] sm:$0xff] }
 0x291   : > { %v2464_v0 = vpack.c.bf16 %v1861_v57, %v1860_v30 }
 0x293   : > { %2466 = vmatprep.subr.msk.bf16.mxu0 %vm3418_vm10, %v2464_v0 }
 0x294   : > { %v1844_v33 = vld [vmem:[#allocation2 + $0x70] sm:$0xff]  ;;  %v1845_v54 = vld [vmem:[#allocation2 + $0x78] sm:$0xff] }
 0x295   : > { %v2467_v42 = vpack.c.bf16 %v1845_v54, %v1844_v33 }
 0x297   : > { %2469 = vmatpush3.bf16.xpose.msk.msra.mxu0 %vm3418_vm10, %v2467_v42 }
 0x29d   : > { %v2037_v62 = vpop.permute.xlu0 %2036  ;;  %v2045_v43 = vpop.permute.xlu1 %2044 }
 0x29e   : > { %2421 = vmatmul.mubr.msk.f32.vlgmr.msra.gmra.mrb[0].mxu0 %vm1862_vm9, %v3801_v29 }
 0x371   : > { %v2028_v44 = vpop.f32.mrb[0].mxu0 }
 0x372   : > { %v2039_v55 = vmul.f32 %v2037_v62, %v2028_v44  ;;  %v2030_v12 = vpop.f32.mrb[1].mxu0 }
 0x373   : > { %v2040_v13 = vmul.f32 %v2037_v62, %v2030_v12 }
 0x374   : > { %v2047_v1 = vadd.f32 %v2045_v43, %v2039_v55 }
 0x375   : > { %v2048_v18 = vadd.f32 %v2045_v43, %v2040_v13 }
 0x376   : > { %v2049_v2 = vmax.f32 %v2047_v1, 0.0 }
 0x377   : > { %v2050_v26 = vmax.f32 %v2048_v18, 0.0 }
 0x378   : > { %2051 = vst [vmem:[%s204_s9] sm:$0xff] %v2049_v2 }
 0x379   : > { %2052 = vst [vmem:[%s204_s9 + $0x8] sm:$0xff] %v2050_v26 }
 0x37a   : > { %2550 = shalt.err (!%p2547_p5)
}
 0x37b   : > { %s2551_s26 = scalar_lea.hbm %s3892_s13, 256  ;;  %s2555_s5 = scalar_lea.hbm %s3943_s4, 512 }
 0x37c   : > { %p2552_p6 = scmp.ne.s32.totalorder %s3892_s13, %s2551_s26  ;;  %p2556_p10 = scmp.lt.u32.totalorder %s3892_s13, %s3943_s4 }
 0x37d   : > { %p2557_p11 = scmp.lt.u32.totalorder %s2555_s5, %s2551_s26  ;;  %p2559_p13 = scmp.lt.u32.totalorder %s2551_s26, %s3892_s13 }
 0x37e   : > { %p2553_p7 = pnand %p2552_p6, %p2692_p4 }
 0x37f   : > { %p2558_p12 = por %p2557_p11, %p2556_p10 }
 0x380   : > { %p2554_p9 = pneg %p2553_p7 }
 0x381   : > { %p2560_p0 = por %p2559_p13, %p2558_p12 }
 0x383   : > { %p2561_p1 = pnand %p2560_p0, %p2554_p9 }
 0x385   : > { %2564 = shalt.err (!%p2561_p1)
}
 0x386   : > { %2471 = dma.vmem_to_hbm [thread:$0]  (%p2692_p4), %s3894_s10, 256, %s3892_s13, %s2054_s14  }
 0x387 PF: > { %p2477_p2 = scmp.ge.s32.totalorder %s2615_s20, 2  ;;  %s2082_s8 = sand.u32 1, %s2595_s15  }
 0x388   : > { %s2083_s9 = scalar_lea.sflag [#allocation4], %s2082_s8 }
 0x389   : > { %p2474_p3 = pnand %p2477_p2, %p2699_p8 }
 0x38b   : > { %2590 = dma.done.wait (!%p2474_p3), %s2083_s9, 256  }
 0x38c   : > { %2592 = vsyncadd (!%p2474_p3), %s2083_s9, 4294967040  ;;  %s17_s20 = sadd.s32 1, %s2615_s20   ;;  %s3982_s15 = smov %s2599_s16 }
 0x38d   : > { %p14_p5 = scmp.ge.s32.totalorder %s17_s20, 4   ;;  %s3983_s16 = smov %s2603_s17 }
 0x38e   : > { %s3984_s17 = smov %s2705_s28  ;;  %s3985_s18 = smov %s2611_s19 }
 0x38f   : > { %s3986_s19 = smov %s3988_s23  ;;  %16 = sbr.rel (!%p14_p5) target bundleno = 4 (0x4), region = 74 }
 0x396   :  { %2088 = vsyncpa [#allocation4], 1 }
 0x397   :  { %2090 = vsyncpa [#allocation4 + $0x1], 1 }

</bundles_post_ra>
